<compile_context>
chip_gen: v6e
topology: v6e:2x2x1
jax: 0.10.0
libtpu: 0.0.40
codegen_flags: <defaults>
</compile_context>

<pallas_src>
import math
import functools

import jax
import jax.numpy as jnp
from jax import lax
from jax.experimental import pallas as pl
from jax.experimental.pallas import tpu as pltpu


def _flash_sdp_kernel(q_ref, k_ref, v_ref, o_ref, qs_sc, m_sc, l_sc, acc_sc,
                      *, scale, use_mask, tq, tk):
    qi = pl.program_id(1)
    ki = pl.program_id(2)
    nk = pl.num_programs(2)

    @pl.when(ki == 0)
    def _init():
        # Q block is resident across the ki ("arbitrary") axis: fold the
        # 1/sqrt(dk) scale into it exactly once per q-tile.
        qs_sc[...] = q_ref[...] * scale
        m_sc[...] = jnp.full_like(m_sc, -jnp.inf)
        l_sc[...] = jnp.zeros_like(l_sc)
        acc_sc[...] = jnp.zeros_like(acc_sc)

    qs = qs_sc[...]           # (tq, D) native dtype, pre-scaled
    k = k_ref[...]            # (tk, D)
    v = v_ref[...]            # (tk, D)

    # scores tile = (Q*scale) @ K^T  -> (tq, tk), f32 MXU accumulation.
    s = lax.dot_general(qs, k, (((1,), (1,)), ((), ())),
                        preferred_element_type=jnp.float32)

    # --- online softmax update (all f32) ---
    m_prev = m_sc[...]                                         # (tq, 1)
    m_new = jnp.maximum(m_prev, jnp.max(s, axis=-1, keepdims=True))
    alpha = jnp.exp(m_prev - m_new)                            # (tq, 1)
    p = jnp.exp(s - m_new)                                     # (tq, tk)

    # tril is applied AFTER softmax in the reference (no renormalization), so
    # the normalizer l accumulates the UNMASKED probabilities.
    l_sc[...] = alpha * l_sc[...] + jnp.sum(p, axis=-1, keepdims=True)
    m_sc[...] = m_new

    if use_mask:
        q_start = qi * tq
        kv_start = ki * tk
        # Tile classification relative to the diagonal (mutually exclusive).
        fully_below = (kv_start + (tk - 1)) <= q_start          # no masking needed
        fully_above = kv_start > (q_start + (tq - 1))           # contributes nothing
        boundary = jnp.logical_and(jnp.logical_not(fully_below),
                                   jnp.logical_not(fully_above))

        @pl.when(fully_below)
        def _below():
            acc_sc[...] = alpha * acc_sc[...] + jnp.dot(
                p.astype(v.dtype), v, preferred_element_type=jnp.float32)

        @pl.when(boundary)
        def _boundary():
            # Grid-invariant iota difference; only one compare against a scalar
            # per boundary tile.
            diff = (lax.broadcasted_iota(jnp.int32, (tq, tk), 1)
                    - lax.broadcasted_iota(jnp.int32, (tq, tk), 0))
            p_m = jnp.where(diff <= (q_start - kv_start), p, 0.0)
            acc_sc[...] = alpha * acc_sc[...] + jnp.dot(
                p_m.astype(v.dtype), v, preferred_element_type=jnp.float32)

        @pl.when(fully_above)
        def _above():
            # No contribution to the output, but acc must track the new max.
            acc_sc[...] = alpha * acc_sc[...]
    else:
        acc_sc[...] = alpha * acc_sc[...] + jnp.dot(
            p.astype(v.dtype), v, preferred_element_type=jnp.float32)

    @pl.when(ki == nk - 1)
    def _finalize():
        inv_l = pl.reciprocal(l_sc[...], approx=True)          # EUP slot
        o_ref[...] = (acc_sc[...] * inv_l).astype(o_ref.dtype)


def _sublane_min(dtype):
    """Minimum sublane multiple for a dtype: 8 (f32), 16 (bf16), 32 (int8/fp8)."""
    return max(8, 32 // jnp.dtype(dtype).itemsize)


def _pick_tile(s, target, sublane):
    """Largest divisor of s that is <= target and a multiple of `sublane`;
    falls back to the full extent (always a legal block)."""
    t = min(s, target)
    for cand in range(t, sublane - 1, -1):
        if s % cand == 0 and cand % sublane == 0:
            return cand
    return s


def scaled_dot_product(queries, keys, values, *, embed_len, mask=None,
                       block_q=256, block_kv=256):
    """Pallas TPU implementation of ScaledDotProduct.forward.

    queries, keys, values: [B, S, D] with D == embed_len.
    mask: if not None, applies torch.tril AFTER softmax (matches the reference).
    """
    B, S, D = queries.shape
    assert D == embed_len
    assert keys.shape == (B, S, D) and values.shape == (B, S, D)

    sub = _sublane_min(queries.dtype)
    tq = _pick_tile(S, block_q, sub)
    tk = _pick_tile(S, block_kv, sub)
    grid = (B, S // tq, S // tk)

    kernel = functools.partial(
        _flash_sdp_kernel,
        scale=1.0 / math.sqrt(embed_len),
        use_mask=(mask is not None),
        tq=tq, tk=tk)

    q_spec = pl.BlockSpec((None, tq, D), lambda b, qi, ki: (b, qi, 0))
    kv_spec = pl.BlockSpec((None, tk, D), lambda b, qi, ki: (b, ki, 0))
    o_spec = pl.BlockSpec((None, tq, D), lambda b, qi, ki: (b, qi, 0))

    return pl.pallas_call(
        kernel,
        out_shape=jax.ShapeDtypeStruct((B, S, D), queries.dtype),
        grid_spec=pltpu.PrefetchScalarGridSpec(
            num_scalar_prefetch=0,
            grid=grid,
            in_specs=[q_spec, kv_spec, kv_spec],
            out_specs=o_spec,
            scratch_shapes=[
                pltpu.VMEM((tq, D), queries.dtype),  # cached scaled Q
                pltpu.VMEM((tq, 1), jnp.float32),    # running max  m
                pltpu.VMEM((tq, 1), jnp.float32),    # running sum  l (unmasked)
                pltpu.VMEM((tq, D), jnp.float32),    # output accumulator
            ],
        ),
        compiler_params=pltpu.CompilerParams(
            dimension_semantics=("parallel", "parallel", "arbitrary")),
    )(queries, keys, values)


def _reference(q, k, v, embed_len, mask=None):
    scores = jnp.einsum("bqd,bkd->bqk", q, k) / math.sqrt(embed_len)
    attn = jax.nn.softmax(scores, axis=-1)
    if mask is not None:
        attn = jnp.tril(attn)
    return jnp.einsum("bqk,bkd->bqd", attn, v)


if __name__ == "__main__":
    # Shapes chosen so the default 256x256 tiles give a 2x2 (q,kv) tile grid:
    # exercises fully-below / boundary / fully-above mask branches, and keeps
    # B * (S//tq) = 4 parallel blocks for megacore sharding.
    B, S, D = 2, 512, 128
    key = jax.random.PRNGKey(0)
    kq, kk, kv = jax.random.split(key, 3)
    q = jax.random.normal(kq, (B, S, D), dtype=jnp.float32)
    k = jax.random.normal(kk, (B, S, D), dtype=jnp.float32)
    v = jax.random.normal(kv, (B, S, D), dtype=jnp.float32)

    # f32, unmasked path.
    out = jax.block_until_ready(scaled_dot_product(q, k, v, embed_len=D, mask=None))
    ref = _reference(q, k, v, D, mask=None)
    assert out.shape == (B, S, D)
    assert jnp.allclose(out, ref, atol=2e-3, rtol=2e-3), \
        float(jnp.max(jnp.abs(out - ref)))

    # f32, masked path (tril AFTER softmax, as in the reference module).
    out_m = jax.block_until_ready(scaled_dot_product(q, k, v, embed_len=D, mask=True))
    ref_m = _reference(q, k, v, D, mask=True)
    assert jnp.allclose(out_m, ref_m, atol=2e-3, rtol=2e-3), \
        float(jnp.max(jnp.abs(out_m - ref_m)))

    # bf16 inputs: halves the K/V HBM stream and uses the bf16-native MXU rate;
    # softmax stats and the accumulator stay f32 inside the kernel.
    qb, kb, vb = (x.astype(jnp.bfloat16) for x in (q, k, v))
    out_b = jax.block_until_ready(scaled_dot_product(qb, kb, vb, embed_len=D, mask=True))
    ref_b = _reference(qb.astype(jnp.float32), kb.astype(jnp.float32),
                       vb.astype(jnp.float32), D, mask=True)
    assert jnp.allclose(out_b.astype(jnp.float32), ref_b, atol=5e-2, rtol=5e-2), \
        float(jnp.max(jnp.abs(out_b.astype(jnp.float32) - ref_b)))

    print("KERNEL_OK")
</pallas_src>

<mosaic_0001>
module attributes {stable_mosaic.version = 11 : i64} {
  func.func @_flash_sdp_kernel(%arg0: i32, %arg1: i32, %arg2: i32, %arg3: memref<1x256x128xf32, #tpu.memory_space<vmem>>, %arg4: memref<1x256x128xf32, #tpu.memory_space<vmem>>, %arg5: memref<1x256x128xf32, #tpu.memory_space<vmem>>, %arg6: memref<1x256x128xf32, #tpu.memory_space<vmem>>, %arg7: memref<256x128xf32, #tpu.memory_space<vmem>>, %arg8: memref<256x1xf32, #tpu.memory_space<vmem>>, %arg9: memref<256x1xf32, #tpu.memory_space<vmem>>, %arg10: memref<256x128xf32, #tpu.memory_space<vmem>>) attributes {dimension_semantics = [#tpu.dimension_semantics<parallel>, #tpu.dimension_semantics<parallel>, #tpu.dimension_semantics<arbitrary>], iteration_bounds = array<i64: 2, 2, 2>, scalar_prefetch = 0 : i64, scratch_operands = 4 : i64, tpu.core_type = #tpu.core_type<tc>, window_params = [{transform_indices = @transform_0, window_bounds = array<i64: 1, 256, 128>}, {transform_indices = @transform_1, window_bounds = array<i64: 1, 256, 128>}, {transform_indices = @transform_2, window_bounds = array<i64: 1, 256, 128>}, {transform_indices = @transform_3, window_bounds = array<i64: 1, 256, 128>}]} {
    %c0_i32 = arith.constant 0 : i32
    %0 = arith.cmpi eq, %arg2, %c0_i32 : i32
    %1 = arith.extui %0 : i1 to i32
    %c0_i32_0 = arith.constant 0 : i32
    %2 = arith.cmpi ne, %1, %c0_i32_0 : i32
    scf.if %2 {
      %c0_24 = arith.constant 0 : index
      %c0_25 = arith.constant 0 : index
      %c0_26 = arith.constant 0 : index
      %34 = vector.load %arg3[%c0_24, %c0_25, %c0_26] : memref<1x256x128xf32, #tpu.memory_space<vmem>>, vector<1x256x128xf32>
      %35 = vector.shape_cast %34 : vector<1x256x128xf32> to vector<256x128xf32>
      %cst_27 = arith.constant 0.0883883461 : f32
      %36 = vector.broadcast %cst_27 : f32 to vector<256x128xf32>
      %37 = arith.mulf %35, %36 : vector<256x128xf32>
      %c0_28 = arith.constant 0 : index
      %c0_29 = arith.constant 0 : index
      %38 = vector.load %arg7[%c0_28, %c0_29] : memref<256x128xf32, #tpu.memory_space<vmem>>, vector<256x128xf32>
      tpu.vector_store %arg7[%c0_28, %c0_29], %37 {strides = array<i32>} : memref<256x128xf32, #tpu.memory_space<vmem>>, vector<256x128xf32>,
      %cst_30 = arith.constant 0xFF800000 : f32
      %39 = vector.broadcast %cst_30 : f32 to vector<256x1xf32>
      %c0_31 = arith.constant 0 : index
      %c0_32 = arith.constant 0 : index
      %40 = vector.load %arg8[%c0_31, %c0_32] : memref<256x1xf32, #tpu.memory_space<vmem>>, vector<256x1xf32>
      tpu.vector_store %arg8[%c0_31, %c0_32], %39 {strides = array<i32>} : memref<256x1xf32, #tpu.memory_space<vmem>>, vector<256x1xf32>,
      %cst_33 = arith.constant 0.000000e+00 : f32
      %41 = vector.broadcast %cst_33 : f32 to vector<256x1xf32>
      %c0_34 = arith.constant 0 : index
      %c0_35 = arith.constant 0 : index
      %42 = vector.load %arg9[%c0_34, %c0_35] : memref<256x1xf32, #tpu.memory_space<vmem>>, vector<256x1xf32>
      tpu.vector_store %arg9[%c0_34, %c0_35], %41 {strides = array<i32>} : memref<256x1xf32, #tpu.memory_space<vmem>>, vector<256x1xf32>,
      %cst_36 = arith.constant 0.000000e+00 : f32
      %43 = vector.broadcast %cst_36 : f32 to vector<256x128xf32>
      %c0_37 = arith.constant 0 : index
      %c0_38 = arith.constant 0 : index
      %44 = vector.load %arg10[%c0_37, %c0_38] : memref<256x128xf32, #tpu.memory_space<vmem>>, vector<256x128xf32>
      tpu.vector_store %arg10[%c0_37, %c0_38], %43 {strides = array<i32>} : memref<256x128xf32, #tpu.memory_space<vmem>>, vector<256x128xf32>,
    } else {
    }
    %c0 = arith.constant 0 : index
    %c0_1 = arith.constant 0 : index
    %3 = vector.load %arg7[%c0, %c0_1] : memref<256x128xf32, #tpu.memory_space<vmem>>, vector<256x128xf32>
    %c0_2 = arith.constant 0 : index
    %c0_3 = arith.constant 0 : index
    %c0_4 = arith.constant 0 : index
    %4 = vector.load %arg4[%c0_2, %c0_3, %c0_4] : memref<1x256x128xf32, #tpu.memory_space<vmem>>, vector<1x256x128xf32>
    %5 = vector.shape_cast %4 : vector<1x256x128xf32> to vector<256x128xf32>
    %c0_5 = arith.constant 0 : index
    %c0_6 = arith.constant 0 : index
    %c0_7 = arith.constant 0 : index
    %6 = vector.load %arg5[%c0_5, %c0_6, %c0_7] : memref<1x256x128xf32, #tpu.memory_space<vmem>>, vector<1x256x128xf32>
    %7 = vector.shape_cast %6 : vector<1x256x128xf32> to vector<256x128xf32>
    %cst = arith.constant dense<0.000000e+00> : vector<256x256xf32>
    %8 = tpu.matmul %3, %5, %cst {dimension_numbers = #tpu.dot_dimension_numbers<[1], [1], [0], [0], [0, 0, 1, 0], [], []>} : vector<256x128xf32>, vector<256x128xf32>, vector<256x256xf32> -> vector<256x256xf32>
    %c0_8 = arith.constant 0 : index
    %c0_9 = arith.constant 0 : index
    %9 = vector.load %arg8[%c0_8, %c0_9] : memref<256x1xf32, #tpu.memory_space<vmem>>, vector<256x1xf32>
    %cst_10 = arith.constant dense<0xFF800000> : vector<256xf32>
    %10 = vector.multi_reduction <maximumf>, %8, %cst_10 [1] : vector<256x256xf32> to vector<256xf32>
    %11 = vector.shape_cast %10 : vector<256xf32> to vector<256x1xf32>
    %12 = arith.maximumf %9, %11 : vector<256x1xf32>
    %13 = arith.subf %9, %12 : vector<256x1xf32>
    %14 = math.exp %13 : vector<256x1xf32>
    %15 = vector.broadcast %12 : vector<256x1xf32> to vector<256x256xf32>
    %16 = arith.subf %8, %15 : vector<256x256xf32>
    %17 = math.exp %16 : vector<256x256xf32>
    %c0_11 = arith.constant 0 : index
    %c0_12 = arith.constant 0 : index
    %18 = vector.load %arg9[%c0_11, %c0_12] : memref<256x1xf32, #tpu.memory_space<vmem>>, vector<256x1xf32>
    %19 = arith.mulf %14, %18 : vector<256x1xf32>
    %cst_13 = arith.constant dense<0.000000e+00> : vector<256xf32>
    %20 = vector.multi_reduction <add>, %17, %cst_13 [1] : vector<256x256xf32> to vector<256xf32>
    %21 = vector.shape_cast %20 : vector<256xf32> to vector<256x1xf32>
    %22 = arith.addf %19, %21 : vector<256x1xf32>
    %c0_14 = arith.constant 0 : index
    %c0_15 = arith.constant 0 : index
    %23 = vector.load %arg9[%c0_14, %c0_15] : memref<256x1xf32, #tpu.memory_space<vmem>>, vector<256x1xf32>
    tpu.vector_store %arg9[%c0_14, %c0_15], %22 {strides = array<i32>} : memref<256x1xf32, #tpu.memory_space<vmem>>, vector<256x1xf32>,
    %c0_16 = arith.constant 0 : index
    %c0_17 = arith.constant 0 : index
    %24 = vector.load %arg8[%c0_16, %c0_17] : memref<256x1xf32, #tpu.memory_space<vmem>>, vector<256x1xf32>
    tpu.vector_store %arg8[%c0_16, %c0_17], %12 {strides = array<i32>} : memref<256x1xf32, #tpu.memory_space<vmem>>, vector<256x1xf32>,
    %c0_18 = arith.constant 0 : index
    %c0_19 = arith.constant 0 : index
    %25 = vector.load %arg10[%c0_18, %c0_19] : memref<256x128xf32, #tpu.memory_space<vmem>>, vector<256x128xf32>
    %26 = vector.broadcast %14 : vector<256x1xf32> to vector<256x128xf32>
    %27 = arith.mulf %26, %25 : vector<256x128xf32>
    %cst_20 = arith.constant dense<0.000000e+00> : vector<256x128xf32>
    %28 = tpu.matmul %17, %7, %cst_20 {dimension_numbers = #tpu.dot_dimension_numbers<[1], [0], [0], [1], [0, 0, 1, 1], [], []>} : vector<256x256xf32>, vector<256x128xf32>, vector<256x128xf32> -> vector<256x128xf32>
    %29 = arith.addf %27, %28 : vector<256x128xf32>
    %c0_21 = arith.constant 0 : index
    %c0_22 = arith.constant 0 : index
    %30 = vector.load %arg10[%c0_21, %c0_22] : memref<256x128xf32, #tpu.memory_space<vmem>>, vector<256x128xf32>
    tpu.vector_store %arg10[%c0_21, %c0_22], %29 {strides = array<i32>} : memref<256x128xf32, #tpu.memory_space<vmem>>, vector<256x128xf32>,
    %c1_i32 = arith.constant 1 : i32
    %31 = arith.cmpi eq, %arg2, %c1_i32 : i32
    %32 = arith.extui %31 : i1 to i32
    %c0_i32_23 = arith.constant 0 : i32
    %33 = arith.cmpi ne, %32, %c0_i32_23 : i32
    scf.if %33 {
      %c0_24 = arith.constant 0 : index
      %c0_25 = arith.constant 0 : index
      %34 = vector.load %arg9[%c0_24, %c0_25] : memref<256x1xf32, #tpu.memory_space<vmem>>, vector<256x1xf32>
      %35 = tpu.reciprocal %34 {approx = true} : vector<256x1xf32> -> vector<256x1xf32>
      %c0_26 = arith.constant 0 : index
      %c0_27 = arith.constant 0 : index
      %36 = vector.load %arg10[%c0_26, %c0_27] : memref<256x128xf32, #tpu.memory_space<vmem>>, vector<256x128xf32>
      %37 = vector.broadcast %35 : vector<256x1xf32> to vector<256x128xf32>
      %38 = arith.mulf %36, %37 : vector<256x128xf32>
      %c0_28 = arith.constant 0 : index
      %c0_29 = arith.constant 0 : index
      %c0_30 = arith.constant 0 : index
      %39 = vector.load %arg6[%c0_28, %c0_29, %c0_30] : memref<1x256x128xf32, #tpu.memory_space<vmem>>, vector<1x256x128xf32>
      %40 = vector.shape_cast %39 : vector<1x256x128xf32> to vector<256x128xf32>
      %41 = vector.shape_cast %38 : vector<256x128xf32> to vector<1x256x128xf32>
      tpu.vector_store %arg6[%c0_28, %c0_29, %c0_30], %41 {strides = array<i32>} : memref<1x256x128xf32, #tpu.memory_space<vmem>>, vector<1x256x128xf32>,
    } else {
    }
    return
  }
  func.func @transform_0(%arg0: i32, %arg1: i32, %arg2: i32) -> (i32, i32, i32) {
    %c0_i32 = arith.constant 0 : i32
    %c0_i32_0 = arith.constant 0 : i32
    return %arg0, %arg1, %c0_i32 : i32, i32, i32
  }
  func.func @transform_1(%arg0: i32, %arg1: i32, %arg2: i32) -> (i32, i32, i32) {
    %c0_i32 = arith.constant 0 : i32
    %c0_i32_0 = arith.constant 0 : i32
    return %arg0, %arg2, %c0_i32 : i32, i32, i32
  }
  func.func @transform_2(%arg0: i32, %arg1: i32, %arg2: i32) -> (i32, i32, i32) {
    %c0_i32 = arith.constant 0 : i32
    %c0_i32_0 = arith.constant 0 : i32
    return %arg0, %arg2, %c0_i32 : i32, i32, i32
  }
  func.func @transform_3(%arg0: i32, %arg1: i32, %arg2: i32) -> (i32, i32, i32) {
    %c0_i32 = arith.constant 0 : i32
    %c0_i32_0 = arith.constant 0 : i32
    return %arg0, %arg1, %c0_i32 : i32, i32, i32
  }
}

</mosaic_0001>

<bundles_post_ra>
// kernel: tpu_custom_call.1
= control target key start
LH: loop header
LB: loop body
LE: loop exit
PB: predicated region body
PF: predicated region fallthrough
CT: control target
= control target key end

     0   :  { %s5112_s0 = inlined_call_operand.hbm [shape: f32[2,512,128], index: 0, kind: input, shape index: {}]   ;;  %s5113_s1 = inlined_call_operand.hbm [shape: f32[2,512,128], index: 1, kind: input, shape index: {}]   ;;  %s5114_s2 = inlined_call_operand.hbm [shape: f32[2,512,128], index: 2, kind: input, shape index: {}]   ;;  %s5115_s3 = inlined_call_operand.hbm [shape: f32[2,512,128], index: 3, kind: output, shape index: {}]  }
   0x1   :  { %5223 = sst [smem:[#allocation104_spill]] %s5113_s1 }
   0x2   :  { %5224 = sst [smem:[#allocation105_spill]] %s5114_s2 }
   0x3   :  { %5225 = sst [smem:[#allocation106_spill]] %s5115_s3 }
   0x4   :  { %8 = vsyncpa [#allocation7], 0 }
   0x5   :  { %10 = vsyncpa [#allocation7 + $0x1], 0 }
   0x6   :  { %11 = vsyncpa [#allocation10], 0 }
   0x7   :  { %13 = vsyncpa [#allocation10 + $0x1], 0 }
   0x8   :  { %14 = vsyncpa [#allocation8], 0 }
   0x9   :  { %16 = vsyncpa [#allocation8 + $0x1], 0  ;;  %s3497_s12 = smov 0   ;;  %s3499_s13 = smov 0  }
   0xa   :  { %s3501_s14 = smov 0   ;;  %s3503_s15 = smov 0  }
   0xb   :  { %s3505_s16 = smov 0   ;;  %s3507_s17 = smov 0  }
   0xc   :  { %s3509_s18 = smov 0   ;;  %s3511_s19 = smov 0  }
   0xd   :  { %s3513_s20 = smov 0   ;;  %s3515_s21 = smov 0  }
   0xe   :  { %s3517_s22 = smov 0   ;;  %s3519_s23 = smov 0  }
   0xf   :  { %s3521_s24 = smov 0  }
  0x10 LB: > { %5226 = sst [smem:[#allocation16_spill]] %s3418_s13  ;;  %s3561_s25 = sadd.s32 4294967295, %s3462_s24   ;;  %s3462_s24 = sphi %s3521_s24, %s22_s24   ;;  %s3458_s23 = sphi %s3519_s23, %s5488_s23   ;;  %s3454_s22 = sphi %s3517_s22, %s5479_s22   ;;  %s3450_s21 = sphi %s3515_s21, %s5487_s21   ;;  %s3446_s20 = sphi %s3513_s20, %s5486_s20   ;;  %s3442_s19 = sphi %s3511_s19, %s5478_s19   ;;  %s3438_s18 = sphi %s3509_s18, %s5485_s18   ;;  %s3434_s17 = sphi %s3507_s17, %s5484_s17   ;;  %s3430_s16 = sphi %s3505_s16, %s5483_s16   ;;  %s3426_s15 = sphi %s3503_s15, %s5476_s15   ;;  %s3422_s14 = sphi %s3501_s14, %s5482_s14   ;;  %s3418_s13 = sphi %s3499_s13, %s5481_s13   ;;  %s3414_s12 = sphi %s3497_s12, %s5475_s12  }
  0x11   : > { %5227 = sst [smem:[#allocation17_spill]] %s3426_s15  ;;  %s34_s26 = sadd.s32 1, %s3450_s21 }
  0x12   : > { %5228 = sst [smem:[#allocation18_spill]] %s3430_s16  ;;  %p3564_p0 = scmp.ge.s32.totalorder %s34_s26, 2 }
  0x13   : > { %5229 = sst [smem:[#allocation19_spill]] %s3438_s18  ;;  %p58_p1 = scmp.eq.s32.totalorder %s3462_s24, 0 }
  0x14   : > { %5230 = sst [smem:[#allocation20_spill]] %s3442_s19  ;;  %p64_p2 = scmp.eq.s32.totalorder %s3561_s25, 0 }
  0x15   : > { %5231 = sst [smem:[#allocation21_spill]] %s3446_s20  ;;  %s5490_s26 = smov (%p3564_p0, %s34_s26), 0 }
  0x16   : > { %5232 = sst [smem:[#allocation22_spill]] %s3454_s22  ;;  %p85_p3 = scmp.ne.s32.totalorder %s3422_s14, %s3418_s13 }
  0x17   : > { %5233 = sst [smem:[#allocation23_spill]] %s3561_s25  ;;  %p91_p4 = scmp.ne.s32.totalorder %s3418_s13, %s3414_s12 }
  0x18   : > { %p3581_p5 = por %p85_p3, %p58_p1  ;;  %p2863_p7 = scmp.lt.s32.totalorder %s3462_s24, 8 }
  0x19   : > { %p3587_p6 = por %p91_p4, %p64_p2  ;;  %s5119_s5 = sshll.u32 %s3458_s23, 6 }
  0x1a   : > { %s194_s6 = sand.u32 1, %s3462_s24   ;;  %s196_s7 = sand.u32 1, %s3422_s14  }
  0x1b   : > { %s5236_s4 = scalar_select %p3587_p6, 1, 0 }
  0x1c   : > { %s2724_s8 = sshll.u32 %s196_s7, 8  ;;  %s2725_s9 = sshll.u32 %s3450_s21, 5 }
  0x1d   : > { %5237 = sst [smem:[#allocation24_spill]] %s5236_s4  ;;  %s204_s10 = sadd.s32 %s2725_s9, %s5119_s5 }
  0x1e   : > { %s2727_s11 = sshll.u32 %s204_s10, 7  ;;  %s198_s12 = scalar_lea.vmem [#allocation9], %s2724_s8 }
  0x1f   : > { %s207_s29 = sshll.u32 %s198_s12, 4  ;;  %s5238_s1 = sld [smem:[#allocation104_spill]]  ;;  %s208_s29 = int_to_ptr.vmem [resolvable:$true] %s207_s29 }
  0x20   : > { %p3605_p8 = pnand %p2863_p7, %p3581_p5  ;;  %s5240_s2 = sld [smem:[#allocation105_spill]] }
  0x21   : > { %s221_s10 = scalar_lea.vmem [#allocation11], %s2724_s8  ;;  %s3616_s5 = scalar_lea.sflag [#allocation10], %s194_s6 }
  0x22   : > { %s230_s12 = sshll.u32 %s221_s10, 4  ;;  %p5120_p9 = pneg %p3605_p8  ;;  %s3635_s12 = int_to_ptr.vmem [resolvable:$true] %s230_s12 }
  0x23   : > { %s3251_s3 = scalar_lea.vmem %s208_s29, 4096  ;;  %s3464_s28 = smov [#allocation9]  }
  0x24   : > { %p3252_p10 = scmp.ne.s32.totalorder %s208_s29, %s3251_s3  ;;  %s3256_s30 = sshll.u32 %s3464_s28, 4  ;;  %s3257_s30 = int_to_ptr.vmem [resolvable:$false] %s3256_s30 }
  0x25   : > { %s206_s20 = scalar_lea.hbm %s5238_s1, %s2727_s11  ;;  %s3258_s7 = scalar_lea.vmem %s3257_s30, 8192 }
  0x26   : > { %s3614_s9 = scalar_lea.hbm %s5240_s2, %s2727_s11  ;;  %p3254_p11 = pnand %p3252_p10, %p5120_p9 }
  0x27   : > { %p3259_p13 = scmp.lt.s32.totalorder %s208_s29, %s3257_s30  ;;  %p3260_p3 = scmp.lt.s32.totalorder %s3258_s7, %s3251_s3 }
  0x28   : > { %p3255_p12 = pneg %p3254_p11 }
  0x29   : > { %p3261_p4 = por %p3260_p3, %p3259_p13 }
  0x2b   : > { %p3262_p5 = pnand %p3261_p4, %p3255_p12 }
  0x2d   : > { %3265 = shalt.err (!%p3262_p5)
}
  0x2e   : > { %s5121_s18 = smov 128   ;;  %s5123_s4 = smov 8  }
  0x2f   : > { %2855 = dma.hbm_to_vmem [thread:$0]  (!%p3605_p8), %s206_s20, 4096, %s208_s29, %s3616_s5, %s5121_s18, %s5121_s18, %s5123_s4  }
  0x30   : > { %p2732_p10 = scmp.ge.s32.totalorder %s3462_s24, 1  ;;  %p238_p11 = scmp.lt.s32.totalorder %s3462_s24, 9 }
  0x31   : > { %s2717_s8 = sadd.s32 4294967294, %s3462_s24   ;;  %s37_s11 = sadd.s32 1, %s3454_s22 }
  0x32   : > { %p3631_p12 = pnand %p2732_p10, %p238_p11  ;;  %s5492_s11 = smov (!%p3564_p0, %s37_s11), %s3454_s22 }
  0x33   : > { %p57_p13 = scmp.ne.s32.totalorder %s3434_s17, %s3430_s16  ;;  %p63_p3 = scmp.ne.s32.totalorder %s3430_s16, %s3426_s15 }
  0x34   : > { %s5241_s6 = scalar_select %p3631_p12, 1, 0 }
  0x35   : > { %p39_p4 = scmp.ge.s32.totalorder %s5492_s11, 2  ;;  %p145_p5 = scmp.eq.s32.totalorder %s3561_s25, 7 }
  0x36   : > { %5242 = sst [smem:[#allocation25_spill]] %s5241_s6  ;;  %s50_s20 = sadd.s32 1, %s3434_s17 }
  0x37   : > { %p3653_p10 = por %p64_p2, %p63_p3  ;;  %s5494_s11 = smov (%p39_p4, %s5492_s11), 0 }
  0x38   : > { %5245 = sst [smem:[#allocation27_spill]] %s5494_s11  ;;  %s5246_s27 = sadd.s32 1, %s3458_s23 }
  0x39   : > { %s5243_s29 = scalar_select %p3653_p10, 1, 0 }
  0x3a   : > { %s5496_s27 = smov (!%p39_p4, %s5246_s27), %s3458_s23  ;;  %p3664_p0 = por %p58_p1, %p57_p13 }
  0x3b   : > { %5244 = sst [smem:[#allocation26_spill]] %s5243_s29  ;;  %p3668_p11 = por %p145_p5, %p57_p13 }
  0x3c   : > { %p43_p2 = scmp.ge.s32.totalorder %s5496_s27, 2  ;;  %p151_p9 = scmp.eq.s32.totalorder %s2717_s8, 7 }
  0x3d   : > { %s5248_s10 = scalar_select %p3668_p11, 1, 0 }
  0x3e   : > { %s46_s3 = ssub.s32 %s3454_s22, %s5494_s11  ;;  %s5138_s28 = sand.u32 1, %s3434_s17  }
  0x3f   : > { %5249 = sst [smem:[#allocation28_spill]] %s5248_s10  ;;  %s5498_s27 = smov (%p43_p2, %s5496_s27), 0 }
  0x40   : > { %5250 = sst [smem:[#allocation29_spill]] %s5498_s27  ;;  %p3680_p4 = por %p151_p9, %p63_p3 }
  0x41   : > { %s2721_s18 = sshll.u32 %s3454_s22, 5  ;;  %s45_s4 = ssub.s32 %s3458_s23, %s5498_s27 }
  0x42   : > { %s5251_s30 = scalar_select %p3680_p4, 1, 0 }
  0x43   : > { %s2720_s1 = sshll.u32 %s5138_s28, 8  ;;  %s47_s8 = sor.u32 %s46_s3, %s45_s4 }
  0x44   : > { %5252 = sst [smem:[#allocation30_spill]] %s5251_s30  ;;  %s5253_s2 = ssub.s32 %s3450_s21, %s5490_s26 }
  0x45   : > { %s75_s11 = sor.u32 %s5253_s2, %s45_s4  ;;  %p48_p1 = scmp.eq.s32.totalorder %s47_s8, 0 }
  0x46   : > { %p76_p13 = scmp.eq.s32.totalorder %s75_s11, 0  ;;  %s5254_s15 = sshll.u32 %s3458_s23, 6 }
  0x47   : > { %s181_s10 = sadd.s32 %s5254_s15, %s2721_s18  ;;  %s5255_s25 = sadd.s32 1, %s3422_s14 }
  0x48   : > { %s3695_s13 = scalar_select %p48_p1, %s3434_s17, %s50_s20  }
  0x49   : > { %s3700_s30 = scalar_select %p76_p13, %s3422_s14, %s5255_s25  }
  0x4a   : > { %s2723_s22 = sshll.u32 %s181_s10, 7  ;;  %s175_s29 = scalar_lea.vmem [#allocation6], %s2720_s1 }
  0x4b   : > { %s184_s27 = sshll.u32 %s175_s29, 4  ;;  %s3705_s28 = scalar_lea.hbm %s5112_s0, %s2723_s22  ;;  %s3707_s27 = int_to_ptr.vmem [resolvable:$true] %s184_s27 }
  0x4c   : > { %p3713_p9 = pnand %p2863_p7, %p3664_p0  ;;  %s3279_s15 = scalar_lea.vmem %s3635_s12, 4096 }
  0x4d   : > { %p3280_p3 = scmp.ne.s32.totalorder %s3635_s12, %s3279_s15  ;;  %p5257_p5 = pneg %p3605_p8 }
  0x4e   : > { %s3467_s1 = smov [#allocation11]  }
  0x4f   : > { %p3282_p2 = pnand %p3280_p3, %p5257_p5  ;;  %s3284_s25 = sshll.u32 %s3467_s1, 4  ;;  %s3285_s25 = int_to_ptr.vmem [resolvable:$false] %s3284_s25 }
  0x50   : > { %s3286_s16 = scalar_lea.vmem %s3285_s25, 8192  ;;  %p3287_p13 = scmp.lt.s32.totalorder %s3635_s12, %s3285_s25 }
  0x51   : > { %p3283_p1 = pneg %p3282_p2  ;;  %p3288_p4 = scmp.lt.s32.totalorder %s3286_s16, %s3279_s15 }
  0x53   : > { %p3289_p11 = por %p3288_p4, %p3287_p13 }
  0x55   : > { %p3290_p6 = pnand %p3289_p11, %p3283_p1 }
  0x57   : > { %3293 = shalt.err (!%p3290_p6)
}
  0x58   : > { %s5258_s22 = smov 8   ;;  %s5259_s18 = smov 128  }
  0x59   : > { %2858 = dma.hbm_to_vmem [thread:$0]  (!%p3605_p8), %s3614_s9, 4096, %s3635_s12, %s3616_s5, %s5259_s18, %s5259_s18, %s5258_s22  }
  0x5a   : > { %s5260_s4 = sand.u32 1, %s3434_s17   ;;  %p3296_p7 = pneg %p3713_p9 }
  0x5b   : > { %s172_s6 = scalar_lea.sflag [#allocation7], %s5260_s4  ;;  %s3307_s11 = scalar_lea.vmem %s3707_s27, 4096 }
  0x5c   : > { %p3308_p6 = scmp.ne.s32.totalorder %s3707_s27, %s3307_s11  ;;  %s3468_s19 = smov [#allocation6]  }
  0x5d   : > { %s3312_s20 = sshll.u32 %s3468_s19, 4  ;;  %s3313_s20 = int_to_ptr.vmem [resolvable:$false] %s3312_s20 }
  0x5e   : > { %p3310_p0 = pnand %p3308_p6, %p3296_p7  ;;  %s3314_s29 = scalar_lea.vmem %s3313_s20, 8192 }
  0x5f   : > { %p3315_p4 = scmp.lt.s32.totalorder %s3707_s27, %s3313_s20  ;;  %p3316_p3 = scmp.lt.s32.totalorder %s3314_s29, %s3307_s11 }
  0x60   : > { %p3311_p11 = pneg %p3310_p0 }
  0x61   : > { %p3317_p5 = por %p3316_p3, %p3315_p4 }
  0x63   : > { %p3318_p2 = pnand %p3317_p5, %p3311_p11 }
  0x65   : > { %3321 = shalt.err (!%p3318_p2)
}
  0x66   : > { %2852 = dma.hbm_to_vmem [thread:$0]  (!%p3713_p9), %s3705_s28, 4096, %s3707_s27, %s172_s6, %s5259_s18, %s5259_s18, %s5258_s22  }
  0x67   : > { %242 = sbr.rel (%p3631_p12) target bundleno = 1364 (0x554), region = 32 }
  0x6c   : > { %s5262_s9 = sld [smem:[#allocation18_spill]] }
  0x72   : > { %s3748_s7 = sand.u32 1, %s5262_s9  }
  0x73   : > { %s2733_s10 = sshll.u32 %s3748_s7, 8  ;;  %s245_s3 = scalar_lea.sflag [#allocation7], %s3748_s7 }
  0x74   : > { %s3752_s8 = scalar_lea.vmem [#allocation6], %s2733_s10 }
  0x75   : > { %3401 = dma.done.wait (%p3653_p10), %s245_s3, 4096  }
  0x76   : > { %3403 = vsyncadd (%p3653_p10), %s245_s3, 4294963200  ;;  %s5264_s2 = sld [smem:[#allocation23_spill]] }
  0x77   : > { %s5265_s27 = sld [smem:[#allocation16_spill]] }
  0x78   : > { %s5266_s28 = sld [smem:[#allocation24_spill]] }
  0x7c   : > { %s253_s15 = sand.u32 1, %s5264_s2  }
  0x7d   : > { %s255_s1 = sand.u32 1, %s5265_s27   ;;  %s254_s16 = scalar_lea.sflag [#allocation10], %s253_s15 }
  0x7e   : > { %s2734_s25 = sshll.u32 %s255_s1, 8  ;;  %p5267_p8 = scmp.ne.s32.totalorder %s5266_s28, 0 }
  0x7f   : > { %s3760_s22 = scalar_lea.vmem [#allocation9], %s2734_s25 }
  0x80   : > { %3405 = dma.done.wait (%p5267_p8), %s254_s16, 8192  }
  0x81   : > { %3407 = vsyncadd (%p5267_p8), %s254_s16, 4294959104  ;;  %s3766_s18 = scalar_lea.vmem [#allocation11], %s2734_s25  ;;  %s3768_s4 = scalar_lea.vmem [#allocation12], %s2733_s10 }
  0x82   : > { %s5268_s6 = sld [smem:[#allocation19_spill]] }
  0x88   : > { %p2737_p12 = scmp.ne.s32.totalorder %s5268_s6, 0 }
  0x8a   : > { %306 = sbr.rel (%p2737_p12) target bundleno = 209 (0xd1), region = 48 }
  0x8f   : > { %v307_v0 = vld [vmem:[%s3752_s8] sm:$0xff]  ;;  %v308_v1 = vld [vmem:[%s3752_s8 + $0x8] sm:$0xff]  ;;  %v309_v2 = vld [vmem:[%s3752_s8 + $0x10] sm:$0xff]  ;;  %vm403_vm0 = vcmask 7168   ;;  %v3469_v6 = vmov -inf   ;;  %v3470_v7 = vmov 0.0  }
  0x90   : > { %v3774_v3 = vmul.f32 0.088388346, %v307_v0  ;;  %v3776_v4 = vmul.f32 0.088388346, %v308_v1  ;;  %v3778_v5 = vmul.f32 0.088388346, %v309_v2 }
  0x91   : > { %404 = vst.msk [vmem:[#allocation3] sm:$0xff] %vm403_vm0, %v3469_v6  ;;  %405 = vst.msk [vmem:[#allocation3 + $0x8] sm:$0xff] %vm403_vm0, %v3469_v6  ;;  %v310_v8 = vld [vmem:[%s3752_s8 + $0x18] sm:$0xff]  ;;  %v311_v9 = vld [vmem:[%s3752_s8 + $0x20] sm:$0xff] }
  0x92   : > { %406 = vst.msk [vmem:[#allocation3 + $0x10] sm:$0xff] %vm403_vm0, %v3469_v6  ;;  %407 = vst.msk [vmem:[#allocation3 + $0x18] sm:$0xff] %vm403_vm0, %v3469_v6  ;;  %v312_v10 = vld [vmem:[%s3752_s8 + $0x28] sm:$0xff]  ;;  %v342_v11 = vmul.f32 0.088388346, %v310_v8  ;;  %v313_v14 = vld [vmem:[%s3752_s8 + $0x30] sm:$0xff] }
  0x93   : > { %408 = vst.msk [vmem:[#allocation3 + $0x20] sm:$0xff] %vm403_vm0, %v3469_v6  ;;  %409 = vst.msk [vmem:[#allocation3 + $0x28] sm:$0xff] %vm403_vm0, %v3469_v6  ;;  %v343_v12 = vmul.f32 0.088388346, %v311_v9  ;;  %v344_v13 = vmul.f32 0.088388346, %v312_v10 }
  0x94   : > { %410 = vst.msk [vmem:[#allocation3 + $0x30] sm:$0xff] %vm403_vm0, %v3469_v6  ;;  %411 = vst.msk [vmem:[#allocation3 + $0x38] sm:$0xff] %vm403_vm0, %v3469_v6  ;;  %v314_v15 = vld [vmem:[%s3752_s8 + $0x38] sm:$0xff]  ;;  %v315_v16 = vld [vmem:[%s3752_s8 + $0x40] sm:$0xff]  ;;  %v345_v17 = vmul.f32 0.088388346, %v313_v14 }
  0x95   : > { %412 = vst.msk [vmem:[#allocation3 + $0x40] sm:$0xff] %vm403_vm0, %v3469_v6  ;;  %413 = vst.msk [vmem:[#allocation3 + $0x48] sm:$0xff] %vm403_vm0, %v3469_v6  ;;  %v346_v18 = vmul.f32 0.088388346, %v314_v15  ;;  %v347_v19 = vmul.f32 0.088388346, %v315_v16 }
  0x96   : > { %414 = vst.msk [vmem:[#allocation3 + $0x50] sm:$0xff] %vm403_vm0, %v3469_v6  ;;  %415 = vst.msk [vmem:[#allocation3 + $0x58] sm:$0xff] %vm403_vm0, %v3469_v6  ;;  %v316_v20 = vld [vmem:[%s3752_s8 + $0x48] sm:$0xff]  ;;  %v317_v21 = vld [vmem:[%s3752_s8 + $0x50] sm:$0xff] }
  0x97   : > { %416 = vst.msk [vmem:[#allocation3 + $0x60] sm:$0xff] %vm403_vm0, %v3469_v6  ;;  %417 = vst.msk [vmem:[#allocation3 + $0x68] sm:$0xff] %vm403_vm0, %v3469_v6  ;;  %v318_v22 = vld [vmem:[%s3752_s8 + $0x58] sm:$0xff]  ;;  %v348_v23 = vmul.f32 0.088388346, %v316_v20  ;;  %v319_v26 = vld [vmem:[%s3752_s8 + $0x60] sm:$0xff] }
  0x98   : > { %418 = vst.msk [vmem:[#allocation3 + $0x70] sm:$0xff] %vm403_vm0, %v3469_v6  ;;  %419 = vst.msk [vmem:[#allocation3 + $0x78] sm:$0xff] %vm403_vm0, %v3469_v6  ;;  %v349_v24 = vmul.f32 0.088388346, %v317_v21  ;;  %v350_v25 = vmul.f32 0.088388346, %v318_v22 }
  0x99   : > { %420 = vst.msk [vmem:[#allocation3 + $0x80] sm:$0xff] %vm403_vm0, %v3469_v6  ;;  %421 = vst.msk [vmem:[#allocation3 + $0x88] sm:$0xff] %vm403_vm0, %v3469_v6  ;;  %v320_v27 = vld [vmem:[%s3752_s8 + $0x68] sm:$0xff]  ;;  %v321_v28 = vld [vmem:[%s3752_s8 + $0x70] sm:$0xff]  ;;  %v351_v29 = vmul.f32 0.088388346, %v319_v26 }
  0x9a   : > { %422 = vst.msk [vmem:[#allocation3 + $0x90] sm:$0xff] %vm403_vm0, %v3469_v6  ;;  %423 = vst.msk [vmem:[#allocation3 + $0x98] sm:$0xff] %vm403_vm0, %v3469_v6  ;;  %v352_v30 = vmul.f32 0.088388346, %v320_v27  ;;  %v353_v31 = vmul.f32 0.088388346, %v321_v28 }
  0x9b   : > { %424 = vst.msk [vmem:[#allocation3 + $0xa0] sm:$0xff] %vm403_vm0, %v3469_v6  ;;  %425 = vst.msk [vmem:[#allocation3 + $0xa8] sm:$0xff] %vm403_vm0, %v3469_v6  ;;  %v322_v32 = vld [vmem:[%s3752_s8 + $0x78] sm:$0xff]  ;;  %v323_v33 = vld [vmem:[%s3752_s8 + $0x80] sm:$0xff] }
  0x9c   : > { %426 = vst.msk [vmem:[#allocation3 + $0xb0] sm:$0xff] %vm403_vm0, %v3469_v6  ;;  %427 = vst.msk [vmem:[#allocation3 + $0xb8] sm:$0xff] %vm403_vm0, %v3469_v6  ;;  %v324_v34 = vld [vmem:[%s3752_s8 + $0x88] sm:$0xff]  ;;  %v354_v35 = vmul.f32 0.088388346, %v322_v32  ;;  %v325_v38 = vld [vmem:[%s3752_s8 + $0x90] sm:$0xff] }
  0x9d   : > { %428 = vst.msk [vmem:[#allocation3 + $0xc0] sm:$0xff] %vm403_vm0, %v3469_v6  ;;  %429 = vst.msk [vmem:[#allocation3 + $0xc8] sm:$0xff] %vm403_vm0, %v3469_v6  ;;  %v355_v36 = vmul.f32 0.088388346, %v323_v33  ;;  %v356_v37 = vmul.f32 0.088388346, %v324_v34 }
  0x9e   : > { %430 = vst.msk [vmem:[#allocation3 + $0xd0] sm:$0xff] %vm403_vm0, %v3469_v6  ;;  %431 = vst.msk [vmem:[#allocation3 + $0xd8] sm:$0xff] %vm403_vm0, %v3469_v6  ;;  %v326_v39 = vld [vmem:[%s3752_s8 + $0x98] sm:$0xff]  ;;  %v327_v40 = vld [vmem:[%s3752_s8 + $0xa0] sm:$0xff]  ;;  %v357_v41 = vmul.f32 0.088388346, %v325_v38 }
  0x9f   : > { %432 = vst.msk [vmem:[#allocation3 + $0xe0] sm:$0xff] %vm403_vm0, %v3469_v6  ;;  %433 = vst.msk [vmem:[#allocation3 + $0xe8] sm:$0xff] %vm403_vm0, %v3469_v6  ;;  %v358_v42 = vmul.f32 0.088388346, %v326_v39  ;;  %v359_v43 = vmul.f32 0.088388346, %v327_v40 }
  0xa0   : > { %434 = vst.msk [vmem:[#allocation3 + $0xf0] sm:$0xff] %vm403_vm0, %v3469_v6  ;;  %435 = vst.msk [vmem:[#allocation3 + $0xf8] sm:$0xff] %vm403_vm0, %v3469_v6  ;;  %v328_v44 = vld [vmem:[%s3752_s8 + $0xa8] sm:$0xff]  ;;  %v329_v45 = vld [vmem:[%s3752_s8 + $0xb0] sm:$0xff] }
  0xa1   : > { %436 = vst.msk [vmem:[#allocation4] sm:$0xff] %vm403_vm0, %v3470_v7  ;;  %437 = vst.msk [vmem:[#allocation4 + $0x8] sm:$0xff] %vm403_vm0, %v3470_v7  ;;  %v330_v46 = vld [vmem:[%s3752_s8 + $0xb8] sm:$0xff]  ;;  %v360_v47 = vmul.f32 0.088388346, %v328_v44  ;;  %v331_v50 = vld [vmem:[%s3752_s8 + $0xc0] sm:$0xff] }
  0xa2   : > { %438 = vst.msk [vmem:[#allocation4 + $0x10] sm:$0xff] %vm403_vm0, %v3470_v7  ;;  %439 = vst.msk [vmem:[#allocation4 + $0x18] sm:$0xff] %vm403_vm0, %v3470_v7  ;;  %v361_v48 = vmul.f32 0.088388346, %v329_v45  ;;  %v362_v49 = vmul.f32 0.088388346, %v330_v46 }
  0xa3   : > { %440 = vst.msk [vmem:[#allocation4 + $0x20] sm:$0xff] %vm403_vm0, %v3470_v7  ;;  %441 = vst.msk [vmem:[#allocation4 + $0x28] sm:$0xff] %vm403_vm0, %v3470_v7  ;;  %v332_v51 = vld [vmem:[%s3752_s8 + $0xc8] sm:$0xff]  ;;  %v333_v52 = vld [vmem:[%s3752_s8 + $0xd0] sm:$0xff]  ;;  %v363_v53 = vmul.f32 0.088388346, %v331_v50 }
  0xa4   : > { %442 = vst.msk [vmem:[#allocation4 + $0x30] sm:$0xff] %vm403_vm0, %v3470_v7  ;;  %443 = vst.msk [vmem:[#allocation4 + $0x38] sm:$0xff] %vm403_vm0, %v3470_v7  ;;  %v364_v54 = vmul.f32 0.088388346, %v332_v51  ;;  %v365_v55 = vmul.f32 0.088388346, %v333_v52 }
  0xa5   : > { %444 = vst.msk [vmem:[#allocation4 + $0x40] sm:$0xff] %vm403_vm0, %v3470_v7  ;;  %445 = vst.msk [vmem:[#allocation4 + $0x48] sm:$0xff] %vm403_vm0, %v3470_v7  ;;  %v334_v56 = vld [vmem:[%s3752_s8 + $0xd8] sm:$0xff]  ;;  %v335_v57 = vld [vmem:[%s3752_s8 + $0xe0] sm:$0xff] }
  0xa6   : > { %446 = vst.msk [vmem:[#allocation4 + $0x50] sm:$0xff] %vm403_vm0, %v3470_v7  ;;  %447 = vst.msk [vmem:[#allocation4 + $0x58] sm:$0xff] %vm403_vm0, %v3470_v7  ;;  %v336_v58 = vld [vmem:[%s3752_s8 + $0xe8] sm:$0xff]  ;;  %v366_v59 = vmul.f32 0.088388346, %v334_v56  ;;  %v337_v62 = vld [vmem:[%s3752_s8 + $0xf0] sm:$0xff] }
  0xa7   : > { %448 = vst.msk [vmem:[#allocation4 + $0x60] sm:$0xff] %vm403_vm0, %v3470_v7  ;;  %449 = vst.msk [vmem:[#allocation4 + $0x68] sm:$0xff] %vm403_vm0, %v3470_v7  ;;  %v367_v60 = vmul.f32 0.088388346, %v335_v57  ;;  %v368_v61 = vmul.f32 0.088388346, %v336_v58 }
  0xa8   : > { %450 = vst.msk [vmem:[#allocation4 + $0x70] sm:$0xff] %vm403_vm0, %v3470_v7  ;;  %451 = vst.msk [vmem:[#allocation4 + $0x78] sm:$0xff] %vm403_vm0, %v3470_v7  ;;  %v338_v63 = vld [vmem:[%s3752_s8 + $0xf8] sm:$0xff]  ;;  %v369_v0 = vmul.f32 0.088388346, %v337_v62 }
  0xa9   : > { %452 = vst.msk [vmem:[#allocation4 + $0x80] sm:$0xff] %vm403_vm0, %v3470_v7  ;;  %453 = vst.msk [vmem:[#allocation4 + $0x88] sm:$0xff] %vm403_vm0, %v3470_v7  ;;  %v370_v1 = vmul.f32 0.088388346, %v338_v63 }
  0xaa   : > { %454 = vst.msk [vmem:[#allocation4 + $0x90] sm:$0xff] %vm403_vm0, %v3470_v7  ;;  %455 = vst.msk [vmem:[#allocation4 + $0x98] sm:$0xff] %vm403_vm0, %v3470_v7 }
  0xab   : > { %456 = vst.msk [vmem:[#allocation4 + $0xa0] sm:$0xff] %vm403_vm0, %v3470_v7  ;;  %457 = vst.msk [vmem:[#allocation4 + $0xa8] sm:$0xff] %vm403_vm0, %v3470_v7 }
  0xac   : > { %458 = vst.msk [vmem:[#allocation4 + $0xb0] sm:$0xff] %vm403_vm0, %v3470_v7  ;;  %459 = vst.msk [vmem:[#allocation4 + $0xb8] sm:$0xff] %vm403_vm0, %v3470_v7 }
  0xad   : > { %460 = vst.msk [vmem:[#allocation4 + $0xc0] sm:$0xff] %vm403_vm0, %v3470_v7  ;;  %461 = vst.msk [vmem:[#allocation4 + $0xc8] sm:$0xff] %vm403_vm0, %v3470_v7 }
  0xae   : > { %462 = vst.msk [vmem:[#allocation4 + $0xd0] sm:$0xff] %vm403_vm0, %v3470_v7  ;;  %463 = vst.msk [vmem:[#allocation4 + $0xd8] sm:$0xff] %vm403_vm0, %v3470_v7 }
  0xaf   : > { %464 = vst.msk [vmem:[#allocation4 + $0xe0] sm:$0xff] %vm403_vm0, %v3470_v7  ;;  %465 = vst.msk [vmem:[#allocation4 + $0xe8] sm:$0xff] %vm403_vm0, %v3470_v7 }
  0xb0   : > { %466 = vst.msk [vmem:[#allocation4 + $0xf0] sm:$0xff] %vm403_vm0, %v3470_v7  ;;  %467 = vst.msk [vmem:[#allocation4 + $0xf8] sm:$0xff] %vm403_vm0, %v3470_v7 }
  0xb1   : > { %468 = vst [vmem:[#allocation5 + $0x80] sm:$0xff] %v3470_v7  ;;  %469 = vst [vmem:[#allocation5 + $0xc8] sm:$0xff] %v3470_v7 }
  0xb2   : > { %470 = vst [vmem:[#allocation5 + $0xe8] sm:$0xff] %v3470_v7  ;;  %471 = vst [vmem:[#allocation5 + $0x78] sm:$0xff] %v3470_v7 }
  0xb3   : > { %472 = vst [vmem:[#allocation5 + $0x8] sm:$0xff] %v3470_v7  ;;  %473 = vst [vmem:[#allocation5 + $0x90] sm:$0xff] %v3470_v7 }
  0xb4   : > { %474 = vst [vmem:[#allocation5 + $0x58] sm:$0xff] %v3470_v7  ;;  %475 = vst [vmem:[#allocation5 + $0xa8] sm:$0xff] %v3470_v7 }
  0xb5   : > { %476 = vst [vmem:[#allocation5 + $0xd0] sm:$0xff] %v3470_v7  ;;  %477 = vst [vmem:[#allocation5 + $0xb0] sm:$0xff] %v3470_v7 }
  0xb6   : > { %478 = vst [vmem:[#allocation5 + $0x38] sm:$0xff] %v3470_v7  ;;  %479 = vst [vmem:[#allocation5 + $0x40] sm:$0xff] %v3470_v7 }
  0xb7   : > { %480 = vst [vmem:[#allocation5 + $0xe0] sm:$0xff] %v3470_v7  ;;  %481 = vst [vmem:[#allocation5 + $0x60] sm:$0xff] %v3470_v7 }
  0xb8   : > { %482 = vst [vmem:[#allocation5 + $0x18] sm:$0xff] %v3470_v7  ;;  %483 = vst [vmem:[#allocation5 + $0x68] sm:$0xff] %v3470_v7 }
  0xb9   : > { %484 = vst [vmem:[#allocation5 + $0x10] sm:$0xff] %v3470_v7  ;;  %485 = vst [vmem:[#allocation5 + $0x70] sm:$0xff] %v3470_v7 }
  0xba   : > { %486 = vst [vmem:[#allocation5 + $0x50] sm:$0xff] %v3470_v7  ;;  %487 = vst [vmem:[#allocation5 + $0xa0] sm:$0xff] %v3470_v7 }
  0xbb   : > { %488 = vst [vmem:[#allocation5 + $0xd8] sm:$0xff] %v3470_v7  ;;  %489 = vst [vmem:[#allocation5 + $0x30] sm:$0xff] %v3470_v7 }
  0xbc   : > { %490 = vst [vmem:[#allocation5 + $0x20] sm:$0xff] %v3470_v7  ;;  %491 = vst [vmem:[#allocation5 + $0xf0] sm:$0xff] %v3470_v7 }
  0xbd   : > { %492 = vst [vmem:[#allocation5 + $0x88] sm:$0xff] %v3470_v7  ;;  %493 = vst [vmem:[#allocation5 + $0x48] sm:$0xff] %v3470_v7 }
  0xbe   : > { %494 = vst [vmem:[#allocation5 + $0xf8] sm:$0xff] %v3470_v7  ;;  %495 = vst [vmem:[#allocation5 + $0xc0] sm:$0xff] %v3470_v7 }
  0xbf   : > { %496 = vst [vmem:[#allocation5 + $0xb8] sm:$0xff] %v3470_v7  ;;  %497 = vst [vmem:[#allocation5] sm:$0xff] %v3470_v7 }
  0xc0   : > { %498 = vst [vmem:[#allocation5 + $0x28] sm:$0xff] %v3470_v7  ;;  %499 = vst [vmem:[#allocation5 + $0x98] sm:$0xff] %v3470_v7 }
  0xc1   : > { %371 = vst [vmem:[#allocation2 + $0xb0] sm:$0xff] %v3774_v3  ;;  %372 = vst [vmem:[#allocation2] sm:$0xff] %v3776_v4 }
  0xc2   : > { %373 = vst [vmem:[#allocation2 + $0xd8] sm:$0xff] %v3778_v5  ;;  %374 = vst [vmem:[#allocation2 + $0x18] sm:$0xff] %v342_v11 }
  0xc3   : > { %375 = vst [vmem:[#allocation2 + $0x50] sm:$0xff] %v343_v12  ;;  %376 = vst [vmem:[#allocation2 + $0x68] sm:$0xff] %v344_v13 }
  0xc4   : > { %377 = vst [vmem:[#allocation2 + $0x30] sm:$0xff] %v345_v17  ;;  %378 = vst [vmem:[#allocation2 + $0x48] sm:$0xff] %v346_v18 }
  0xc5   : > { %379 = vst [vmem:[#allocation2 + $0x80] sm:$0xff] %v347_v19  ;;  %380 = vst [vmem:[#allocation2 + $0x88] sm:$0xff] %v348_v23 }
  0xc6   : > { %381 = vst [vmem:[#allocation2 + $0xe8] sm:$0xff] %v349_v24  ;;  %382 = vst [vmem:[#allocation2 + $0xb8] sm:$0xff] %v350_v25 }
  0xc7   : > { %383 = vst [vmem:[#allocation2 + $0x60] sm:$0xff] %v351_v29  ;;  %384 = vst [vmem:[#allocation2 + $0xf0] sm:$0xff] %v352_v30 }
  0xc8   : > { %385 = vst [vmem:[#allocation2 + $0x8] sm:$0xff] %v353_v31  ;;  %386 = vst [vmem:[#allocation2 + $0x78] sm:$0xff] %v354_v35 }
  0xc9   : > { %387 = vst [vmem:[#allocation2 + $0x38] sm:$0xff] %v355_v36  ;;  %388 = vst [vmem:[#allocation2 + $0x58] sm:$0xff] %v356_v37 }
  0xca   : > { %389 = vst [vmem:[#allocation2 + $0x40] sm:$0xff] %v357_v41  ;;  %390 = vst [vmem:[#allocation2 + $0xc8] sm:$0xff] %v358_v42 }
  0xcb   : > { %391 = vst [vmem:[#allocation2 + $0xe0] sm:$0xff] %v359_v43  ;;  %392 = vst [vmem:[#allocation2 + $0x90] sm:$0xff] %v360_v47 }
  0xcc   : > { %393 = vst [vmem:[#allocation2 + $0x70] sm:$0xff] %v361_v48  ;;  %394 = vst [vmem:[#allocation2 + $0xc0] sm:$0xff] %v362_v49 }
  0xcd   : > { %395 = vst [vmem:[#allocation2 + $0xa8] sm:$0xff] %v363_v53  ;;  %396 = vst [vmem:[#allocation2 + $0xd0] sm:$0xff] %v364_v54 }
  0xce   : > { %397 = vst [vmem:[#allocation2 + $0x10] sm:$0xff] %v365_v55  ;;  %398 = vst [vmem:[#allocation2 + $0x28] sm:$0xff] %v366_v59 }
  0xcf   : > { %399 = vst [vmem:[#allocation2 + $0xa0] sm:$0xff] %v367_v60  ;;  %400 = vst [vmem:[#allocation2 + $0xf8] sm:$0xff] %v368_v61 }
  0xd0   : > { %401 = vst [vmem:[#allocation2 + $0x20] sm:$0xff] %v369_v0  ;;  %402 = vst [vmem:[#allocation2 + $0x98] sm:$0xff] %v370_v1 }
  0xd1 PF: > { %v563_v2 = vld [vmem:[%s3760_s22 + $0xf8] sm:$0xff]  ;;  %v562_v4 = vld [vmem:[%s3760_s22 + $0xf0] sm:$0xff]  ;;  %v561_v6 = vld [vmem:[%s3760_s22 + $0xe8] sm:$0xff]  ;;  %vm1653_vm1 = vcmask 7168   ;;  %s5465_s11 = sld [smem:[#allocation19_spill]] }
  0xd2   : > { %v547_v3 = vld [vmem:[%s3760_s22 + $0x78] sm:$0xff]  ;;  %2745 = vmatprep.subr.mxu0 %v563_v2  ;;  %v546_v5 = vld [vmem:[%s3760_s22 + $0x70] sm:$0xff]  ;;  %v545_v7 = vld [vmem:[%s3760_s22 + $0x68] sm:$0xff] }
  0xd3   : > { %2746 = vmatpush3.xpose.msra.mxu0 %v547_v3  ;;  %v560_v8 = vld [vmem:[%s3760_s22 + $0xe0] sm:$0xff]  ;;  %v500_v9 = vld [vmem:[#allocation2 + $0xb0] sm:$0xff]  ;;  %v559_v11 = vld [vmem:[%s3760_s22 + $0xd8] sm:$0xff] }
  0xd4   : > { %2747 = vmatprep.subr.mxu0 %v562_v4  ;;  %v544_v10 = vld [vmem:[%s3760_s22 + $0x60] sm:$0xff]  ;;  %2777 = vmatprep.mubr.f32.mxu0 %v500_v9  ;;  %v543_v12 = vld [vmem:[%s3760_s22 + $0x58] sm:$0xff]  ;;  %v558_v13 = vld [vmem:[%s3760_s22 + $0xd0] sm:$0xff] }
  0xd5   : > { %v542_v14 = vld [vmem:[%s3760_s22 + $0x50] sm:$0xff]  ;;  %v557_v15 = vld [vmem:[%s3760_s22 + $0xc8] sm:$0xff]  ;;  %v556_v17 = vld [vmem:[%s3760_s22 + $0xc0] sm:$0xff] }
  0xd6   : > { %v541_v16 = vld [vmem:[%s3760_s22 + $0x48] sm:$0xff]  ;;  %v540_v18 = vld [vmem:[%s3760_s22 + $0x40] sm:$0xff]  ;;  %v555_v19 = vld [vmem:[%s3760_s22 + $0xb8] sm:$0xff] }
  0xd7   : > { %2748 = vmatpush3.xpose.msra.mxu0 %v546_v5  ;;  %v539_v20 = vld [vmem:[%s3760_s22 + $0x38] sm:$0xff]  ;;  %v554_v21 = vld [vmem:[%s3760_s22 + $0xb0] sm:$0xff]  ;;  %v553_v23 = vld [vmem:[%s3760_s22 + $0xa8] sm:$0xff]  ;;  %p2738_p10 = scmp.ne.s32.totalorder %s5465_s11, 1 }
  0xd8   : > { %2749 = vmatprep.subr.mxu0 %v561_v6  ;;  %v538_v22 = vld [vmem:[%s3760_s22 + $0x30] sm:$0xff]  ;;  %v537_v24 = vld [vmem:[%s3760_s22 + $0x28] sm:$0xff]  ;;  %v552_v25 = vld [vmem:[%s3760_s22 + $0xa0] sm:$0xff] }
  0xd9   : > { %v536_v26 = vld [vmem:[%s3760_s22 + $0x20] sm:$0xff]  ;;  %v551_v27 = vld [vmem:[%s3760_s22 + $0x98] sm:$0xff]  ;;  %v550_v29 = vld [vmem:[%s3760_s22 + $0x90] sm:$0xff] }
  0xda   : > { %v535_v28 = vld [vmem:[%s3760_s22 + $0x18] sm:$0xff]  ;;  %v534_v30 = vld [vmem:[%s3760_s22 + $0x10] sm:$0xff]  ;;  %v549_v31 = vld [vmem:[%s3760_s22 + $0x88] sm:$0xff] }
  0xdb   : > { %2750 = vmatpush3.xpose.msra.mxu0 %v545_v7  ;;  %v533_v32 = vld [vmem:[%s3760_s22 + $0x8] sm:$0xff]  ;;  %v548_v33 = vld [vmem:[%s3760_s22 + $0x80] sm:$0xff]  ;;  %v502_v36 = vld [vmem:[#allocation2 + $0xd8] sm:$0xff] }
  0xdc   : > { %2751 = vmatprep.subr.mxu0 %v560_v8  ;;  %v532_v34 = vld [vmem:[%s3760_s22] sm:$0xff]  ;;  %v503_v37 = vld [vmem:[#allocation2 + $0x18] sm:$0xff]  ;;  %v504_v38 = vld [vmem:[#allocation2 + $0x50] sm:$0xff] }
  0xdd   : > { %v501_v35 = vld [vmem:[#allocation2] sm:$0xff]  ;;  %v505_v39 = vld [vmem:[#allocation2 + $0x68] sm:$0xff]  ;;  %v506_v40 = vld [vmem:[#allocation2 + $0x30] sm:$0xff] }
  0xde   : > { %v507_v41 = vld [vmem:[#allocation2 + $0x48] sm:$0xff]  ;;  %v508_v42 = vld [vmem:[#allocation2 + $0x80] sm:$0xff]  ;;  %v511_v45 = vld [vmem:[#allocation2 + $0xb8] sm:$0xff] }
  0xdf   : > { %2752 = vmatpush3.xpose.msra.mxu0 %v544_v10  ;;  %v509_v43 = vld [vmem:[#allocation2 + $0x88] sm:$0xff]  ;;  %v512_v46 = vld [vmem:[#allocation2 + $0x60] sm:$0xff]  ;;  %v513_v47 = vld [vmem:[#allocation2 + $0xf0] sm:$0xff] }
  0xe0   : > { %2753 = vmatprep.subr.mxu0 %v559_v11  ;;  %v510_v44 = vld [vmem:[#allocation2 + $0xe8] sm:$0xff]  ;;  %v515_v49 = vld [vmem:[#allocation2 + $0x78] sm:$0xff]  ;;  %v518_v52 = vld [vmem:[#allocation2 + $0x40] sm:$0xff] }
  0xe1   : > { %v514_v48 = vld [vmem:[#allocation2 + $0x8] sm:$0xff]  ;;  %v516_v50 = vld [vmem:[#allocation2 + $0x38] sm:$0xff]  ;;  %v520_v54 = vld [vmem:[#allocation2 + $0xe0] sm:$0xff] }
  0xe2   : > { %v517_v51 = vld [vmem:[#allocation2 + $0x58] sm:$0xff]  ;;  %v519_v53 = vld [vmem:[#allocation2 + $0xc8] sm:$0xff]  ;;  %v521_v55 = vld [vmem:[#allocation2 + $0x90] sm:$0xff] }
  0xe3   : > { %2754 = vmatpush3.xpose.msra.mxu0 %v543_v12  ;;  %v522_v56 = vld [vmem:[#allocation2 + $0x70] sm:$0xff]  ;;  %v523_v57 = vld [vmem:[#allocation2 + $0xc0] sm:$0xff]  ;;  %v524_v58 = vld [vmem:[#allocation2 + $0xa8] sm:$0xff] }
  0xe4   : > { %2755 = vmatprep.subr.mxu0 %v558_v13  ;;  %v525_v59 = vld [vmem:[#allocation2 + $0xd0] sm:$0xff]  ;;  %v527_v61 = vld [vmem:[#allocation2 + $0x28] sm:$0xff]  ;;  %v528_v62 = vld [vmem:[#allocation2 + $0xa0] sm:$0xff] }
  0xe5   : > { %v526_v60 = vld [vmem:[#allocation2 + $0x10] sm:$0xff]  ;;  %v529_v63 = vld [vmem:[#allocation2 + $0xf8] sm:$0xff]  ;;  %v530_v0 = vld [vmem:[#allocation2 + $0x20] sm:$0xff] }
  0xe6   : > { %v531_v1 = vld [vmem:[#allocation2 + $0x98] sm:$0xff] }
  0xe7   : > { %2756 = vmatpush3.xpose.msra.mxu0 %v542_v14 }
  0xe8   : > { %2757 = vmatprep.subr.mxu0 %v557_v15  ;;  %v3471_v15 = vmov 0  }
  0xe9   : > { %2978 = vset.pattern.permute.xlu1 %v3471_v15  ;;  %2979 = vset.pattern.permute.xlu0 %v3471_v15 }
  0xeb   : > { %2758 = vmatpush3.xpose.msra.mxu0 %v541_v16 }
  0xec   : > { %2759 = vmatprep.subr.mxu0 %v556_v17 }
  0xef   : > { %2760 = vmatpush3.xpose.msra.mxu0 %v540_v18 }
  0xf0   : > { %2761 = vmatprep.subr.mxu0 %v555_v19 }
  0xf3   : > { %2762 = vmatpush3.xpose.msra.mxu0 %v539_v20 }
  0xf4   : > { %2763 = vmatprep.subr.mxu0 %v554_v21 }
  0xf7   : > { %2764 = vmatpush3.xpose.msra.mxu0 %v538_v22 }
  0xf8   : > { %2765 = vmatprep.subr.mxu0 %v553_v23 }
  0xfb   : > { %2766 = vmatpush3.xpose.msra.mxu0 %v537_v24 }
  0xfc   : > { %2767 = vmatprep.subr.mxu0 %v552_v25 }
  0xff   : > { %2768 = vmatpush3.xpose.msra.mxu0 %v536_v26 }
 0x100   : > { %2769 = vmatprep.subr.mxu0 %v551_v27 }
 0x103   : > { %2770 = vmatpush3.xpose.msra.mxu0 %v535_v28 }
 0x104   : > { %2771 = vmatprep.subr.mxu0 %v550_v29 }
 0x107   : > { %2772 = vmatpush3.xpose.msra.mxu0 %v534_v30 }
 0x108   : > { %2773 = vmatprep.subr.mxu0 %v549_v31 }
 0x10b   : > { %2774 = vmatpush3.xpose.msra.mxu0 %v533_v32 }
 0x10c   : > { %2775 = vmatprep.subr.mxu0 %v548_v33 }
 0x10f   : > { %2776 = vmatpush3.xpose.msra.mxu0 %v532_v34 }
 0x112   : > { %2778 = vmatmul.mubr.f32.vlgmr.msra.gmra.mxu0 %v500_v9 }
 0x113   : > { %2779 = vmatprep.mubr.f32.mxu0 %v501_v35 }
 0x116   : > { %2780 = vmatmul.mubr.f32.gmra.mxu0 %v501_v35 }
 0x117   : > { %2781 = vmatprep.mubr.f32.mxu0 %v502_v36 }
 0x11a   : > { %2782 = vmatmul.mubr.f32.gmra.mxu0 %v502_v36 }
 0x11b   : > { %2783 = vmatprep.mubr.f32.mxu0 %v503_v37 }
 0x11e   : > { %2784 = vmatmul.mubr.f32.gmra.mxu0 %v503_v37 }
 0x11f   : > { %2785 = vmatprep.mubr.f32.mxu0 %v504_v38 }
 0x122   : > { %2786 = vmatmul.mubr.f32.gmra.mxu0 %v504_v38 }
 0x123   : > { %2787 = vmatprep.mubr.f32.mxu0 %v505_v39 }
 0x126   : > { %2788 = vmatmul.mubr.f32.gmra.mxu0 %v505_v39 }
 0x127   : > { %2789 = vmatprep.mubr.f32.mxu0 %v506_v40 }
 0x12a   : > { %2790 = vmatmul.mubr.f32.gmra.mxu0 %v506_v40 }
 0x12b   : > { %2791 = vmatprep.mubr.f32.mxu0 %v507_v41 }
 0x12e   : > { %2792 = vmatmul.mubr.f32.gmra.mxu0 %v507_v41 }
 0x12f   : > { %2793 = vmatprep.mubr.f32.mxu0 %v508_v42 }
 0x132   : > { %2794 = vmatmul.mubr.f32.gmra.mxu0 %v508_v42 }
 0x133   : > { %2795 = vmatprep.mubr.f32.mxu0 %v509_v43 }
 0x136   : > { %2796 = vmatmul.mubr.f32.gmra.mxu0 %v509_v43 }
 0x137   : > { %2797 = vmatprep.mubr.f32.mxu0 %v510_v44 }
 0x13a   : > { %2798 = vmatmul.mubr.f32.gmra.mxu0 %v510_v44 }
 0x13b   : > { %2799 = vmatprep.mubr.f32.mxu0 %v511_v45 }
 0x13e   : > { %2800 = vmatmul.mubr.f32.gmra.mxu0 %v511_v45 }
 0x13f   : > { %2801 = vmatprep.mubr.f32.mxu0 %v512_v46 }
 0x142   : > { %2802 = vmatmul.mubr.f32.gmra.mxu0 %v512_v46 }
 0x143   : > { %2803 = vmatprep.mubr.f32.mxu0 %v513_v47 }
 0x146   : > { %2804 = vmatmul.mubr.f32.gmra.mxu0 %v513_v47 }
 0x147   : > { %2805 = vmatprep.mubr.f32.mxu0 %v514_v48 }
 0x14a   : > { %2806 = vmatmul.mubr.f32.gmra.mxu0 %v514_v48 }
 0x14b   : > { %2807 = vmatprep.mubr.f32.mxu0 %v515_v49 }
 0x14e   : > { %2808 = vmatmul.mubr.f32.gmra.mxu0 %v515_v49 }
 0x14f   : > { %2809 = vmatprep.mubr.f32.mxu0 %v516_v50 }
 0x152   : > { %2810 = vmatmul.mubr.f32.gmra.mxu0 %v516_v50 }
 0x153   : > { %2811 = vmatprep.mubr.f32.mxu0 %v517_v51 }
 0x156   : > { %2812 = vmatmul.mubr.f32.gmra.mxu0 %v517_v51 }
 0x157   : > { %2813 = vmatprep.mubr.f32.mxu0 %v518_v52 }
 0x15a   : > { %2814 = vmatmul.mubr.f32.gmra.mxu0 %v518_v52 }
 0x15b   : > { %2815 = vmatprep.mubr.f32.mxu0 %v519_v53 }
 0x15e   : > { %2816 = vmatmul.mubr.f32.gmra.mxu0 %v519_v53 }
 0x15f   : > { %2817 = vmatprep.mubr.f32.mxu0 %v520_v54 }
 0x162   : > { %2818 = vmatmul.mubr.f32.gmra.mxu0 %v520_v54 }
 0x163   : > { %2819 = vmatprep.mubr.f32.mxu0 %v521_v55 }
 0x166   : > { %2820 = vmatmul.mubr.f32.gmra.mxu0 %v521_v55 }
 0x167   : > { %2821 = vmatprep.mubr.f32.mxu0 %v522_v56 }
 0x16a   : > { %2822 = vmatmul.mubr.f32.gmra.mxu0 %v522_v56 }
 0x16b   : > { %2823 = vmatprep.mubr.f32.mxu0 %v523_v57 }
 0x16e   : > { %2824 = vmatmul.mubr.f32.gmra.mxu0 %v523_v57 }
 0x16f   : > { %2825 = vmatprep.mubr.f32.mxu0 %v524_v58 }
 0x172   : > { %2826 = vmatmul.mubr.f32.gmra.mxu0 %v524_v58 }
 0x173   : > { %2827 = vmatprep.mubr.f32.mxu0 %v525_v59 }
 0x176   : > { %2828 = vmatmul.mubr.f32.gmra.mxu0 %v525_v59 }
 0x177   : > { %2829 = vmatprep.mubr.f32.mxu0 %v526_v60 }
 0x17a   : > { %2830 = vmatmul.mubr.f32.gmra.mxu0 %v526_v60 }
 0x17b   : > { %2831 = vmatprep.mubr.f32.mxu0 %v527_v61 }
 0x17e   : > { %2832 = vmatmul.mubr.f32.gmra.mxu0 %v527_v61 }
 0x17f   : > { %2833 = vmatprep.mubr.f32.mxu0 %v528_v62 }
 0x182   : > { %2834 = vmatmul.mubr.f32.gmra.mxu0 %v528_v62 }
 0x183   : > { %2835 = vmatprep.mubr.f32.mxu0 %v529_v63 }
 0x186   : > { %2836 = vmatmul.mubr.f32.gmra.mxu0 %v529_v63 }
 0x187   : > { %2837 = vmatprep.mubr.f32.mxu0 %v530_v0 }
 0x18a   : > { %2838 = vmatmul.mubr.f32.gmra.mxu0 %v530_v0 }
 0x18b   : > { %2839 = vmatprep.mubr.f32.mxu0 %v531_v1 }
 0x18e   : > { %2840 = vmatmul.mubr.f32.gmra.mxu0 %v531_v1 }
 0x1d2   : > { %v3972_v2 = vpop.f32.mrf.mxu0 }
 0x1d4   : > { %v3974_v3 = vpop.f32.mrf.mxu0 }
 0x1d5   : > { %v885_v4 = vmax.f32 %v3972_v2, %v3974_v3 }
 0x1d6   : > { %v3978_v5 = vpop.f32.mrf.mxu0 }
 0x1d7   : > { %886 = vmax.xlane.f32.xlu0 %v885_v4 }
 0x1d8   : > { %v3980_v6 = vpop.f32.mrf.mxu0 }
 0x1d9   : > { %v888_v7 = vmax.f32 %v3978_v5, %v3980_v6 }
 0x1da   : > { %v3984_v8 = vpop.f32.mrf.mxu0 }
 0x1db   : > { %889 = vmax.xlane.f32.xlu0 %v888_v7 }
 0x1dc   : > { %v3986_v9 = vpop.f32.mrf.mxu0 }
 0x1dd   : > { %v891_v10 = vmax.f32 %v3984_v8, %v3986_v9 }
 0x1de   : > { %v3990_v11 = vpop.f32.mrf.mxu0 }
 0x1df   : > { %892 = vmax.xlane.f32.xlu1 %v891_v10 }
 0x1e0   : > { %v3992_v12 = vpop.f32.mrf.mxu0 }
 0x1e1   : > { %v894_v13 = vmax.f32 %v3990_v11, %v3992_v12 }
 0x1e2   : > { %v3996_v14 = vpop.f32.mrf.mxu0 }
 0x1e3   : > { %895 = vmax.xlane.f32.xlu1 %v894_v13 }
 0x1e4   : > { %v3998_v16 = vpop.f32.mrf.mxu0 }
 0x1e5   : > { %v897_v17 = vmax.f32 %v3996_v14, %v3998_v16 }
 0x1e6   : > { %v4002_v18 = vpop.f32.mrf.mxu0 }
 0x1e7   : > { %898 = vmax.xlane.f32.xlu0 %v897_v17 }
 0x1e8   : > { %v4004_v19 = vpop.f32.mrf.mxu0 }
 0x1e9   : > { %v900_v20 = vmax.f32 %v4002_v18, %v4004_v19 }
 0x1ea   : > { %v4008_v21 = vpop.f32.mrf.mxu0 }
 0x1eb   : > { %901 = vmax.xlane.f32.xlu1 %v900_v20 }
 0x1ec   : > { %v4010_v22 = vpop.f32.mrf.mxu0 }
 0x1ed   : > { %v903_v23 = vmax.f32 %v4008_v21, %v4010_v22 }
 0x1ee   : > { %v4014_v24 = vpop.f32.mrf.mxu0 }
 0x1ef   : > { %904 = vmax.xlane.f32.xlu0 %v903_v23 }
 0x1f0   : > { %v4016_v25 = vpop.f32.mrf.mxu0 }
 0x1f1   : > { %v906_v26 = vmax.f32 %v4014_v24, %v4016_v25 }
 0x1f2   : > { %v4020_v27 = vpop.f32.mrf.mxu0 }
 0x1f3   : > { %907 = vmax.xlane.f32.xlu1 %v906_v26 }
 0x1f4   : > { %v4022_v28 = vpop.f32.mrf.mxu0 }
 0x1f5   : > { %v909_v29 = vmax.f32 %v4020_v27, %v4022_v28 }
 0x1f6   : > { %v4026_v30 = vpop.f32.mrf.mxu0 }
 0x1f7   : > { %910 = vmax.xlane.f32.xlu0 %v909_v29 }
 0x1f8   : > { %v4028_v31 = vpop.f32.mrf.mxu0 }
 0x1f9   : > { %v912_v32 = vmax.f32 %v4026_v30, %v4028_v31 }
 0x1fa   : > { %v4032_v33 = vpop.f32.mrf.mxu0 }
 0x1fb   : > { %913 = vmax.xlane.f32.xlu1 %v912_v32  ;;  %v3472_v32 = vmov 0.0  }
 0x1fc   : > { %v4034_v34 = vpop.f32.mrf.mxu0  ;;  %1942 = vmatprep.subr.mxu1 %v3472_v32 }
 0x1fd   : > { %v915_v35 = vmax.f32 %v4032_v33, %v4034_v34 }
 0x1fe   : > { %v4038_v36 = vpop.f32.mrf.mxu0 }
 0x1ff   : > { %916 = vmax.xlane.f32.xlu0 %v915_v35  ;;  %v579_v35 = vld [vmem:[%s3766_s18 + $0x78] sm:$0xff] }
 0x200   : > { %v4040_v37 = vpop.f32.mrf.mxu0  ;;  %1943 = vmatpush1.msra.mxu1 %v579_v35 }
 0x201   : > { %v918_v38 = vmax.f32 %v4038_v36, %v4040_v37  ;;  %1944 = vmatprep.subr.mxu1 %v3472_v32 }
 0x202   : > { %v4044_v39 = vpop.f32.mrf.mxu0 }
 0x203   : > { %919 = vmax.xlane.f32.xlu1 %v918_v38 }
 0x204   : > { %v4046_v40 = vpop.f32.mrf.mxu0 }
 0x205   : > { %v921_v41 = vmax.f32 %v4044_v39, %v4046_v40 }
 0x206   : > { %v4050_v42 = vpop.f32.mrf.mxu0 }
 0x207   : > { %922 = vmax.xlane.f32.xlu0 %v921_v41  ;;  %v578_v41 = vld [vmem:[%s3766_s18 + $0x70] sm:$0xff] }
 0x208   : > { %v4052_v43 = vpop.f32.mrf.mxu0  ;;  %1945 = vmatpush1.msra.mxu1 %v578_v41  ;;  %v573_v41 = vld [vmem:[%s3766_s18 + $0x48] sm:$0xff] }
 0x209   : > { %v924_v44 = vmax.f32 %v4050_v42, %v4052_v43  ;;  %1946 = vmatprep.subr.mxu1 %v3472_v32 }
 0x20a   : > { %v4056_v45 = vpop.f32.mrf.mxu0 }
 0x20b   : > { %925 = vmax.xlane.f32.xlu1 %v924_v44 }
 0x20c   : > { %v4058_v46 = vpop.f32.mrf.mxu0 }
 0x20d   : > { %5269 = vst [vmem:[#allocation31_spill] sm:$0xff] %v4058_v46  ;;  %v927_v47 = vmax.f32 %v4056_v45, %v4058_v46 }
 0x20e   : > { %v4062_v48 = vpop.f32.mrf.mxu0 }
 0x20f   : > { %5270 = vst [vmem:[#allocation32_spill] sm:$0xff] %v4062_v48  ;;  %928 = vmax.xlane.f32.xlu0 %v927_v47 }
 0x210   : > { %v4064_v49 = vpop.f32.mrf.mxu0 }
 0x211   : > { %5271 = vst [vmem:[#allocation33_spill] sm:$0xff] %v4064_v49  ;;  %v930_v50 = vmax.f32 %v4062_v48, %v4064_v49 }
 0x212   : > { %v4068_v51 = vpop.f32.mrf.mxu0 }
 0x213   : > { %5272 = vst [vmem:[#allocation34_spill] sm:$0xff] %v4068_v51  ;;  %931 = vmax.xlane.f32.xlu1 %v930_v50  ;;  %v577_v50 = vld [vmem:[%s3766_s18 + $0x68] sm:$0xff] }
 0x214   : > { %v4070_v52 = vpop.f32.mrf.mxu0  ;;  %1947 = vmatpush1.msra.mxu1 %v577_v50  ;;  %v572_v50 = vld [vmem:[%s3766_s18 + $0x40] sm:$0xff] }
 0x215   : > { %5273 = vst [vmem:[#allocation35_spill] sm:$0xff] %v4070_v52  ;;  %v933_v53 = vmax.f32 %v4068_v51, %v4070_v52  ;;  %1948 = vmatprep.subr.mxu1 %v3472_v32  ;;  %v4343_v52 = vld [vmem:[#allocation3 + $0x60] sm:$0xff]  ;;  %v4373_v51 = vld [vmem:[#allocation3 + $0x78] sm:$0xff] }
 0x216   : > { %v4074_v54 = vpop.f32.mrf.mxu0  ;;  %5312 = vst [vmem:[#allocation74_spill] sm:$0xff] %v4373_v51 }
 0x217   : > { %5274 = vst [vmem:[#allocation36_spill] sm:$0xff] %v4074_v54  ;;  %934 = vmax.xlane.f32.xlu0 %v933_v53 }
 0x218   : > { %v4076_v55 = vpop.f32.mrf.mxu0 }
 0x219   : > { %5275 = vst [vmem:[#allocation37_spill] sm:$0xff] %v4076_v55  ;;  %v936_v56 = vmax.f32 %v4074_v54, %v4076_v55 }
 0x21a   : > { %v4080_v57 = vpop.f32.mrf.mxu0 }
 0x21b   : > { %5276 = vst [vmem:[#allocation38_spill] sm:$0xff] %v4080_v57  ;;  %937 = vmax.xlane.f32.xlu1 %v936_v56  ;;  %v576_v56 = vld [vmem:[%s3766_s18 + $0x60] sm:$0xff] }
 0x21c   : > { %v4082_v58 = vpop.f32.mrf.mxu0  ;;  %1949 = vmatpush1.msra.mxu1 %v576_v56 }
 0x21d   : > { %5277 = vst [vmem:[#allocation39_spill] sm:$0xff] %v4082_v58  ;;  %v939_v59 = vmax.f32 %v4080_v57, %v4082_v58  ;;  %1950 = vmatprep.subr.mxu1 %v3472_v32  ;;  %v4321_v57 = vld [vmem:[#allocation3 + $0x50] sm:$0xff] }
 0x21e   : > { %v4086_v60 = vpop.f32.mrf.mxu0 }
 0x21f   : > { %5278 = vst [vmem:[#allocation40_spill] sm:$0xff] %v4086_v60  ;;  %940 = vmax.xlane.f32.xlu0 %v939_v59 }
 0x220   : > { %v4088_v61 = vpop.f32.mrf.mxu0 }
 0x221   : > { %5279 = vst [vmem:[#allocation41_spill] sm:$0xff] %v4088_v61  ;;  %v942_v62 = vmax.f32 %v4086_v60, %v4088_v61 }
 0x222   : > { %v4092_v63 = vpop.f32.mrf.mxu0 }
 0x223   : > { %5280 = vst [vmem:[#allocation42_spill] sm:$0xff] %v4092_v63  ;;  %943 = vmax.xlane.f32.xlu0 %v942_v62 }
 0x224   : > { %v4094_v0 = vpop.f32.mrf.mxu0 }
 0x225   : > { %5281 = vst [vmem:[#allocation43_spill] sm:$0xff] %v4094_v0  ;;  %v945_v1 = vmax.f32 %v4092_v63, %v4094_v0  ;;  %v4305_v63 = vld [vmem:[#allocation3 + $0x48] sm:$0xff] }
 0x226   : > { %v4098_v4 = vpop.f32.mrf.mxu0  ;;  %5302 = vst [vmem:[#allocation64_spill] sm:$0xff] %v4305_v63 }
 0x227   : > { %5282 = vst [vmem:[#allocation44_spill] sm:$0xff] %v4098_v4  ;;  %946 = vmax.xlane.f32.xlu1 %v945_v1  ;;  %v575_v1 = vld [vmem:[%s3766_s18 + $0x58] sm:$0xff] }
 0x228   : > { %v4100_v7 = vpop.f32.mrf.mxu0  ;;  %1951 = vmatpush1.msra.mxu1 %v575_v1  ;;  %v571_v1 = vld [vmem:[%s3766_s18 + $0x38] sm:$0xff] }
 0x229   : > { %5283 = vst [vmem:[#allocation45_spill] sm:$0xff] %v4100_v7  ;;  %v948_v10 = vmax.f32 %v4098_v4, %v4100_v7  ;;  %1952 = vmatprep.subr.mxu1 %v3472_v32  ;;  %v4293_v7 = vld [vmem:[#allocation3 + $0x40] sm:$0xff] }
 0x22a   : > { %v4104_v13 = vpop.f32.mrf.mxu0 }
 0x22b   : > { %5284 = vst [vmem:[#allocation46_spill] sm:$0xff] %v4104_v13  ;;  %949 = vmax.xlane.f32.xlu1 %v948_v10 }
 0x22c   : > { %v4106_v15 = vpop.f32.mrf.mxu0 }
 0x22d   : > { %5285 = vst [vmem:[#allocation47_spill] sm:$0xff] %v4106_v15  ;;  %v951_v17 = vmax.f32 %v4104_v13, %v4106_v15 }
 0x22e   : > { %v4110_v20 = vpop.f32.mrf.mxu0 }
 0x22f   : > { %5286 = vst [vmem:[#allocation48_spill] sm:$0xff] %v4110_v20  ;;  %952 = vmax.xlane.f32.xlu1 %v951_v17  ;;  %v574_v17 = vld [vmem:[%s3766_s18 + $0x50] sm:$0xff] }
 0x230   : > { %v4112_v23 = vpop.f32.mrf.mxu0  ;;  %1953 = vmatpush1.msra.mxu1 %v574_v17 }
 0x231   : > { %5287 = vst [vmem:[#allocation49_spill] sm:$0xff] %v4112_v23  ;;  %v954_v26 = vmax.f32 %v4110_v20, %v4112_v23  ;;  %1954 = vmatprep.subr.mxu1 %v3472_v32  ;;  %v4281_v20 = vld [vmem:[#allocation3 + $0x38] sm:$0xff] }
 0x232   : > { %v4116_v29 = vpop.f32.mrf.mxu0  ;;  %1955 = vmatpush1.msra.mxu1 %v573_v41 }
 0x233   : > { %5288 = vst [vmem:[#allocation50_spill] sm:$0xff] %v4116_v29  ;;  %955 = vmax.xlane.f32.xlu1 %v954_v26  ;;  %1956 = vmatprep.subr.mxu1 %v3472_v32 }
 0x234   : > { %v4120_v38 = vpop.f32.mrf.mxu0  ;;  %1957 = vmatpush1.msra.mxu1 %v572_v50 }
 0x235   : > { %5289 = vst [vmem:[#allocation51_spill] sm:$0xff] %v4120_v38  ;;  %v957_v44 = vmax.f32 %v4116_v29, %v4120_v38  ;;  %1958 = vmatprep.subr.mxu1 %v3472_v32  ;;  %v580_v29 = vld [vmem:[%s3766_s18 + $0x80] sm:$0xff] }
 0x236   : > { %v4126_v47 = vpop.f32.mrf.mxu0  ;;  %1959 = vmatpush1.msra.mxu1 %v571_v1  ;;  %v568_v1 = vld [vmem:[%s3766_s18 + $0x20] sm:$0xff] }
 0x237   : > { %5290 = vst [vmem:[#allocation52_spill] sm:$0xff] %v4126_v47  ;;  %958 = vmax.xlane.f32.xlu1 %v957_v44  ;;  %1960 = vmatprep.subr.mxu1 %v3472_v32 }
 0x238   : > { %v4130_v53 = vpop.f32.mrf.mxu0 }
 0x239   : > { %5291 = vst [vmem:[#allocation53_spill] sm:$0xff] %v4130_v53  ;;  %v960_v59 = vmax.f32 %v4126_v47, %v4130_v53  ;;  %v4247_v47 = vld [vmem:[#allocation3 + $0x20] sm:$0xff] }
 0x23a   : > { %v4136_v62 = vpop.f32.mrf.mxu0 }
 0x23b   : > { %5292 = vst [vmem:[#allocation54_spill] sm:$0xff] %v4136_v62  ;;  %961 = vmax.xlane.f32.xlu1 %v960_v59 }
 0x23c   : > { %v4140_v10 = vpop.f32.mrf.mxu0 }
 0x23d   : > { %5293 = vst [vmem:[#allocation55_spill] sm:$0xff] %v4140_v10  ;;  %v963_v26 = vmax.f32 %v4136_v62, %v4140_v10  ;;  %v4233_v62 = vld [vmem:[#allocation3 + $0x18] sm:$0xff] }
 0x23e   : > { %v4146_v35 = vpop.f32.mrf.mxu0 }
 0x23f   : > { %5294 = vst [vmem:[#allocation56_spill] sm:$0xff] %v4146_v35  ;;  %964 = vmax.xlane.f32.xlu1 %v963_v26  ;;  %v570_v26 = vld [vmem:[%s3766_s18 + $0x30] sm:$0xff] }
 0x240   : > { %v4150_v44 = vpop.f32.mrf.mxu0  ;;  %1961 = vmatpush1.msra.mxu1 %v570_v26  ;;  %v567_v26 = vld [vmem:[%s3766_s18 + $0x18] sm:$0xff] }
 0x241   : > { %5295 = vst [vmem:[#allocation57_spill] sm:$0xff] %v4150_v44  ;;  %v966_v56 = vmax.f32 %v4146_v35, %v4150_v44  ;;  %1962 = vmatprep.subr.mxu1 %v3472_v32  ;;  %v569_v44 = vld [vmem:[%s3766_s18 + $0x28] sm:$0xff] }
 0x242   : > { %v4156_v59 = vpop.f32.mrf.mxu0  ;;  %1963 = vmatpush1.msra.mxu1 %v569_v44  ;;  %v566_v44 = vld [vmem:[%s3766_s18 + $0x10] sm:$0xff] }
 0x243   : > { %5296 = vst [vmem:[#allocation58_spill] sm:$0xff] %v4156_v59  ;;  %967 = vmax.xlane.f32.xlu1 %v966_v56  ;;  %1964 = vmatprep.subr.mxu1 %v3472_v32 }
 0x244   : > { %v4160_v17 = vpop.f32.mrf.mxu0  ;;  %1965 = vmatpush1.msra.mxu1 %v568_v1  ;;  %v564_v1 = vld [vmem:[%s3766_s18] sm:$0xff] }
 0x245   : > { %5297 = vst [vmem:[#allocation59_spill] sm:$0xff] %v4160_v17  ;;  %v969_v41 = vmax.f32 %v4156_v59, %v4160_v17  ;;  %1966 = vmatprep.subr.mxu1 %v3472_v32  ;;  %v4219_v59 = vld [vmem:[#allocation3 + $0x10] sm:$0xff] }
 0x246   : > { %v4166_v50 = vpop.f32.mrf.mxu0  ;;  %1967 = vmatpush1.msra.mxu1 %v567_v26  ;;  %v594_v26 = vld [vmem:[%s3766_s18 + $0xf0] sm:$0xff] }
 0x247   : > { %5298 = vst [vmem:[#allocation60_spill] sm:$0xff] %v4166_v50  ;;  %970 = vmax.xlane.f32.xlu1 %v969_v41  ;;  %1968 = vmatprep.subr.mxu1 %v3472_v32  ;;  %v565_v41 = vld [vmem:[%s3766_s18 + $0x8] sm:$0xff] }
 0x248   : > { %v4170_v56 = vpop.f32.mrf.mxu0  ;;  %1969 = vmatpush1.msra.mxu1 %v566_v44  ;;  %v593_v44 = vld [vmem:[%s3766_s18 + $0xe8] sm:$0xff] }
 0x249   : > { %5299 = vst [vmem:[#allocation61_spill] sm:$0xff] %v4170_v56  ;;  %v972_v35 = vmax.f32 %v4166_v50, %v4170_v56  ;;  %1970 = vmatprep.subr.mxu1 %v3472_v32  ;;  %v590_v56 = vld [vmem:[%s3766_s18 + $0xd0] sm:$0xff]  ;;  %v4205_v50 = vld [vmem:[#allocation3 + $0x8] sm:$0xff] }
 0x24a   : > { %1971 = vmatpush1.msra.mxu1 %v565_v41  ;;  %v592_v41 = vld [vmem:[%s3766_s18 + $0xe0] sm:$0xff]  ;;  %v4283_v15 = vpop.f32.mrf.mxu0 }
 0x24b   : > { %973 = vmax.xlane.f32.xlu1 %v972_v35  ;;  %1972 = vmatprep.subr.mxu1 %v3472_v32  ;;  %v595_v35 = vld [vmem:[%s3766_s18 + $0xf8] sm:$0xff]  ;;  %5300 = vst [vmem:[#allocation62_spill] sm:$0xff] %v4283_v15 }
 0x24c   : > { %1973 = vmatpush1.msra.mxu1 %v564_v1  ;;  %v591_v1 = vld [vmem:[%s3766_s18 + $0xd8] sm:$0xff] }
 0x24d   : > { %1974 = vmatprep.subr.mxu1 %v3472_v32 }
 0x24e   : > { %1975 = vmatpush2.msra.mxu1 %v595_v35  ;;  %v4196_v35 = vld [vmem:[#allocation3] sm:$0xff] }
 0x24f   : > { %1976 = vmatprep.subr.mxu1 %v3472_v32 }
 0x250   : > { %1977 = vmatpush2.msra.mxu1 %v594_v26  ;;  %v589_v26 = vld [vmem:[%s3766_s18 + $0xc8] sm:$0xff] }
 0x251   : > { %1978 = vmatprep.subr.mxu1 %v3472_v32 }
 0x252   : > { %1979 = vmatpush2.msra.mxu1 %v593_v44 }
 0x253   : > { %1980 = vmatprep.subr.mxu1 %v3472_v32 }
 0x254   : > { %1981 = vmatpush2.msra.mxu1 %v592_v41 }
 0x255   : > { %1982 = vmatprep.subr.mxu1 %v3472_v32 }
 0x256   : > { %1983 = vmatpush2.msra.mxu1 %v591_v1  ;;  %v588_v1 = vld [vmem:[%s3766_s18 + $0xc0] sm:$0xff] }
 0x257   : > { %1984 = vmatprep.subr.mxu1 %v3472_v32 }
 0x258   : > { %1985 = vmatpush2.msra.mxu1 %v590_v56 }
 0x259   : > { %1986 = vmatprep.subr.mxu1 %v3472_v32 }
 0x25a   : > { %1987 = vmatpush2.msra.mxu1 %v589_v26  ;;  %v587_v26 = vld [vmem:[%s3766_s18 + $0xb8] sm:$0xff] }
 0x25b   : > { %1988 = vmatprep.subr.mxu1 %v3472_v32 }
 0x25c   : > { %1989 = vmatpush2.msra.mxu1 %v588_v1  ;;  %v586_v1 = vld [vmem:[%s3766_s18 + $0xb0] sm:$0xff] }
 0x25d   : > { %1990 = vmatprep.subr.mxu1 %v3472_v32 }
 0x25e   : > { %1991 = vmatpush2.msra.mxu1 %v587_v26  ;;  %v585_v26 = vld [vmem:[%s3766_s18 + $0xa8] sm:$0xff] }
 0x25f   : > { %1992 = vmatprep.subr.mxu1 %v3472_v32 }
 0x260   : > { %v887_v44 = vpop.xlane.xlu0 %886  ;;  %1993 = vmatpush2.msra.mxu1 %v586_v1  ;;  %v584_v1 = vld [vmem:[%s3766_s18 + $0xa0] sm:$0xff] }
 0x261   : > { %v4201_v41 = vmax.f32 %v4196_v35, %v887_v44  ;;  %1994 = vmatprep.subr.mxu1 %v3472_v32 }
 0x262   : > { %1995 = vmatpush2.msra.mxu1 %v585_v26  ;;  %v583_v26 = vld [vmem:[%s3766_s18 + $0x98] sm:$0xff] }
 0x263   : > { %1686 = vst.msk [vmem:[#allocation3] sm:$0xff] %vm1653_vm1, %v4201_v41  ;;  %1111 = vperm.xlu1 %2978, %v4201_v41   ;;  %1996 = vmatprep.subr.mxu1 %v3472_v32 }
 0x264   : > { %v890_v44 = vpop.xlane.xlu0 %889  ;;  %1997 = vmatpush2.msra.mxu1 %v584_v1  ;;  %v582_v1 = vld [vmem:[%s3766_s18 + $0x90] sm:$0xff] }
 0x265   : > { %v4215_v17 = vmax.f32 %v4205_v50, %v890_v44  ;;  %1998 = vmatprep.subr.mxu1 %v3472_v32 }
 0x266   : > { %1999 = vmatpush2.msra.mxu1 %v583_v26  ;;  %v581_v26 = vld [vmem:[%s3766_s18 + $0x88] sm:$0xff] }
 0x267   : > { %1687 = vst.msk [vmem:[#allocation3 + $0x8] sm:$0xff] %vm1653_vm1, %v4215_v17  ;;  %1116 = vperm.xlu0 %2979, %v4215_v17   ;;  %2000 = vmatprep.subr.mxu1 %v3472_v32 }
 0x268   : > { %v893_v44 = vpop.xlane.xlu1 %892  ;;  %2001 = vmatpush2.msra.mxu1 %v582_v1  ;;  %v4261_v1 = vld [vmem:[#allocation3 + $0x28] sm:$0xff] }
 0x269   : > { %v4229_v10 = vmax.f32 %v4219_v59, %v893_v44  ;;  %2002 = vmatprep.subr.mxu1 %v3472_v32 }
 0x26a   : > { %2003 = vmatpush2.msra.mxu1 %v581_v26 }
 0x26b   : > { %1688 = vst.msk [vmem:[#allocation3 + $0x10] sm:$0xff] %vm1653_vm1, %v4229_v10  ;;  %1121 = vperm.xlu0 %2979, %v4229_v10   ;;  %2004 = vmatprep.subr.mxu1 %v3472_v32 }
 0x26c   : > { %v896_v44 = vpop.xlane.xlu1 %895  ;;  %2005 = vmatpush2.msra.mxu1 %v580_v29 }
 0x26d   : > { %v4243_v53 = vmax.f32 %v4233_v62, %v896_v44 }
 0x26f   : > { %1689 = vst.msk [vmem:[#allocation3 + $0x18] sm:$0xff] %vm1653_vm1, %v4243_v53  ;;  %1126 = vperm.xlu0 %2979, %v4243_v53  }
 0x270   : > { %v899_v38 = vpop.xlane.xlu0 %898 }
 0x271   : > { %v4257_v44 = vmax.f32 %v4247_v47, %v899_v38  ;;  %v4271_v38 = vld [vmem:[#allocation3 + $0x30] sm:$0xff] }
 0x273   : > { %1690 = vst.msk [vmem:[#allocation3 + $0x20] sm:$0xff] %vm1653_vm1, %v4257_v44  ;;  %1131 = vperm.xlu0 %2979, %v4257_v44  }
 0x274   : > { %v902_v23 = vpop.xlane.xlu1 %901 }
 0x275   : > { %v4269_v26 = vmax.f32 %v4261_v1, %v902_v23 }
 0x277   : > { %1691 = vst.msk [vmem:[#allocation3 + $0x28] sm:$0xff] %vm1653_vm1, %v4269_v26  ;;  %1136 = vperm.xlu0 %2979, %v4269_v26  }
 0x278   : > { %v905_v29 = vpop.xlane.xlu0 %904 }
 0x279   : > { %v4279_v56 = vmax.f32 %v4271_v38, %v905_v29  ;;  %v4295_v29 = vpop.f32.mrf.mxu0 }
 0x27a   : > { %5301 = vst [vmem:[#allocation63_spill] sm:$0xff] %v4295_v29 }
 0x27b   : > { %1692 = vst.msk [vmem:[#allocation3 + $0x30] sm:$0xff] %vm1653_vm1, %v4279_v56  ;;  %1141 = vperm.xlu0 %2979, %v4279_v56  }
 0x27c   : > { %v908_v32 = vpop.xlane.xlu1 %907 }
 0x27d   : > { %v4291_v13 = vmax.f32 %v4281_v20, %v908_v32  ;;  %v4307_v32 = vpop.f32.mrf.mxu0 }
 0x27e   : > { %5303 = vst [vmem:[#allocation65_spill] sm:$0xff] %v4307_v32 }
 0x27f   : > { %1693 = vst.msk [vmem:[#allocation3 + $0x38] sm:$0xff] %vm1653_vm1, %v4291_v13  ;;  %1146 = vperm.xlu0 %2979, %v4291_v13   ;;  %v4319_v58 = vpop.f32.mrf.mxu0 }
 0x280   : > { %v911_v23 = vpop.xlane.xlu0 %910  ;;  %5305 = vst [vmem:[#allocation67_spill] sm:$0xff] %v4319_v58 }
 0x281   : > { %v4303_v0 = vmax.f32 %v4293_v7, %v911_v23  ;;  %v975_v23 = vmax.f32 %v4283_v15, %v4295_v29  ;;  %v4333_v29 = vld [vmem:[#allocation3 + $0x58] sm:$0xff] }
 0x282   : > { %5306 = vst [vmem:[#allocation68_spill] sm:$0xff] %v4333_v29 }
 0x283   : > { %1694 = vst.msk [vmem:[#allocation3 + $0x40] sm:$0xff] %vm1653_vm1, %v4303_v0  ;;  %1151 = vperm.xlu0 %2979, %v4303_v0  }
 0x284   : > { %v914_v4 = vpop.xlane.xlu1 %913 }
 0x285   : > { %v4315_v60 = vmax.f32 %v4305_v63, %v914_v4  ;;  %v978_v4 = vmax.f32 %v4307_v32, %v4319_v58  ;;  %v4353_v32 = vld [vmem:[#allocation3 + $0x68] sm:$0xff] }
 0x286   : > { %5308 = vst [vmem:[#allocation70_spill] sm:$0xff] %v4353_v32  ;;  %v4393_v63 = vld [vmem:[#allocation3 + $0x88] sm:$0xff] }
 0x287   : > { %5304 = vst [vmem:[#allocation66_spill] sm:$0xff] %v4315_v60  ;;  %1695 = vst.msk [vmem:[#allocation3 + $0x48] sm:$0xff] %vm1653_vm1, %v4315_v60  ;;  %1156 = vperm.xlu0 %2979, %v4315_v60   ;;  %976 = vmax.xlane.f32.xlu1 %v975_v23 }
 0x288   : > { %v917_v61 = vpop.xlane.xlu0 %916  ;;  %5316 = vst [vmem:[#allocation78_spill] sm:$0xff] %v4393_v63 }
 0x289   : > { %v4331_v54 = vmax.f32 %v4321_v57, %v917_v61 }
 0x28b   : > { %1696 = vst.msk [vmem:[#allocation3 + $0x50] sm:$0xff] %vm1653_vm1, %v4331_v54  ;;  %1161 = vperm.xlu0 %2979, %v4331_v54   ;;  %979 = vmax.xlane.f32.xlu1 %v978_v4 }
 0x28c   : > { %v920_v55 = vpop.xlane.xlu1 %919 }
 0x28d   : > { %v4341_v23 = vmax.f32 %v4333_v29, %v920_v55  ;;  %v4363_v29 = vld [vmem:[#allocation3 + $0x70] sm:$0xff] }
 0x28e   : > { %5310 = vst [vmem:[#allocation72_spill] sm:$0xff] %v4363_v29 }
 0x28f   : > { %5307 = vst [vmem:[#allocation69_spill] sm:$0xff] %v4341_v23  ;;  %1697 = vst.msk [vmem:[#allocation3 + $0x58] sm:$0xff] %vm1653_vm1, %v4341_v23  ;;  %1166 = vperm.xlu0 %2979, %v4341_v23  }
 0x290   : > { %v923_v15 = vpop.xlane.xlu0 %922 }
 0x291   : > { %v4351_v58 = vmax.f32 %v4343_v52, %v923_v15 }
 0x293   : > { %1698 = vst.msk [vmem:[#allocation3 + $0x60] sm:$0xff] %vm1653_vm1, %v4351_v58  ;;  %1171 = vperm.xlu0 %2979, %v4351_v58  }
 0x294   : > { %v926_v4 = vpop.xlane.xlu1 %925 }
 0x295   : > { %v4361_v61 = vmax.f32 %v4353_v32, %v926_v4  ;;  %v4383_v32 = vld [vmem:[#allocation3 + $0x80] sm:$0xff] }
 0x296   : > { %5314 = vst [vmem:[#allocation76_spill] sm:$0xff] %v4383_v32 }
 0x297   : > { %5309 = vst [vmem:[#allocation71_spill] sm:$0xff] %v4361_v61  ;;  %1699 = vst.msk [vmem:[#allocation3 + $0x68] sm:$0xff] %vm1653_vm1, %v4361_v61  ;;  %1176 = vperm.xlu0 %2979, %v4361_v61  }
 0x298   : > { %v929_v55 = vpop.xlane.xlu0 %928 }
 0x299   : > { %v4371_v23 = vmax.f32 %v4363_v29, %v929_v55 }
 0x29b   : > { %5311 = vst [vmem:[#allocation73_spill] sm:$0xff] %v4371_v23  ;;  %1700 = vst.msk [vmem:[#allocation3 + $0x70] sm:$0xff] %vm1653_vm1, %v4371_v23 }
 0x29c   : > { %v932_v60 = vpop.xlane.xlu1 %931  ;;  %1181 = vperm.xlu1 %2978, %v4371_v23   ;;  %v4403_v23 = vld [vmem:[#allocation3 + $0x90] sm:$0xff] }
 0x29d   : > { %v4381_v15 = vmax.f32 %v4373_v51, %v932_v60  ;;  %5318 = vst [vmem:[#allocation80_spill] sm:$0xff] %v4403_v23 }
 0x29f   : > { %5313 = vst [vmem:[#allocation75_spill] sm:$0xff] %v4381_v15  ;;  %1701 = vst.msk [vmem:[#allocation3 + $0x78] sm:$0xff] %vm1653_vm1, %v4381_v15  ;;  %1186 = vperm.xlu0 %2979, %v4381_v15  }
 0x2a0   : > { %v935_v4 = vpop.xlane.xlu0 %934 }
 0x2a1   : > { %v4391_v61 = vmax.f32 %v4383_v32, %v935_v4  ;;  %v4413_v32 = vld [vmem:[#allocation3 + $0x98] sm:$0xff] }
 0x2a2   : > { %5320 = vst [vmem:[#allocation82_spill] sm:$0xff] %v4413_v32 }
 0x2a3   : > { %5315 = vst [vmem:[#allocation77_spill] sm:$0xff] %v4391_v61  ;;  %1702 = vst.msk [vmem:[#allocation3 + $0x80] sm:$0xff] %vm1653_vm1, %v4391_v61  ;;  %1191 = vperm.xlu0 %2979, %v4391_v61   ;;  %v4423_v61 = vld [vmem:[#allocation3 + $0xa0] sm:$0xff] }
 0x2a4   : > { %v938_v55 = vpop.xlane.xlu1 %937  ;;  %5322 = vst [vmem:[#allocation84_spill] sm:$0xff] %v4423_v61 }
 0x2a5   : > { %v4401_v51 = vmax.f32 %v4393_v63, %v938_v55 }
 0x2a7   : > { %5317 = vst [vmem:[#allocation79_spill] sm:$0xff] %v4401_v51  ;;  %1703 = vst.msk [vmem:[#allocation3 + $0x88] sm:$0xff] %vm1653_vm1, %v4401_v51  ;;  %1196 = vperm.xlu0 %2979, %v4401_v51  }
 0x2a8   : > { %v941_v60 = vpop.xlane.xlu0 %940 }
 0x2a9   : > { %v4411_v15 = vmax.f32 %v4403_v23, %v941_v60  ;;  %v4433_v23 = vld [vmem:[#allocation3 + $0xa8] sm:$0xff] }
 0x2aa   : > { %5324 = vst [vmem:[#allocation86_spill] sm:$0xff] %v4433_v23 }
 0x2ab   : > { %5319 = vst [vmem:[#allocation81_spill] sm:$0xff] %v4411_v15  ;;  %1704 = vst.msk [vmem:[#allocation3 + $0x90] sm:$0xff] %vm1653_vm1, %v4411_v15  ;;  %1201 = vperm.xlu0 %2979, %v4411_v15   ;;  %v4443_v15 = vld [vmem:[#allocation3 + $0xb0] sm:$0xff] }
 0x2ac   : > { %v944_v4 = vpop.xlane.xlu0 %943  ;;  %5326 = vst [vmem:[#allocation88_spill] sm:$0xff] %v4443_v15 }
 0x2ad   : > { %v4421_v63 = vmax.f32 %v4413_v32, %v944_v4 }
 0x2af   : > { %5321 = vst [vmem:[#allocation83_spill] sm:$0xff] %v4421_v63  ;;  %1705 = vst.msk [vmem:[#allocation3 + $0x98] sm:$0xff] %vm1653_vm1, %v4421_v63  ;;  %1206 = vperm.xlu1 %2978, %v4421_v63  }
 0x2b0   : > { %v947_v55 = vpop.xlane.xlu1 %946 }
 0x2b1   : > { %v4431_v51 = vmax.f32 %v4423_v61, %v947_v55  ;;  %v4453_v61 = vld [vmem:[#allocation3 + $0xb8] sm:$0xff] }
 0x2b2   : > { %5328 = vst [vmem:[#allocation90_spill] sm:$0xff] %v4453_v61 }
 0x2b3   : > { %5323 = vst [vmem:[#allocation85_spill] sm:$0xff] %v4431_v51  ;;  %1706 = vst.msk [vmem:[#allocation3 + $0xa0] sm:$0xff] %vm1653_vm1, %v4431_v51  ;;  %1211 = vperm.xlu0 %2979, %v4431_v51   ;;  %v4463_v51 = vld [vmem:[#allocation3 + $0xc0] sm:$0xff] }
 0x2b4   : > { %v950_v60 = vpop.xlane.xlu1 %949  ;;  %5330 = vst [vmem:[#allocation92_spill] sm:$0xff] %v4463_v51 }
 0x2b5   : > { %v4441_v32 = vmax.f32 %v4433_v23, %v950_v60 }
 0x2b7   : > { %5325 = vst [vmem:[#allocation87_spill] sm:$0xff] %v4441_v32  ;;  %1707 = vst.msk [vmem:[#allocation3 + $0xa8] sm:$0xff] %vm1653_vm1, %v4441_v32  ;;  %1216 = vperm.xlu1 %2978, %v4441_v32  }
 0x2b8   : > { %v953_v4 = vpop.xlane.xlu1 %952 }
 0x2b9   : > { %v4451_v63 = vmax.f32 %v4443_v15, %v953_v4  ;;  %v4473_v15 = vld [vmem:[#allocation3 + $0xc8] sm:$0xff] }
 0x2ba   : > { %5332 = vst [vmem:[#allocation94_spill] sm:$0xff] %v4473_v15 }
 0x2bb   : > { %5327 = vst [vmem:[#allocation89_spill] sm:$0xff] %v4451_v63  ;;  %1708 = vst.msk [vmem:[#allocation3 + $0xb0] sm:$0xff] %vm1653_vm1, %v4451_v63  ;;  %1221 = vperm.xlu0 %2979, %v4451_v63   ;;  %v4483_v63 = vld [vmem:[#allocation3 + $0xd0] sm:$0xff] }
 0x2bc   : > { %v956_v55 = vpop.xlane.xlu1 %955  ;;  %5334 = vst [vmem:[#allocation96_spill] sm:$0xff] %v4483_v63 }
 0x2bd   : > { %v4461_v23 = vmax.f32 %v4453_v61, %v956_v55 }
 0x2bf   : > { %5329 = vst [vmem:[#allocation91_spill] sm:$0xff] %v4461_v23  ;;  %1709 = vst.msk [vmem:[#allocation3 + $0xb8] sm:$0xff] %vm1653_vm1, %v4461_v23  ;;  %1226 = vperm.xlu1 %2978, %v4461_v23  }
 0x2c0   : > { %v959_v60 = vpop.xlane.xlu1 %958 }
 0x2c1   : > { %v4471_v32 = vmax.f32 %v4463_v51, %v959_v60  ;;  %v4493_v51 = vld [vmem:[#allocation3 + $0xd8] sm:$0xff] }
 0x2c2   : > { %5336 = vst [vmem:[#allocation98_spill] sm:$0xff] %v4493_v51 }
 0x2c3   : > { %5331 = vst [vmem:[#allocation93_spill] sm:$0xff] %v4471_v32  ;;  %1710 = vst.msk [vmem:[#allocation3 + $0xc0] sm:$0xff] %vm1653_vm1, %v4471_v32  ;;  %1231 = vperm.xlu0 %2979, %v4471_v32   ;;  %v4503_v32 = vld [vmem:[#allocation3 + $0xe0] sm:$0xff] }
 0x2c4   : > { %v962_v4 = vpop.xlane.xlu1 %961  ;;  %5338 = vst [vmem:[#allocation100_spill] sm:$0xff] %v4503_v32 }
 0x2c5   : > { %v4481_v61 = vmax.f32 %v4473_v15, %v962_v4 }
 0x2c7   : > { %5333 = vst [vmem:[#allocation95_spill] sm:$0xff] %v4481_v61  ;;  %1711 = vst.msk [vmem:[#allocation3 + $0xc8] sm:$0xff] %vm1653_vm1, %v4481_v61  ;;  %1236 = vperm.xlu1 %2978, %v4481_v61  }
 0x2c8   : > { %v965_v55 = vpop.xlane.xlu1 %964 }
 0x2c9   : > { %v4491_v23 = vmax.f32 %v4483_v63, %v965_v55  ;;  %v4513_v63 = vld [vmem:[#allocation3 + $0xe8] sm:$0xff] }
 0x2ca   : > { %5340 = vst [vmem:[#allocation102_spill] sm:$0xff] %v4513_v63 }
 0x2cb   : > { %5335 = vst [vmem:[#allocation97_spill] sm:$0xff] %v4491_v23  ;;  %1712 = vst.msk [vmem:[#allocation3 + $0xd0] sm:$0xff] %vm1653_vm1, %v4491_v23  ;;  %1241 = vperm.xlu0 %2979, %v4491_v23  }
 0x2cc   : > { %v968_v60 = vpop.xlane.xlu1 %967 }
 0x2cd   : > { %v4501_v15 = vmax.f32 %v4493_v51, %v968_v60 }
 0x2cf   : > { %5337 = vst [vmem:[#allocation99_spill] sm:$0xff] %v4501_v15  ;;  %1713 = vst.msk [vmem:[#allocation3 + $0xd8] sm:$0xff] %vm1653_vm1, %v4501_v15  ;;  %1246 = vperm.xlu1 %2978, %v4501_v15  }
 0x2d0   : > { %v971_v4 = vpop.xlane.xlu1 %970 }
 0x2d1   : > { %v4511_v61 = vmax.f32 %v4503_v32, %v971_v4 }
 0x2d3   : > { %5339 = vst [vmem:[#allocation101_spill] sm:$0xff] %v4511_v61  ;;  %1714 = vst.msk [vmem:[#allocation3 + $0xe0] sm:$0xff] %vm1653_vm1, %v4511_v61  ;;  %1251 = vperm.xlu0 %2979, %v4511_v61  }
 0x2d4   : > { %v974_v55 = vpop.xlane.xlu1 %973 }
 0x2d5   : > { %v4521_v51 = vmax.f32 %v4513_v63, %v974_v55 }
 0x2d7   : > { %5341 = vst [vmem:[#allocation103_spill] sm:$0xff] %v4521_v51  ;;  %1715 = vst.msk [vmem:[#allocation3 + $0xe8] sm:$0xff] %vm1653_vm1, %v4521_v51  ;;  %1256 = vperm.xlu1 %2978, %v4521_v51  }
 0x2de   : > { %v1112_v4 = vpop.permute.xlu1 %1111 }
 0x2df   : > { %v1269_v60 = vsub.f32 %v3972_v2, %v1112_v4  ;;  %v1270_v32 = vsub.f32 %v3974_v3, %v1112_v4 }
 0x2e1   : > { %v1333_v23 = vmul.f32 1.442695, %v1269_v60  ;;  %v1335_v29 = vmul.f32 1.442695, %v1270_v32 }
 0x2e2   : > { %v1117_v61 = vpop.permute.xlu0 %1116 }
 0x2e3   : > { %2980 = vpow2.f32 %v1333_v23  ;;  %v1271_v55 = vsub.f32 %v3978_v5, %v1117_v61  ;;  %v1272_v49 = vsub.f32 %v3980_v6, %v1117_v61 }
 0x2e4   : > { %2982 = vpow2.f32 %v1335_v29 }
 0x2e5   : > { %v1337_v15 = vmul.f32 1.442695, %v1271_v55  ;;  %v1339_v63 = vmul.f32 1.442695, %v1272_v49 }
 0x2e6   : > { %v1122_v48 = vpop.permute.xlu0 %1121 }
 0x2e7   : > { %2984 = vpow2.f32 %v1337_v15  ;;  %v1273_v51 = vsub.f32 %v3984_v8, %v1122_v48  ;;  %v1274_v46 = vsub.f32 %v3986_v9, %v1122_v48 }
 0x2e8   : > { %2986 = vpow2.f32 %v1339_v63 }
 0x2e9   : > { %v1341_v2 = vmul.f32 1.442695, %v1273_v51  ;;  %v1343_v3 = vmul.f32 1.442695, %v1274_v46 }
 0x2ea   : > { %v1127_v60 = vpop.permute.xlu0 %1126 }
 0x2eb   : > { %2988 = vpow2.f32 %v1341_v2  ;;  %v1275_v32 = vsub.f32 %v3990_v11, %v1127_v60  ;;  %v1276_v5 = vsub.f32 %v3992_v12, %v1127_v60 }
 0x2ec   : > { %2990 = vpow2.f32 %v1343_v3 }
 0x2ed   : > { %v1345_v6 = vmul.f32 1.442695, %v1275_v32  ;;  %v1347_v29 = vmul.f32 1.442695, %v1276_v5 }
 0x2ee   : > { %v1132_v23 = vpop.permute.xlu0 %1131 }
 0x2ef   : > { %2992 = vpow2.f32 %v1345_v6  ;;  %v1277_v49 = vsub.f32 %v3996_v14, %v1132_v23  ;;  %v1278_v8 = vsub.f32 %v3998_v16, %v1132_v23 }
 0x2f0   : > { %v2981_v61 = vpop.eup %2980  ;;  %2994 = vpow2.f32 %v1347_v29 }
 0x2f1   : > { %v2983_v9 = vpop.eup %2982  ;;  %v1349_v48 = vmul.f32 1.442695, %v1277_v49  ;;  %v1351_v46 = vmul.f32 1.442695, %v1278_v8 }
 0x2f2   : > { %2006 = vmatprep.mubr.f32.mxu1 %v2983_v9  ;;  %v1137_v51 = vpop.permute.xlu0 %1136  ;;  %v4538_v63 = vadd.f32 %v2983_v9, %v2981_v61 }
 0x2f3   : > { %2996 = vpow2.f32 %v1349_v48  ;;  %v1279_v11 = vsub.f32 %v4002_v18, %v1137_v51  ;;  %v1280_v12 = vsub.f32 %v4004_v19, %v1137_v51  ;;  %2007 = vmatmul.mubr.f32.vlgmr.msra.gmra.mxu1 %v2981_v61 }
 0x2f4   : > { %v2985_v15 = vpop.eup %2984  ;;  %2998 = vpow2.f32 %v1351_v46 }
 0x2f5   : > { %v2987_v14 = vpop.eup %2986  ;;  %v1353_v4 = vmul.f32 1.442695, %v1279_v11  ;;  %v1355_v16 = vmul.f32 1.442695, %v1280_v12 }
 0x2f6   : > { %2011 = vmatprep.mubr.f32.mxu1 %v2987_v14  ;;  %v1142_v55 = vpop.permute.xlu0 %1141  ;;  %v4542_v2 = vadd.f32 %v2987_v14, %v2985_v15 }
 0x2f7   : > { %3000 = vpow2.f32 %v1353_v4  ;;  %v1281_v3 = vsub.f32 %v4008_v21, %v1142_v55  ;;  %v1282_v60 = vsub.f32 %v4010_v22, %v1142_v55  ;;  %2012 = vmatmul.mubr.f32.gmra.mxu1 %v2985_v15 }
 0x2f8   : > { %v2989_v32 = vpop.eup %2988  ;;  %3002 = vpow2.f32 %v1355_v16 }
 0x2f9   : > { %v2991_v18 = vpop.eup %2990  ;;  %v1357_v19 = vmul.f32 1.442695, %v1281_v3  ;;  %v1359_v5 = vmul.f32 1.442695, %v1282_v60 }
 0x2fa   : > { %2016 = vmatprep.mubr.f32.mxu1 %v2991_v18  ;;  %v1147_v6 = vpop.permute.xlu0 %1146  ;;  %v4546_v29 = vadd.f32 %v2991_v18, %v2989_v32  ;;  %v5343_v18 = vsub.f32 %v4196_v35, %v4201_v41 }
 0x2fb   : > { %3004 = vpow2.f32 %v1357_v19  ;;  %v1283_v23 = vsub.f32 %v4014_v24, %v1147_v6  ;;  %v1284_v49 = vsub.f32 %v4016_v25, %v1147_v6  ;;  %2017 = vmatmul.mubr.f32.gmra.mxu1 %v2989_v32 }
 0x2fc   : > { %v2993_v8 = vpop.eup %2992  ;;  %3006 = vpow2.f32 %v1359_v5  ;;  %v1045_v19 = vmul.f32 1.442695, %v5343_v18 }
 0x2fd   : > { %v2995_v21 = vpop.eup %2994  ;;  %v1361_v22 = vmul.f32 1.442695, %v1283_v23  ;;  %v1363_v61 = vmul.f32 1.442695, %v1284_v49 }
 0x2fe   : > { %2021 = vmatprep.mubr.f32.mxu1 %v2995_v21  ;;  %v1152_v9 = vpop.permute.xlu0 %1151  ;;  %v4550_v48 = vadd.f32 %v2995_v21, %v2993_v8 }
 0x2ff   : > { %3008 = vpow2.f32 %v1361_v22  ;;  %v1285_v46 = vsub.f32 %v4020_v27, %v1152_v9  ;;  %v1286_v51 = vsub.f32 %v4022_v28, %v1152_v9  ;;  %2022 = vmatmul.mubr.f32.gmra.mxu1 %v2993_v8  ;;  %v5342_v28 = vsub.f32 %v4205_v50, %v4215_v17 }
 0x300   : > { %v2997_v11 = vpop.eup %2996  ;;  %3010 = vpow2.f32 %v1363_v61  ;;  %v5344_v50 = vsub.f32 %v4247_v47, %v4257_v44  ;;  %v5345_v8 = vsub.f32 %v4271_v38, %v4279_v56  ;;  %v5346_v56 = vsub.f32 %v4219_v59, %v4229_v10 }
 0x301   : > { %v2999_v24 = vpop.eup %2998  ;;  %v1365_v25 = vmul.f32 1.442695, %v1285_v46  ;;  %v1367_v12 = vmul.f32 1.442695, %v1286_v51  ;;  %v1047_v3 = vmul.f32 1.442695, %v5342_v28  ;;  %v5347_v10 = vsub.f32 %v4293_v7, %v4303_v0 }
 0x302   : > { %2026 = vmatprep.mubr.f32.mxu1 %v2999_v24  ;;  %v1157_v15 = vpop.permute.xlu0 %1156  ;;  %v4554_v14 = vadd.f32 %v2999_v24, %v2997_v11  ;;  %v1053_v49 = vmul.f32 1.442695, %v5344_v50  ;;  %v1057_v21 = vmul.f32 1.442695, %v5345_v8  ;;  %v1049_v38 = vmul.f32 1.442695, %v5346_v56 }
 0x303   : > { %3012 = vpow2.f32 %v1365_v25  ;;  %v1287_v4 = vsub.f32 %v4026_v30, %v1157_v15  ;;  %v1288_v16 = vsub.f32 %v4028_v31, %v1157_v15  ;;  %2027 = vmatmul.mubr.f32.gmra.mxu1 %v2997_v11  ;;  %v4581_v11 = vld [vmem:[#allocation3 + $0xf0] sm:$0xff]  ;;  %v1061_v59 = vmul.f32 1.442695, %v5347_v10  ;;  %v5353_v8 = vld [vmem:[#allocation31_spill] sm:$0xff]  ;;  %v5360_v10 = vld [vmem:[#allocation66_spill] sm:$0xff] }
 0x304   : > { %v3001_v55 = vpop.eup %3000  ;;  %3014 = vpow2.f32 %v1367_v12  ;;  %v5434_v7 = vld [vmem:[#allocation53_spill] sm:$0xff] }
 0x305   : > { %v3003_v27 = vpop.eup %3002  ;;  %v1369_v60 = vmul.f32 1.442695, %v1287_v4  ;;  %v1371_v32 = vmul.f32 1.442695, %v1288_v16 }
 0x306   : > { %2031 = vmatprep.mubr.f32.mxu1 %v3003_v27  ;;  %v1162_v5 = vpop.permute.xlu0 %1161  ;;  %v4564_v6 = vadd.f32 %v3003_v27, %v3001_v55 }
 0x307   : > { %3016 = vpow2.f32 %v1369_v60  ;;  %v1289_v30 = vsub.f32 %v4032_v33, %v1162_v5  ;;  %v1290_v31 = vsub.f32 %v4034_v34, %v1162_v5  ;;  %2032 = vmatmul.mubr.f32.gmra.mxu1 %v3001_v55  ;;  %v4599_v60 = vld [vmem:[#allocation3 + $0xf8] sm:$0xff] }
 0x308   : > { %v3005_v23 = vpop.eup %3004  ;;  %3018 = vpow2.f32 %v1371_v32 }
 0x309   : > { %v3007_v17 = vpop.eup %3006  ;;  %3020 = vpow2.f32 %v1047_v3  ;;  %v1373_v35 = vmul.f32 1.442695, %v1289_v30  ;;  %v1375_v41 = vmul.f32 1.442695, %v1290_v31 }
 0x30a   : > { %3022 = vpow2.f32 %v1045_v19  ;;  %2036 = vmatprep.mubr.f32.mxu1 %v3007_v17  ;;  %v1167_v33 = vpop.permute.xlu0 %1166  ;;  %v4574_v22 = vadd.f32 %v3007_v17, %v3005_v23  ;;  %v5351_v17 = vsub.f32 %v4281_v20, %v4291_v13 }
 0x30b   : > { %3024 = vpow2.f32 %v1373_v35  ;;  %v1291_v34 = vsub.f32 %v4038_v36, %v1167_v33  ;;  %v1292_v61 = vsub.f32 %v4040_v37, %v1167_v33  ;;  %2037 = vmatmul.mubr.f32.gmra.mxu1 %v3005_v23 }
 0x30c   : > { %v3009_v9 = vpop.eup %3008  ;;  %3026 = vpow2.f32 %v1375_v41  ;;  %v1059_v50 = vmul.f32 1.442695, %v5351_v17 }
 0x30d   : > { %v3011_v47 = vpop.eup %3010  ;;  %3028 = vpow2.f32 %v1053_v49  ;;  %v1377_v44 = vmul.f32 1.442695, %v1291_v34  ;;  %v1379_v46 = vmul.f32 1.442695, %v1292_v61 }
 0x30e   : > { %3030 = vpow2.f32 %v1057_v21  ;;  %2041 = vmatprep.mubr.f32.mxu1 %v3011_v47  ;;  %v1172_v51 = vpop.permute.xlu0 %1171  ;;  %v4583_v24 = vadd.f32 %v3011_v47, %v3009_v9  ;;  %v5354_v47 = vld [vmem:[#allocation32_spill] sm:$0xff] }
 0x30f   : > { %3032 = vpow2.f32 %v1377_v44  ;;  %v1293_v36 = vsub.f32 %v4044_v39, %v1172_v51  ;;  %v1294_v37 = vsub.f32 %v4046_v40, %v1172_v51  ;;  %2042 = vmatmul.mubr.f32.gmra.mxu1 %v3009_v9  ;;  %v5348_v39 = vsub.f32 %v4233_v62, %v4243_v53  ;;  %v5356_v51 = vld [vmem:[#allocation72_spill] sm:$0xff] }
 0x310   : > { %v3013_v25 = vpop.eup %3012  ;;  %3034 = vpow2.f32 %v1379_v46  ;;  %v977_v12 = vpop.xlane.xlu1 %976  ;;  %v5349_v40 = vsub.f32 %v4321_v57, %v4331_v54  ;;  %v5355_v46 = vld [vmem:[#allocation33_spill] sm:$0xff] }
 0x311   : > { %v3015_v15 = vpop.eup %3014  ;;  %v1381_v4 = vmul.f32 1.442695, %v1293_v36  ;;  %v1383_v16 = vmul.f32 1.442695, %v1294_v37  ;;  %v4591_v55 = vmax.f32 %v4581_v11, %v977_v12  ;;  %3036 = vpow2.f32 %v1049_v38  ;;  %v5357_v36 = vld [vmem:[#allocation73_spill] sm:$0xff] }
 0x312   : > { %v1051_v27 = vmul.f32 1.442695, %v5348_v39  ;;  %v1065_v28 = vmul.f32 1.442695, %v5349_v40  ;;  %2046 = vmatprep.mubr.f32.mxu1 %v3015_v15  ;;  %v1177_v3 = vpop.permute.xlu0 %1176  ;;  %v4601_v0 = vadd.f32 %v3015_v15, %v3013_v25  ;;  %v5358_v37 = vsub.f32 %v5356_v51, %v5357_v36  ;;  %v5359_v15 = vld [vmem:[#allocation64_spill] sm:$0xff] }
 0x313   : > { %3038 = vpow2.f32 %v1381_v4  ;;  %1716 = vst.msk [vmem:[#allocation3 + $0xf0] sm:$0xff] %vm1653_vm1, %v4591_v55  ;;  %v1295_v53 = vsub.f32 %v4050_v42, %v1177_v3  ;;  %v1296_v62 = vsub.f32 %v4052_v43, %v1177_v3  ;;  %2047 = vmatmul.mubr.f32.gmra.mxu1 %v3013_v25  ;;  %1261 = vperm.xlu0 %2979, %v4591_v55  }
 0x314   : > { %v3017_v54 = vpop.eup %3016  ;;  %3040 = vpow2.f32 %v1383_v16  ;;  %v980_v57 = vpop.xlane.xlu1 %979  ;;  %v5350_v42 = vsub.f32 %v4261_v1, %v4269_v26  ;;  %v5352_v26 = vsub.f32 %v4343_v52, %v4351_v58  ;;  %v1073_v25 = vmul.f32 1.442695, %v5358_v37 }
 0x315   : > { %v3019_v32 = vpop.eup %3018  ;;  %3042 = vpow2.f32 %v1061_v59  ;;  %v1385_v18 = vmul.f32 1.442695, %v1295_v53  ;;  %v1387_v19 = vmul.f32 1.442695, %v1296_v62  ;;  %v4611_v5 = vmax.f32 %v4599_v60, %v980_v57  ;;  %v5363_v53 = vld [vmem:[#allocation35_spill] sm:$0xff] }
 0x316   : > { %v4613_v30 = vpop.eup %3020  ;;  %3044 = vpow2.f32 %v1051_v27  ;;  %v1055_v43 = vmul.f32 1.442695, %v5350_v42  ;;  %2051 = vmatprep.mubr.f32.mxu1 %v3019_v32  ;;  %v4618_v31 = vadd.f32 %v3019_v32, %v3017_v54  ;;  %v1069_v35 = vmul.f32 1.442695, %v5352_v26  ;;  %v5364_v32 = vld [vmem:[#allocation76_spill] sm:$0xff]  ;;  %v5368_v26 = vld [vmem:[#allocation69_spill] sm:$0xff] }
 0x317   : > { %v4620_v23 = vpop.eup %3022  ;;  %3046 = vpow2.f32 %v1065_v28  ;;  %1717 = vst.msk [vmem:[#allocation3 + $0xf8] sm:$0xff] %vm1653_vm1, %v4611_v5  ;;  %2052 = vmatmul.mubr.f32.gmra.mxu1 %v3017_v54  ;;  %1757 = vperm.xlu0 %2979, %v4613_v30   ;;  %v5361_v59 = vsub.f32 %v5359_v15, %v5360_v10  ;;  %v5362_v28 = vld [vmem:[#allocation34_spill] sm:$0xff] }
 0x318   : > { %v3025_v1 = vpop.eup %3024  ;;  %3048 = vpow2.f32 %v1385_v18  ;;  %1266 = vperm.xlu1 %2978, %v4611_v5   ;;  %v1182_v13 = vpop.permute.xlu1 %1181  ;;  %v5365_v18 = vld [vmem:[#allocation77_spill] sm:$0xff] }
 0x319   : > { %v3027_v20 = vpop.eup %3026  ;;  %3050 = vpow2.f32 %v1387_v19  ;;  %v1297_v41 = vsub.f32 %v4056_v45, %v1182_v13  ;;  %v1298_v21 = vsub.f32 %v5353_v8, %v1182_v13  ;;  %v1063_v4 = vmul.f32 1.442695, %v5361_v59 }
 0x31a   : > { %v4636_v33 = vpop.eup %3028  ;;  %3052 = vpow2.f32 %v1055_v43  ;;  %2056 = vmatprep.mubr.f32.mxu1 %v3027_v20  ;;  %v1187_v34 = vpop.permute.xlu0 %1186  ;;  %v4638_v61 = vadd.f32 %v3027_v20, %v3025_v1  ;;  %v5366_v19 = vsub.f32 %v5364_v32, %v5365_v18  ;;  %v5381_v32 = vld [vmem:[#allocation85_spill] sm:$0xff] }
 0x31b   : > { %v4640_v9 = vpop.eup %3030  ;;  %3054 = vpow2.f32 %v1059_v50  ;;  %v1389_v52 = vmul.f32 1.442695, %v1297_v41  ;;  %v1391_v58 = vmul.f32 1.442695, %v1298_v21  ;;  %v1299_v44 = vsub.f32 %v5354_v47, %v1187_v34  ;;  %2057 = vmatmul.mubr.f32.gmra.mxu1 %v3025_v1  ;;  %1772 = vperm.xlu0 %2979, %v4636_v33   ;;  %v5367_v1 = vld [vmem:[#allocation68_spill] sm:$0xff] }
 0x31c   : > { %v3033_v45 = vpop.eup %3032  ;;  %3056 = vpow2.f32 %v1069_v35  ;;  %v1300_v56 = vsub.f32 %v5355_v46, %v1187_v34  ;;  %1752 = vperm.xlu1 %2978, %v4620_v23   ;;  %v1077_v42 = vmul.f32 1.442695, %v5366_v19  ;;  %v5369_v35 = vsub.f32 %v5367_v1, %v5368_v26  ;;  %v5370_v21 = vld [vmem:[#allocation36_spill] sm:$0xff]  ;;  %v5373_v46 = vld [vmem:[#allocation81_spill] sm:$0xff]  ;;  %v5383_v1 = vld [vmem:[#allocation74_spill] sm:$0xff] }
 0x31d   : > { %v3035_v38 = vpop.eup %3034  ;;  %3058 = vpow2.f32 %v1389_v52  ;;  %v1393_v12 = vmul.f32 1.442695, %v1299_v44  ;;  %v5371_v52 = vld [vmem:[#allocation37_spill] sm:$0xff]  ;;  %v5384_v26 = vld [vmem:[#allocation75_spill] sm:$0xff] }
 0x31e   : > { %3060 = vpow2.f32 %v1391_v58  ;;  %v1395_v16 = vmul.f32 1.442695, %v1300_v56  ;;  %2061 = vmatprep.mubr.f32.mxu1 %v3035_v38  ;;  %v1192_v39 = vpop.permute.xlu0 %1191  ;;  %v4652_v27 = vadd.f32 %v3035_v38, %v3033_v45  ;;  %v4654_v40 = vpop.eup %3036  ;;  %v1067_v13 = vmul.f32 1.442695, %v5369_v35 }
 0x31f   : > { %3062 = vpow2.f32 %v1393_v12  ;;  %v1301_v3 = vsub.f32 %v5362_v28, %v1192_v39  ;;  %v1302_v62 = vsub.f32 %v5363_v53, %v1192_v39  ;;  %2062 = vmatmul.mubr.f32.gmra.mxu1 %v3033_v45  ;;  %1782 = vperm.xlu0 %2979, %v4640_v9   ;;  %v5372_v45 = vld [vmem:[#allocation80_spill] sm:$0xff]  ;;  %v5376_v12 = vld [vmem:[#allocation71_spill] sm:$0xff]  ;;  %v5385_v35 = vsub.f32 %v5383_v1, %v5384_v26  ;;  %v5397_v26 = vld [vmem:[#allocation93_spill] sm:$0xff] }
 0x320   : > { %v3039_v54 = vpop.eup %3038  ;;  %3064 = vpow2.f32 %v1395_v16  ;;  %1762 = vperm.xlu1 %2978, %v4654_v40   ;;  %v5374_v56 = vsub.f32 %v5372_v45, %v5373_v46  ;;  %v5378_v16 = vld [vmem:[#allocation38_spill] sm:$0xff]  ;;  %v5379_v28 = vld [vmem:[#allocation39_spill] sm:$0xff]  ;;  %v5396_v1 = vld [vmem:[#allocation92_spill] sm:$0xff] }
 0x321   : > { %v3041_v57 = vpop.eup %3040  ;;  %3066 = vpow2.f32 %v1073_v25  ;;  %v1397_v43 = vmul.f32 1.442695, %v1301_v3  ;;  %v1399_v17 = vmul.f32 1.442695, %v1302_v62  ;;  %v5375_v25 = vld [vmem:[#allocation70_spill] sm:$0xff] }
 0x322   : > { %v4663_v50 = vpop.eup %3042  ;;  %3068 = vpow2.f32 %v1063_v4  ;;  %2066 = vmatprep.mubr.f32.mxu1 %v3041_v57  ;;  %v1197_v20 = vpop.permute.xlu0 %1196  ;;  %v4668_v41 = vadd.f32 %v3041_v57, %v3039_v54  ;;  %v1081_v38 = vmul.f32 1.442695, %v5374_v56  ;;  %v5377_v15 = vsub.f32 %v5375_v25, %v5376_v12  ;;  %v5380_v57 = vld [vmem:[#allocation84_spill] sm:$0xff] }
 0x323   : > { %v4670_v8 = vpop.eup %3044  ;;  %3070 = vpow2.f32 %v1397_v43  ;;  %v1303_v34 = vsub.f32 %v5370_v21, %v1197_v20  ;;  %v1304_v58 = vsub.f32 %v5371_v52, %v1197_v20  ;;  %2067 = vmatmul.mubr.f32.gmra.mxu1 %v3039_v54  ;;  %1792 = vperm.xlu0 %2979, %v4663_v50   ;;  %v5382_v18 = vsub.f32 %v5380_v57, %v5381_v32  ;;  %v5394_v32 = vld [vmem:[#allocation42_spill] sm:$0xff] }
 0x324   : > { %v4675_v47 = vpop.eup %3046  ;;  %3072 = vpow2.f32 %v1399_v17  ;;  %1767 = vperm.xlu1 %2978, %v4670_v8   ;;  %v1071_v10 = vmul.f32 1.442695, %v5377_v15 }
 0x325   : > { %v3049_v44 = vpop.eup %3048  ;;  %3074 = vpow2.f32 %v1077_v42  ;;  %v1401_v51 = vmul.f32 1.442695, %v1303_v34  ;;  %v1403_v36 = vmul.f32 1.442695, %v1304_v58  ;;  %v1085_v19 = vmul.f32 1.442695, %v5382_v18 }
 0x326   : > { %v3051_v37 = vpop.eup %3050  ;;  %3076 = vpow2.f32 %v1067_v13  ;;  %v1202_v59 = vpop.permute.xlu0 %1201  ;;  %v1075_v13 = vmul.f32 1.442695, %v5385_v35  ;;  %v5386_v34 = vld [vmem:[#allocation40_spill] sm:$0xff]  ;;  %v5387_v58 = vld [vmem:[#allocation41_spill] sm:$0xff]  ;;  %v5398_v35 = vsub.f32 %v5396_v1, %v5397_v26  ;;  %v5410_v1 = vld [vmem:[#allocation87_spill] sm:$0xff] }
 0x327   : > { %v4684_v4 = vpop.eup %3052  ;;  %3078 = vpow2.f32 %v1401_v51  ;;  %2071 = vmatprep.mubr.f32.mxu1 %v3051_v37  ;;  %v1305_v39 = vsub.f32 %v5378_v16, %v1202_v59  ;;  %v1306_v3 = vsub.f32 %v5379_v28, %v1202_v59  ;;  %1802 = vperm.xlu0 %2979, %v4675_v47   ;;  %v4689_v53 = vadd.f32 %v3051_v37, %v3049_v44  ;;  %v5389_v51 = vld [vmem:[#allocation89_spill] sm:$0xff]  ;;  %v5392_v59 = vld [vmem:[#allocation79_spill] sm:$0xff] }
 0x328   : > { %v4691_v62 = vpop.eup %3054  ;;  %3080 = vpow2.f32 %v1403_v36  ;;  %2072 = vmatmul.mubr.f32.gmra.mxu1 %v3049_v44  ;;  %1777 = vperm.xlu1 %2978, %v4684_v4  }
 0x329   : > { %v4694_v54 = vpop.eup %3056  ;;  %3082 = vpow2.f32 %v1081_v38  ;;  %v1405_v42 = vmul.f32 1.442695, %v1305_v39  ;;  %v1407_v43 = vmul.f32 1.442695, %v1306_v3  ;;  %v5388_v38 = vld [vmem:[#allocation88_spill] sm:$0xff] }
 0x32a   : > { %v3059_v17 = vpop.eup %3058  ;;  %3084 = vpow2.f32 %v1071_v10  ;;  %v1207_v20 = vpop.permute.xlu1 %1206  ;;  %v5390_v36 = vsub.f32 %v5388_v38, %v5389_v51  ;;  %v5391_v10 = vld [vmem:[#allocation78_spill] sm:$0xff] }
 0x32b   : > { %v3061_v21 = vpop.eup %3060  ;;  %3086 = vpow2.f32 %v1405_v42  ;;  %v1307_v52 = vsub.f32 %v5386_v34, %v1207_v20  ;;  %v1308_v44 = vsub.f32 %v5387_v58, %v1207_v20  ;;  %1812 = vperm.xlu0 %2979, %v4694_v54   ;;  %v5393_v16 = vsub.f32 %v5391_v10, %v5392_v59  ;;  %v5401_v58 = vld [vmem:[#allocation83_spill] sm:$0xff] }
 0x32c   : > { %v3063_v45 = vpop.eup %3062  ;;  %3088 = vpow2.f32 %v1407_v43  ;;  %1787 = vperm.xlu1 %2978, %v4691_v62   ;;  %2076 = vmatprep.mubr.f32.mxu1 %v3061_v21  ;;  %v4706_v46 = vadd.f32 %v3061_v21, %v3059_v17  ;;  %v1089_v37 = vmul.f32 1.442695, %v5390_v36 }
 0x32d   : > { %v3065_v56 = vpop.eup %3064  ;;  %3090 = vpow2.f32 %v1085_v19  ;;  %v1409_v25 = vmul.f32 1.442695, %v1307_v52  ;;  %v1411_v12 = vmul.f32 1.442695, %v1308_v44  ;;  %2077 = vmatmul.mubr.f32.gmra.mxu1 %v3059_v17  ;;  %v1079_v39 = vmul.f32 1.442695, %v5393_v16 }
 0x32e   : > { %v4711_v15 = vpop.eup %3066  ;;  %3092 = vpow2.f32 %v1075_v13  ;;  %2081 = vmatprep.mubr.f32.mxu1 %v3065_v56  ;;  %v1212_v28 = vpop.permute.xlu0 %1211  ;;  %v4716_v3 = vadd.f32 %v3065_v56, %v3063_v45  ;;  %v5395_v19 = vld [vmem:[#allocation43_spill] sm:$0xff]  ;;  %v1093_v13 = vmul.f32 1.442695, %v5398_v35  ;;  %v5400_v52 = vld [vmem:[#allocation82_spill] sm:$0xff]  ;;  %v5405_v16 = vld [vmem:[#allocation96_spill] sm:$0xff] }
 0x32f   : > { %v4718_v57 = vpop.eup %3068  ;;  %3094 = vpow2.f32 %v1409_v25  ;;  %v1309_v18 = vsub.f32 %v5394_v32, %v1212_v28  ;;  %v1310_v42 = vsub.f32 %v5395_v19, %v1212_v28  ;;  %1822 = vperm.xlu0 %2979, %v4711_v15   ;;  %v5402_v44 = vsub.f32 %v5400_v52, %v5401_v58 }
 0x330   : > { %v3071_v43 = vpop.eup %3070  ;;  %3096 = vpow2.f32 %v1411_v12  ;;  %1797 = vperm.xlu1 %2978, %v4718_v57   ;;  %v5404_v12 = vld [vmem:[#allocation45_spill] sm:$0xff] }
 0x331   : > { %v3073_v17 = vpop.eup %3072  ;;  %3098 = vpow2.f32 %v1089_v37  ;;  %v1413_v20 = vmul.f32 1.442695, %v1309_v18  ;;  %v1415_v21 = vmul.f32 1.442695, %v1310_v42  ;;  %2082 = vmatmul.mubr.f32.gmra.mxu1 %v3063_v45  ;;  %v1083_v56 = vmul.f32 1.442695, %v5402_v44 }
 0x332   : > { %v4727_v34 = vpop.eup %3074  ;;  %3100 = vpow2.f32 %v1079_v39  ;;  %2086 = vmatprep.mubr.f32.mxu1 %v3073_v17  ;;  %v1217_v38 = vpop.permute.xlu1 %1216  ;;  %v4732_v51 = vadd.f32 %v3073_v17, %v3071_v43  ;;  %v5403_v37 = vld [vmem:[#allocation44_spill] sm:$0xff]  ;;  %v5406_v39 = vld [vmem:[#allocation97_spill] sm:$0xff]  ;;  %v5409_v17 = vld [vmem:[#allocation86_spill] sm:$0xff] }
 0x333   : > { %5399 = vst [vmem:[#allocation31_spill] sm:$0xff] %v4727_v34  ;;  %v4734_v36 = vpop.eup %3076  ;;  %3102 = vpow2.f32 %v1413_v20  ;;  %v1311_v25 = vsub.f32 %v5403_v37, %v1217_v38  ;;  %v1312_v10 = vsub.f32 %v5404_v12, %v1217_v38  ;;  %1832 = vperm.xlu0 %2979, %v4727_v34   ;;  %v5407_v28 = vsub.f32 %v5405_v16, %v5406_v39  ;;  %v5413_v44 = vld [vmem:[#allocation47_spill] sm:$0xff]  ;;  %v5414_v37 = vld [vmem:[#allocation100_spill] sm:$0xff] }
 0x334   : > { %v3079_v45 = vpop.eup %3078  ;;  %3104 = vpow2.f32 %v1415_v21  ;;  %1807 = vperm.xlu1 %2978, %v4734_v36   ;;  %v5411_v26 = vsub.f32 %v5409_v17, %v5410_v1 }
 0x335   : > { %v3081_v59 = vpop.eup %3080  ;;  %3106 = vpow2.f32 %v1093_v13  ;;  %v1097_v32 = vmul.f32 1.442695, %v5407_v28  ;;  %v1417_v18 = vmul.f32 1.442695, %v1311_v25  ;;  %v1419_v19 = vmul.f32 1.442695, %v1312_v10  ;;  %2087 = vmatmul.mubr.f32.gmra.mxu1 %v3071_v43 }
 0x336   : > { %v4743_v42 = vpop.eup %3082  ;;  %3108 = vpow2.f32 %v1083_v56  ;;  %v1087_v35 = vmul.f32 1.442695, %v5411_v26  ;;  %2091 = vmatprep.mubr.f32.mxu1 %v3081_v59  ;;  %v1222_v20 = vpop.permute.xlu0 %1221  ;;  %v4748_v21 = vadd.f32 %v3081_v59, %v3079_v45  ;;  %v5412_v13 = vld [vmem:[#allocation46_spill] sm:$0xff]  ;;  %v5415_v25 = vld [vmem:[#allocation101_spill] sm:$0xff] }
 0x337   : > { %5408 = vst [vmem:[#allocation32_spill] sm:$0xff] %v4743_v42  ;;  %v4750_v52 = vpop.eup %3084  ;;  %3110 = vpow2.f32 %v1417_v18  ;;  %v1313_v58 = vsub.f32 %v5412_v13, %v1222_v20  ;;  %v1314_v38 = vsub.f32 %v5413_v44, %v1222_v20  ;;  %1842 = vperm.xlu0 %2979, %v4743_v42   ;;  %v5416_v12 = vsub.f32 %v5414_v37, %v5415_v25  ;;  %v5418_v28 = vld [vmem:[#allocation90_spill] sm:$0xff]  ;;  %v5419_v18 = vld [vmem:[#allocation91_spill] sm:$0xff]  ;;  %v5422_v44 = vld [vmem:[#allocation49_spill] sm:$0xff] }
 0x338   : > { %v3087_v43 = vpop.eup %3086  ;;  %3112 = vpow2.f32 %v1419_v19  ;;  %1817 = vperm.xlu1 %2978, %v4750_v52   ;;  %v5420_v17 = vsub.f32 %v5418_v28, %v5419_v18  ;;  %v5424_v25 = vld [vmem:[#allocation94_spill] sm:$0xff] }
 0x339   : > { %v3089_v56 = vpop.eup %3088  ;;  %3114 = vpow2.f32 %v1097_v32  ;;  %v1101_v10 = vmul.f32 1.442695, %v5416_v12  ;;  %v1421_v59 = vmul.f32 1.442695, %v1313_v58  ;;  %v1423_v16 = vmul.f32 1.442695, %v1314_v38  ;;  %2092 = vmatmul.mubr.f32.gmra.mxu1 %v3079_v45 }
 0x33a   : > { %v4759_v39 = vpop.eup %3090  ;;  %3116 = vpow2.f32 %v1087_v35  ;;  %v1091_v1 = vmul.f32 1.442695, %v5420_v17  ;;  %2096 = vmatprep.mubr.f32.mxu1 %v3089_v56  ;;  %v1227_v19 = vpop.permute.xlu1 %1226  ;;  %v4764_v26 = vadd.f32 %v3089_v56, %v3087_v43  ;;  %v5421_v32 = vld [vmem:[#allocation48_spill] sm:$0xff]  ;;  %v5425_v12 = vld [vmem:[#allocation95_spill] sm:$0xff] }
 0x33b   : > { %5417 = vst [vmem:[#allocation33_spill] sm:$0xff] %v4759_v39  ;;  %v4766_v20 = vpop.eup %3092  ;;  %3118 = vpow2.f32 %v1421_v59  ;;  %v1315_v13 = vsub.f32 %v5421_v32, %v1227_v19  ;;  %v1316_v58 = vsub.f32 %v5422_v44, %v1227_v19  ;;  %1852 = vperm.xlu0 %2979, %v4759_v39   ;;  %v5426_v59 = vsub.f32 %v5424_v25, %v5425_v12  ;;  %v5431_v12 = vld [vmem:[#allocation99_spill] sm:$0xff] }
 0x33c   : > { %v3095_v45 = vpop.eup %3094  ;;  %3120 = vpow2.f32 %v1423_v16  ;;  %1827 = vperm.xlu1 %2978, %v4766_v20   ;;  %v5427_v16 = vld [vmem:[#allocation50_spill] sm:$0xff]  ;;  %v5441_v39 = vld [vmem:[#allocation55_spill] sm:$0xff] }
 0x33d   : > { %v3097_v35 = vpop.eup %3096  ;;  %3122 = vpow2.f32 %v1101_v10  ;;  %v1425_v38 = vmul.f32 1.442695, %v1315_v13  ;;  %v1427_v37 = vmul.f32 1.442695, %v1316_v58  ;;  %2097 = vmatmul.mubr.f32.gmra.mxu1 %v3087_v43  ;;  %v1095_v28 = vmul.f32 1.442695, %v5426_v59 }
 0x33e   : > { %v4772_v56 = vpop.eup %3098  ;;  %3124 = vpow2.f32 %v1091_v1  ;;  %2101 = vmatprep.mubr.f32.mxu1 %v3097_v35  ;;  %v1232_v18 = vpop.permute.xlu0 %1231  ;;  %v4777_v17 = vadd.f32 %v3097_v35, %v3095_v45  ;;  %v5428_v10 = vld [vmem:[#allocation51_spill] sm:$0xff]  ;;  %v5430_v35 = vld [vmem:[#allocation98_spill] sm:$0xff] }
 0x33f   : > { %5423 = vst [vmem:[#allocation72_spill] sm:$0xff] %v4772_v56  ;;  %v4779_v19 = vpop.eup %3100  ;;  %3126 = vpow2.f32 %v1425_v38  ;;  %v1317_v32 = vsub.f32 %v5427_v16, %v1232_v18  ;;  %v1318_v13 = vsub.f32 %v5428_v10, %v1232_v18  ;;  %1862 = vperm.xlu0 %2979, %v4772_v56   ;;  %v5432_v38 = vsub.f32 %v5430_v35, %v5431_v12 }
 0x340   : > { %v3103_v43 = vpop.eup %3102  ;;  %3128 = vpow2.f32 %v1427_v37  ;;  %1837 = vperm.xlu1 %2978, %v4779_v19   ;;  %v5433_v37 = vld [vmem:[#allocation52_spill] sm:$0xff] }
 0x341   : > { %v3105_v1 = vpop.eup %3104  ;;  %v1429_v44 = vmul.f32 1.442695, %v1317_v32  ;;  %v1431_v58 = vmul.f32 1.442695, %v1318_v13  ;;  %2102 = vmatmul.mubr.f32.gmra.mxu1 %v3095_v45  ;;  %3130 = vpow2.f32 %v1095_v28  ;;  %v1099_v59 = vmul.f32 1.442695, %v5432_v38 }
 0x342   : > { %v4785_v25 = vpop.eup %3106  ;;  %2106 = vmatprep.mubr.f32.mxu1 %v3105_v1  ;;  %v1237_v16 = vpop.permute.xlu1 %1236  ;;  %v4790_v18 = vadd.f32 %v3105_v1, %v3103_v43  ;;  %v5436_v1 = vld [vmem:[#allocation102_spill] sm:$0xff]  ;;  %v5437_v38 = vld [vmem:[#allocation103_spill] sm:$0xff] }
 0x343   : > { %5429 = vst [vmem:[#allocation73_spill] sm:$0xff] %v4785_v25  ;;  %v4792_v10 = vpop.eup %3108  ;;  %3132 = vpow2.f32 %v1429_v44  ;;  %v1319_v49 = vsub.f32 %v5433_v37, %v1237_v16  ;;  %v1320_v32 = vsub.f32 %v5434_v7, %v1237_v16  ;;  %1872 = vperm.xlu0 %2979, %v4785_v25   ;;  %v5438_v44 = vsub.f32 %v5436_v1, %v5437_v38 }
 0x344   : > { %v3111_v45 = vpop.eup %3110  ;;  %3134 = vpow2.f32 %v1431_v58  ;;  %1847 = vperm.xlu1 %2978, %v4792_v10   ;;  %v5440_v58 = vld [vmem:[#allocation54_spill] sm:$0xff] }
 0x345   : > { %v3113_v28 = vpop.eup %3112  ;;  %v1433_v13 = vmul.f32 1.442695, %v1319_v49  ;;  %v1435_v35 = vmul.f32 1.442695, %v1320_v32  ;;  %2107 = vmatmul.mubr.f32.gmra.mxu1 %v3103_v43  ;;  %3136 = vpow2.f32 %v1099_v59  ;;  %v1103_v56 = vmul.f32 1.442695, %v5438_v44 }
 0x346   : > { %v4798_v12 = vpop.eup %3114  ;;  %2111 = vmatprep.mubr.f32.mxu1 %v3113_v28  ;;  %v1242_v37 = vpop.permute.xlu0 %1241  ;;  %v4803_v7 = vadd.f32 %v3113_v28, %v3111_v45 }
 0x347   : > { %5435 = vst [vmem:[#allocation64_spill] sm:$0xff] %v4798_v12  ;;  %v4805_v16 = vpop.eup %3116  ;;  %3138 = vpow2.f32 %v1433_v13  ;;  %v1321_v25 = vsub.f32 %v5440_v58, %v1242_v37  ;;  %v1322_v49 = vsub.f32 %v5441_v39, %v1242_v37  ;;  %1882 = vperm.xlu0 %2979, %v4798_v12   ;;  %v5444_v39 = vld [vmem:[#allocation56_spill] sm:$0xff]  ;;  %v5445_v58 = vld [vmem:[#allocation57_spill] sm:$0xff] }
 0x348   : > { %5439 = vst [vmem:[#allocation66_spill] sm:$0xff] %v4805_v16  ;;  %v3119_v43 = vpop.eup %3118  ;;  %3140 = vpow2.f32 %v1435_v35  ;;  %1857 = vperm.xlu1 %2978, %v4805_v16  }
 0x349   : > { %v3121_v59 = vpop.eup %3120  ;;  %v1437_v32 = vmul.f32 1.442695, %v1321_v25  ;;  %v1439_v1 = vmul.f32 1.442695, %v1322_v49  ;;  %2112 = vmatmul.mubr.f32.gmra.mxu1 %v3111_v45  ;;  %3142 = vpow2.f32 %v1103_v56 }
 0x34a   : > { %v4811_v38 = vpop.eup %3122  ;;  %2116 = vmatprep.mubr.f32.mxu1 %v3121_v59  ;;  %v1247_v28 = vpop.permute.xlu1 %1246  ;;  %v4813_v13 = vadd.f32 %v3121_v59, %v3119_v43 }
 0x34b   : > { %5442 = vst [vmem:[#allocation34_spill] sm:$0xff] %v4811_v38  ;;  %v4815_v44 = vpop.eup %3124  ;;  %3144 = vpow2.f32 %v1437_v32  ;;  %v1323_v37 = vsub.f32 %v5444_v39, %v1247_v28  ;;  %v1324_v35 = vsub.f32 %v5445_v58, %v1247_v28  ;;  %1892 = vperm.xlu0 %2979, %v4811_v38   ;;  %v5446_v32 = vld [vmem:[#allocation58_spill] sm:$0xff]  ;;  %v5447_v28 = vld [vmem:[#allocation59_spill] sm:$0xff] }
 0x34c   : > { %5443 = vst [vmem:[#allocation35_spill] sm:$0xff] %v4815_v44  ;;  %v3127_v12 = vpop.eup %3126  ;;  %3146 = vpow2.f32 %v1439_v1  ;;  %1867 = vperm.xlu1 %2978, %v4815_v44  }
 0x34d   : > { %v3129_v25 = vpop.eup %3128  ;;  %v1441_v45 = vmul.f32 1.442695, %v1323_v37  ;;  %v1443_v56 = vmul.f32 1.442695, %v1324_v35  ;;  %2117 = vmatmul.mubr.f32.gmra.mxu1 %v3119_v43 }
 0x34e   : > { %2121 = vmatprep.mubr.f32.mxu1 %v3129_v25  ;;  %v1252_v49 = vpop.permute.xlu0 %1251  ;;  %v4821_v59 = vadd.f32 %v3129_v25, %v3127_v12  ;;  %v4823_v42 = vpop.eup %3130 }
 0x34f   : > { %3148 = vpow2.f32 %v1441_v45  ;;  %v1325_v39 = vsub.f32 %v5446_v32, %v1252_v49  ;;  %v1326_v58 = vsub.f32 %v5447_v28, %v1252_v49  ;;  %v5448_v45 = vld [vmem:[#allocation60_spill] sm:$0xff]  ;;  %v5449_v32 = vld [vmem:[#allocation61_spill] sm:$0xff] }
 0x350   : > { %v3133_v38 = vpop.eup %3132  ;;  %3150 = vpow2.f32 %v1443_v56  ;;  %1877 = vperm.xlu1 %2978, %v4823_v42  }
 0x351   : > { %v3135_v1 = vpop.eup %3134  ;;  %v1445_v44 = vmul.f32 1.442695, %v1325_v39  ;;  %v1447_v37 = vmul.f32 1.442695, %v1326_v58  ;;  %2122 = vmatmul.mubr.f32.gmra.mxu1 %v3127_v12 }
 0x352   : > { %2126 = vmatprep.mubr.f32.mxu1 %v3135_v1  ;;  %v1257_v43 = vpop.permute.xlu1 %1256  ;;  %v4828_v35 = vadd.f32 %v3135_v1, %v3133_v38  ;;  %v4830_v25 = vpop.eup %3136 }
 0x353   : > { %3152 = vpow2.f32 %v1445_v44  ;;  %v1327_v34 = vsub.f32 %v5448_v45, %v1257_v43  ;;  %v1328_v16 = vsub.f32 %v5449_v32, %v1257_v43 }
 0x354   : > { %v3139_v49 = vpop.eup %3138  ;;  %3154 = vpow2.f32 %v1447_v37  ;;  %1887 = vperm.xlu1 %2978, %v4830_v25  }
 0x355   : > { %v3141_v56 = vpop.eup %3140  ;;  %v1449_v28 = vmul.f32 1.442695, %v1327_v34  ;;  %v1451_v39 = vmul.f32 1.442695, %v1328_v16  ;;  %2127 = vmatmul.mubr.f32.gmra.mxu1 %v3133_v38 }
 0x356   : > { %2131 = vmatprep.mubr.f32.mxu1 %v3141_v56  ;;  %v1600_v12 = vadd.f32 %v3141_v56, %v3139_v49  ;;  %v4835_v58 = vpop.eup %3142 }
 0x357   : > { %3156 = vpow2.f32 %v1449_v28 }
 0x358   : > { %v3145_v1 = vpop.eup %3144  ;;  %3158 = vpow2.f32 %v1451_v39  ;;  %1897 = vperm.xlu1 %2978, %v4835_v58  }
 0x359   : > { %v3147_v44 = vpop.eup %3146  ;;  %2132 = vmatmul.mubr.f32.gmra.mxu1 %v3139_v49 }
 0x35a   : > { %2136 = vmatprep.mubr.f32.mxu1 %v3147_v44  ;;  %v4838_v43 = vadd.f32 %v3147_v44, %v3145_v1 }
 0x35c   : > { %v3149_v37 = vpop.eup %3148 }
 0x35d   : > { %v3151_v45 = vpop.eup %3150  ;;  %2137 = vmatmul.mubr.f32.gmra.mxu1 %v3145_v1 }
 0x35e   : > { %2141 = vmatprep.mubr.f32.mxu1 %v3151_v45  ;;  %v1606_v34 = vadd.f32 %v3151_v45, %v3149_v37 }
 0x360   : > { %v3153_v16 = vpop.eup %3152 }
 0x361   : > { %v3155_v38 = vpop.eup %3154  ;;  %2142 = vmatmul.mubr.f32.gmra.mxu1 %v3149_v37 }
 0x362   : > { %2146 = vmatprep.mubr.f32.mxu1 %v3155_v38  ;;  %v4840_v32 = vadd.f32 %v3155_v38, %v3153_v16 }
 0x364   : > { %v3157_v56 = vpop.eup %3156 }
 0x365   : > { %v3159_v28 = vpop.eup %3158  ;;  %2147 = vmatmul.mubr.f32.gmra.mxu1 %v3153_v16  ;;  %v1719_v16 = vld [vmem:[#allocation5 + $0xc8] sm:$0xff] }
 0x366   : > { %2151 = vmatprep.mubr.f32.mxu1 %v3159_v28  ;;  %v1612_v39 = vadd.f32 %v3159_v28, %v3157_v56 }
 0x369   : > { %2152 = vmatmul.mubr.f32.gmra.mxu1 %v3157_v56 }
 0x36a   : > { %1526 = vadd.xlane.f32.xlu0 %v4538_v63 }
 0x36e   : > { %1532 = vadd.xlane.f32.xlu0 %v4546_v29 }
 0x372   : > { %1535 = vadd.xlane.f32.xlu0 %v4550_v48  ;;  %v5451_v48 = vld [vmem:[#allocation63_spill] sm:$0xff] }
 0x376   : > { %1541 = vadd.xlane.f32.xlu0 %v4564_v6 }
 0x37a   : > { %1547 = vadd.xlane.f32.xlu0 %v4583_v24 }
 0x37c   : > { %1529 = vadd.xlane.f32.xlu1 %v4542_v2  ;;  %v5450_v2 = vld [vmem:[#allocation62_spill] sm:$0xff] }
 0x37e   : > { %1553 = vadd.xlane.f32.xlu0 %v4618_v31 }
 0x380   : > { %1538 = vadd.xlane.f32.xlu1 %v4554_v14 }
 0x382   : > { %1559 = vadd.xlane.f32.xlu0 %v4652_v27  ;;  %v5453_v27 = vld [vmem:[#allocation67_spill] sm:$0xff] }
 0x384   : > { %1544 = vadd.xlane.f32.xlu1 %v4574_v22 }
 0x386   : > { %1565 = vadd.xlane.f32.xlu0 %v4689_v53 }
 0x388   : > { %1550 = vadd.xlane.f32.xlu1 %v4601_v0  ;;  %v5452_v0 = vld [vmem:[#allocation65_spill] sm:$0xff] }
 0x38a   : > { %1571 = vadd.xlane.f32.xlu0 %v4716_v3 }
 0x38c   : > { %1556 = vadd.xlane.f32.xlu1 %v4638_v61 }
 0x38e   : > { %1577 = vadd.xlane.f32.xlu0 %v4748_v21  ;;  %v1262_v63 = vpop.permute.xlu0 %1261 }
 0x38f   : > { %v1329_v29 = vsub.f32 %v5450_v2, %v1262_v63  ;;  %v1330_v6 = vsub.f32 %v5451_v48, %v1262_v63 }
 0x390   : > { %1562 = vadd.xlane.f32.xlu1 %v4668_v41 }
 0x391   : > { %v1453_v14 = vmul.f32 1.442695, %v1329_v29  ;;  %v1455_v24 = vmul.f32 1.442695, %v1330_v6 }
 0x392   : > { %1583 = vadd.xlane.f32.xlu0 %v4777_v17  ;;  %v1758_v17 = vpop.permute.xlu0 %1757 }
 0x393   : > { %3160 = vpow2.f32 %v1453_v14  ;;  %v1267_v22 = vpop.permute.xlu1 %1266 }
 0x394   : > { %3162 = vpow2.f32 %v1455_v24  ;;  %v1331_v31 = vsub.f32 %v5452_v0, %v1267_v22  ;;  %v1332_v61 = vsub.f32 %v5453_v27, %v1267_v22  ;;  %1568 = vadd.xlane.f32.xlu1 %v4706_v46 }
 0x396   : > { %v1457_v53 = vmul.f32 1.442695, %v1331_v31  ;;  %v1459_v3 = vmul.f32 1.442695, %v1332_v61  ;;  %1589 = vadd.xlane.f32.xlu0 %v4803_v7  ;;  %v1722_v31 = vld [vmem:[#allocation5 + $0x8] sm:$0xff] }
 0x397   : > { %v1753_v49 = vpop.permute.xlu1 %1752 }
 0x398   : > { %3164 = vpow2.f32 %v1457_v53  ;;  %1574 = vadd.xlane.f32.xlu1 %v4732_v51  ;;  %v1773_v51 = vpop.permute.xlu0 %1772 }
 0x399   : > { %3166 = vpow2.f32 %v1459_v3 }
 0x39a   : > { %1595 = vadd.xlane.f32.xlu0 %v4821_v59 }
 0x39b   : > { %v1763_v59 = vpop.permute.xlu1 %1762 }
 0x39c   : > { %1580 = vadd.xlane.f32.xlu1 %v4764_v26 }
 0x39e   : > { %1601 = vadd.xlane.f32.xlu0 %v1600_v12  ;;  %v5454_v12 = vsub.f32 %v4581_v11, %v4591_v55  ;;  %v1720_v11 = vld [vmem:[#allocation5 + $0xe8] sm:$0xff] }
 0x39f   : > { %v1768_v37 = vpop.permute.xlu1 %1767  ;;  %v1912_v48 = vmul.f32 %v1763_v59, %v1720_v11 }
 0x3a0   : > { %v3161_v41 = vpop.eup %3160  ;;  %1586 = vadd.xlane.f32.xlu1 %v4790_v18  ;;  %v1783_v18 = vpop.permute.xlu0 %1782  ;;  %v1105_v1 = vmul.f32 1.442695, %v5454_v12 }
 0x3a1   : > { %v3163_v21 = vpop.eup %3162 }
 0x3a2   : > { %2156 = vmatprep.mubr.f32.mxu1 %v3163_v21  ;;  %1607 = vadd.xlane.f32.xlu0 %v1606_v34  ;;  %3168 = vpow2.f32 %v1105_v1  ;;  %v1615_v45 = vadd.f32 %v3163_v21, %v3161_v41  ;;  %v1723_v21 = vld [vmem:[#allocation5 + $0x90] sm:$0xff]  ;;  %v1724_v1 = vld [vmem:[#allocation5 + $0x58] sm:$0xff] }
 0x3a3   : > { %2157 = vmatmul.mubr.f32.gmra.mxu1 %v3161_v41  ;;  %v1914_v41 = vmul.f32 %v1773_v51, %v1722_v31  ;;  %v1728_v31 = vld [vmem:[#allocation5 + $0x38] sm:$0xff] }
 0x3a4   : > { %1592 = vadd.xlane.f32.xlu1 %v4813_v13  ;;  %v1718_v13 = vld [vmem:[#allocation5 + $0x80] sm:$0xff]  ;;  %v1793_v38 = vpop.permute.xlu0 %1792 }
 0x3a5   : > { %v3165_v46 = vpop.eup %3164  ;;  %v1910_v44 = vmul.f32 %v1753_v49, %v1718_v13 }
 0x3a6   : > { %v3167_v7 = vpop.eup %3166  ;;  %1613 = vadd.xlane.f32.xlu0 %v1612_v39  ;;  %v1911_v39 = vmul.f32 %v1758_v17, %v1719_v16 }
 0x3a7   : > { %2161 = vmatprep.mubr.f32.mxu1 %v3167_v7  ;;  %v1618_v26 = vadd.f32 %v3167_v7, %v3165_v46 }
 0x3a8   : > { %2162 = vmatmul.mubr.f32.gmra.mxu1 %v3165_v46  ;;  %1598 = vadd.xlane.f32.xlu1 %v4828_v35  ;;  %v5455_v35 = vsub.f32 %v4599_v60, %v4611_v5  ;;  %v4879_v2 = vpop.permute.xlu0 %1802  ;;  %v1721_v60 = vld [vmem:[#allocation5 + $0x78] sm:$0xff] }
 0x3a9   : > { %v1913_v24 = vmul.f32 %v1768_v37, %v1721_v60 }
 0x3aa   : > { %1619 = vadd.xlane.f32.xlu0 %v1618_v26  ;;  %v1107_v34 = vmul.f32 1.442695, %v5455_v35  ;;  %v1725_v35 = vld [vmem:[#allocation5 + $0xa8] sm:$0xff] }
 0x3ac   : > { %1604 = vadd.xlane.f32.xlu1 %v4838_v43  ;;  %3170 = vpow2.f32 %v1107_v34  ;;  %v4883_v27 = vpop.permute.xlu0 %1812 }
 0x3af   : > { %v4881_v0 = vpop.eup %3168 }
 0x3b0   : > { %1610 = vadd.xlane.f32.xlu1 %v4840_v32  ;;  %v1778_v32 = vpop.permute.xlu1 %1777  ;;  %v4888_v26 = vpop.permute.xlu0 %1822 }
 0x3b1   : > { %v1915_v12 = vmul.f32 %v1778_v32, %v1723_v21  ;;  %v1729_v21 = vld [vmem:[#allocation5 + $0x40] sm:$0xff] }
 0x3b3   : > { %v2008_v56 = vpop.f32.mrf.mxu1 }
 0x3b4   : > { %v2167_v43 = vadd.f32 %v2008_v56, %v1910_v44  ;;  %1616 = vadd.xlane.f32.xlu1 %v1615_v45  ;;  %v1788_v22 = vpop.permute.xlu1 %1787  ;;  %v1916_v45 = vmul.f32 %v1783_v18, %v1724_v1  ;;  %v4891_v34 = vpop.permute.xlu0 %1832  ;;  %v1727_v18 = vld [vmem:[#allocation5 + $0xb0] sm:$0xff] }
 0x3b5   : > { %v2010_v28 = vpop.f32.mrf.mxu1 }
 0x3b6   : > { %2199 = vst [vmem:[#allocation5 + $0x80] sm:$0xff] %v2167_v43  ;;  %v1917_v28 = vmul.f32 %v1788_v22, %v1725_v35 }
 0x3b7   : > { %v2013_v55 = vpop.f32.mrf.mxu1 }
 0x3b8   : > { %v2168_v63 = vadd.f32 %v2013_v55, %v1911_v39  ;;  %v1798_v7 = vpop.permute.xlu1 %1797  ;;  %v1726_v39 = vld [vmem:[#allocation5 + $0xd0] sm:$0xff] }
 0x3b9   : > { %v2015_v29 = vpop.f32.mrf.mxu1  ;;  %v4886_v46 = vpop.eup %3170 }
 0x3ba   : > { %2200 = vst [vmem:[#allocation5 + $0xc8] sm:$0xff] %v2168_v63  ;;  %v4893_v63 = vpop.permute.xlu0 %1842 }
 0x3bb   : > { %v2018_v5 = vpop.f32.mrf.mxu1 }
 0x3bc   : > { %v2169_v6 = vadd.f32 %v2018_v5, %v1912_v48  ;;  %v1808_v51 = vpop.permute.xlu1 %1807  ;;  %v1918_v48 = vmul.f32 %v1793_v38, %v1726_v39 }
 0x3bd   : > { %v2020_v14 = vpop.f32.mrf.mxu1  ;;  %v1921_v1 = vmul.f32 %v1808_v51, %v1729_v21 }
 0x3be   : > { %2201 = vst [vmem:[#allocation5 + $0xe8] sm:$0xff] %v2169_v6  ;;  %v1919_v14 = vmul.f32 %v1798_v7, %v1727_v18  ;;  %v1730_v7 = vld [vmem:[#allocation5 + $0xe0] sm:$0xff] }
 0x3bf   : > { %v2023_v61 = vpop.f32.mrf.mxu1 }
 0x3c0   : > { %v2170_v53 = vadd.f32 %v2023_v61, %v1913_v24  ;;  %1902 = vperm.xlu0 %2979, %v4881_v0   ;;  %v1818_v55 = vpop.permute.xlu1 %1817  ;;  %v4895_v61 = vpop.permute.xlu0 %1852 }
 0x3c1   : > { %v2025_v3 = vpop.f32.mrf.mxu1 }
 0x3c2   : > { %2202 = vst [vmem:[#allocation5 + $0x78] sm:$0xff] %v2170_v53 }
 0x3c3   : > { %v2028_v17 = vpop.f32.mrf.mxu1 }
 0x3c4   : > { %v2171_v49 = vadd.f32 %v2028_v17, %v1914_v41  ;;  %v1828_v24 = vpop.permute.xlu1 %1827  ;;  %v1920_v41 = vmul.f32 %v4879_v2, %v1728_v31 }
 0x3c5   : > { %v2030_v59 = vpop.f32.mrf.mxu1  ;;  %1907 = vperm.xlu1 %2978, %v4886_v46  }
 0x3c6   : > { %2203 = vst [vmem:[#allocation5 + $0x8] sm:$0xff] %v2171_v49  ;;  %v4898_v59 = vpop.permute.xlu0 %1862 }
 0x3c7   : > { %v2033_v13 = vpop.f32.mrf.mxu1 }
 0x3c8   : > { %v2172_v44 = vadd.f32 %v2033_v13, %v1915_v12  ;;  %v1838_v38 = vpop.permute.xlu1 %1837 }
 0x3c9   : > { %v2035_v37 = vpop.f32.mrf.mxu1 }
 0x3ca   : > { %2204 = vst [vmem:[#allocation5 + $0x90] sm:$0xff] %v2172_v44  ;;  %v4903_v2 = vpop.permute.xlu0 %1872 }
 0x3cb   : > { %v2038_v16 = vpop.f32.mrf.mxu1 }
 0x3cc   : > { %v2173_v56 = vadd.f32 %v2038_v16, %v1916_v45  ;;  %v1922_v45 = vmul.f32 %v4883_v27, %v1730_v7  ;;  %v4901_v35 = vpop.permute.xlu1 %1847 }
 0x3cd   : > { %v2040_v43 = vpop.f32.mrf.mxu1 }
 0x3ce   : > { %2205 = vst [vmem:[#allocation5 + $0x58] sm:$0xff] %v2173_v56  ;;  %v1731_v56 = vld [vmem:[#allocation5 + $0x60] sm:$0xff] }
 0x3cf   : > { %v2043_v11 = vpop.f32.mrf.mxu1  ;;  %v1923_v39 = vmul.f32 %v1818_v55, %v1731_v56  ;;  %v1461_v55 = vld [vmem:[#allocation4] sm:$0xff] }
 0x3d0   : > { %v2174_v32 = vadd.f32 %v2043_v11, %v1917_v28  ;;  %v4905_v11 = vpop.permute.xlu1 %1857 }
 0x3d1   : > { %v2045_v29 = vpop.f32.mrf.mxu1 }
 0x3d2   : > { %2206 = vst [vmem:[#allocation5 + $0xa8] sm:$0xff] %v2174_v32  ;;  %v1732_v32 = vld [vmem:[#allocation5 + $0x18] sm:$0xff]  ;;  %v4907_v29 = vpop.permute.xlu0 %1882 }
 0x3d3   : > { %v2048_v60 = vpop.f32.mrf.mxu1  ;;  %v1924_v27 = vmul.f32 %v4888_v26, %v1732_v32 }
 0x3d4   : > { %v2175_v5 = vadd.f32 %v2048_v60, %v1918_v48  ;;  %v1733_v60 = vld [vmem:[#allocation5 + $0x68] sm:$0xff] }
 0x3d5   : > { %v2050_v6 = vpop.f32.mrf.mxu1 }
 0x3d6   : > { %2207 = vst [vmem:[#allocation5 + $0xd0] sm:$0xff] %v2175_v5  ;;  %v4910_v6 = vpop.permute.xlu1 %1867  ;;  %v4912_v31 = vpop.permute.xlu0 %1892 }
 0x3d7   : > { %v2053_v22 = vpop.f32.mrf.mxu1 }
 0x3d8   : > { %v2176_v53 = vadd.f32 %v2053_v22, %v1919_v14 }
 0x3d9   : > { %v2055_v3 = vpop.f32.mrf.mxu1 }
 0x3da   : > { %2208 = vst [vmem:[#allocation5 + $0xb0] sm:$0xff] %v2176_v53  ;;  %v1925_v53 = vmul.f32 %v1828_v24, %v1733_v60  ;;  %v1734_v3 = vld [vmem:[#allocation5 + $0x10] sm:$0xff]  ;;  %v4916_v7 = vpop.permute.xlu1 %1877  ;;  %v1466_v60 = vld [vmem:[#allocation4 + $0x28] sm:$0xff] }
 0x3db   : > { %v2058_v17 = vpop.f32.mrf.mxu1  ;;  %v1926_v26 = vmul.f32 %v4891_v34, %v1734_v3 }
 0x3dc   : > { %v2177_v49 = vadd.f32 %v2058_v17, %v1920_v41  ;;  %v1493_v17 = vmul.f32 %v4620_v23, %v1461_v55  ;;  %v1498_v55 = vmul.f32 %v4684_v4, %v1466_v60  ;;  %v1470_v4 = vld [vmem:[#allocation4 + $0x48] sm:$0xff] }
 0x3dd   : > { %v2060_v12 = vpop.f32.mrf.mxu1 }
 0x3de   : > { %2209 = vst [vmem:[#allocation5 + $0x38] sm:$0xff] %v2177_v49  ;;  %v4920_v34 = vpop.permute.xlu1 %1887 }
 0x3df   : > { %v2063_v13 = vpop.f32.mrf.mxu1 }
 0x3e0   : > { %v2178_v44 = vadd.f32 %v2063_v13, %v1921_v1  ;;  %v1463_v1 = vld [vmem:[#allocation4 + $0x10] sm:$0xff] }
 0x3e1   : > { %v2065_v37 = vpop.f32.mrf.mxu1 }
 0x3e2   : > { %2210 = vst [vmem:[#allocation5 + $0x40] sm:$0xff] %v2178_v44  ;;  %v1735_v44 = vld [vmem:[#allocation5 + $0x70] sm:$0xff] }
 0x3e3   : > { %v2068_v16 = vpop.f32.mrf.mxu1  ;;  %v1927_v23 = vmul.f32 %v1838_v38, %v1735_v44 }
 0x3e4   : > { %v2179_v43 = vadd.f32 %v2068_v16, %v1922_v45  ;;  %v1495_v45 = vmul.f32 %v4654_v40, %v1463_v1 }
 0x3e5   : > { %v2070_v28 = vpop.f32.mrf.mxu1 }
 0x3e6   : > { %2211 = vst [vmem:[#allocation5 + $0xe0] sm:$0xff] %v2179_v43  ;;  %v1464_v43 = vld [vmem:[#allocation4 + $0x18] sm:$0xff] }
 0x3e8   : > { %v2073_v51 = vpop.f32.mrf.mxu1 }
 0x3e9   : > { %v2180_v48 = vadd.f32 %v2073_v51, %v1923_v39  ;;  %v1736_v39 = vld [vmem:[#allocation5 + $0x50] sm:$0xff] }
 0x3ea   : > { %v2075_v18 = vpop.f32.mrf.mxu1  ;;  %v1928_v40 = vmul.f32 %v4893_v63, %v1736_v39  ;;  %v1502_v39 = vmul.f32 %v4718_v57, %v1470_v4 }
 0x3eb   : > { %2212 = vst [vmem:[#allocation5 + $0x60] sm:$0xff] %v2180_v48  ;;  %v1496_v48 = vmul.f32 %v4670_v8, %v1464_v43  ;;  %v1465_v43 = vld [vmem:[#allocation4 + $0x20] sm:$0xff] }
 0x3ed   : > { %v2078_v5 = vpop.f32.mrf.mxu1 }
 0x3ee   : > { %v2181_v14 = vadd.f32 %v2078_v5, %v1924_v27 }
 0x3ef   : > { %v2080_v22 = vpop.f32.mrf.mxu1 }
 0x3f0   : > { %2213 = vst [vmem:[#allocation5 + $0x18] sm:$0xff] %v2181_v14  ;;  %v1737_v14 = vld [vmem:[#allocation5 + $0xa0] sm:$0xff] }
 0x3f1   : > { %v2083_v41 = vpop.f32.mrf.mxu1 }
 0x3f2   : > { %v2182_v21 = vadd.f32 %v2083_v41, %v1925_v53  ;;  %v1468_v41 = vld [vmem:[#allocation4 + $0x38] sm:$0xff] }
 0x3f3   : > { %v2085_v49 = vpop.f32.mrf.mxu1  ;;  %v1527_v12 = vpop.xlane.xlu0 %1526 }
 0x3f4   : > { %2214 = vst [vmem:[#allocation5 + $0x68] sm:$0xff] %v2182_v21  ;;  %v1621_v13 = vadd.f32 %v1527_v12, %v1493_v17  ;;  %v1929_v21 = vmul.f32 %v4901_v35, %v1737_v14  ;;  %v1738_v17 = vld [vmem:[#allocation5 + $0xd8] sm:$0xff]  ;;  %v4928_v49 = vpop.permute.xlu1 %1897  ;;  %v1462_v12 = vld [vmem:[#allocation4 + $0x8] sm:$0xff] }
 0x3f5   : > { %v2088_v37 = vpop.f32.mrf.mxu1  ;;  %v1494_v35 = vmul.f32 %v4613_v30, %v1462_v12  ;;  %v1497_v30 = vmul.f32 %v4636_v33, %v1465_v43  ;;  %v1478_v43 = vld [vmem:[#allocation4 + $0x88] sm:$0xff] }
 0x3f6   : > { %1654 = vst.msk [vmem:[#allocation4] sm:$0xff] %vm1653_vm1, %v1621_v13  ;;  %v2183_v24 = vadd.f32 %v2088_v37, %v1926_v26  ;;  %v1500_v26 = vmul.f32 %v4691_v62, %v1468_v41  ;;  %v1930_v37 = vmul.f32 %v4895_v61, %v1738_v17 }
 0x3f7   : > { %v2090_v16 = vpop.f32.mrf.mxu1  ;;  %v1533_v56 = vpop.xlane.xlu0 %1532 }
 0x3f8   : > { %2215 = vst [vmem:[#allocation5 + $0x10] sm:$0xff] %v2183_v24  ;;  %v1623_v28 = vadd.f32 %v1533_v56, %v1495_v45  ;;  %v1739_v45 = vld [vmem:[#allocation5 + $0x30] sm:$0xff] }
 0x3f9   : > { %v2093_v51 = vpop.f32.mrf.mxu1 }
 0x3fa   : > { %1656 = vst.msk [vmem:[#allocation4 + $0x10] sm:$0xff] %vm1653_vm1, %v1623_v28  ;;  %v2184_v32 = vadd.f32 %v2093_v51, %v1927_v23 }
 0x3fb   : > { %v2095_v18 = vpop.f32.mrf.mxu1  ;;  %v1536_v27 = vpop.xlane.xlu0 %1535 }
 0x3fc   : > { %2216 = vst [vmem:[#allocation5 + $0x70] sm:$0xff] %v2184_v32  ;;  %v1624_v5 = vadd.f32 %v1536_v27, %v1496_v48  ;;  %v1472_v32 = vld [vmem:[#allocation4 + $0x58] sm:$0xff]  ;;  %v1931_v48 = vmul.f32 %v4905_v11, %v1739_v45  ;;  %v1740_v18 = vld [vmem:[#allocation5 + $0x20] sm:$0xff] }
 0x3fd   : > { %v2098_v38 = vpop.f32.mrf.mxu1  ;;  %v1504_v57 = vmul.f32 %v4734_v36, %v1472_v32  ;;  %v1932_v11 = vmul.f32 %v4898_v59, %v1740_v18  ;;  %v1480_v18 = vld [vmem:[#allocation4 + $0x98] sm:$0xff] }
 0x3fe   : > { %1657 = vst.msk [vmem:[#allocation4 + $0x18] sm:$0xff] %vm1653_vm1, %v1624_v5  ;;  %v2185_v22 = vadd.f32 %v2098_v38, %v1928_v40  ;;  %v1467_v40 = vld [vmem:[#allocation4 + $0x30] sm:$0xff] }
 0x3ff   : > { %v2100_v53 = vpop.f32.mrf.mxu1  ;;  %v1542_v3 = vpop.xlane.xlu0 %1541  ;;  %v1499_v33 = vmul.f32 %v4640_v9, %v1467_v40 }
 0x400   : > { %2217 = vst [vmem:[#allocation5 + $0x50] sm:$0xff] %v2185_v22  ;;  %v1626_v8 = vadd.f32 %v1542_v3, %v1498_v55  ;;  %v1474_v55 = vld [vmem:[#allocation4 + $0x68] sm:$0xff]  ;;  %v1741_v3 = vld [vmem:[#allocation5 + $0xf0] sm:$0xff] }
 0x401   : > { %v2103_v63 = vpop.f32.mrf.mxu1  ;;  %v1506_v36 = vmul.f32 %v4750_v52, %v1474_v55  ;;  %v1933_v59 = vmul.f32 %v4910_v6, %v1741_v3 }
 0x402   : > { %1659 = vst.msk [vmem:[#allocation4 + $0x28] sm:$0xff] %vm1653_vm1, %v1626_v8  ;;  %v2186_v1 = vadd.f32 %v2103_v63, %v1929_v21  ;;  %v1469_v8 = vld [vmem:[#allocation4 + $0x40] sm:$0xff] }
 0x403   : > { %v2105_v13 = vpop.f32.mrf.mxu1  ;;  %v1548_v44 = vpop.xlane.xlu0 %1547  ;;  %v1501_v9 = vmul.f32 %v4663_v50, %v1469_v8 }
 0x404   : > { %2218 = vst [vmem:[#allocation5 + $0xa0] sm:$0xff] %v2186_v1  ;;  %v1628_v24 = vadd.f32 %v1548_v44, %v1500_v26  ;;  %v1476_v26 = vld [vmem:[#allocation4 + $0x78] sm:$0xff]  ;;  %v1742_v44 = vld [vmem:[#allocation5 + $0x88] sm:$0xff] }
 0x405   : > { %v2108_v16 = vpop.f32.mrf.mxu1  ;;  %v1530_v56 = vpop.xlane.xlu1 %1529  ;;  %v1508_v52 = vmul.f32 %v4766_v20, %v1476_v26  ;;  %v1934_v6 = vmul.f32 %v4903_v2, %v1742_v44  ;;  %v1510_v20 = vmul.f32 %v4779_v19, %v1478_v43  ;;  %v1512_v19 = vmul.f32 %v4792_v10, %v1480_v18  ;;  %v5456_v10 = vld [vmem:[#allocation66_spill] sm:$0xff] }
 0x406   : > { %1661 = vst.msk [vmem:[#allocation4 + $0x38] sm:$0xff] %vm1653_vm1, %v1628_v24  ;;  %v2187_v23 = vadd.f32 %v2108_v16, %v1930_v37  ;;  %v1622_v28 = vadd.f32 %v1530_v56, %v1494_v35  ;;  %v1471_v24 = vld [vmem:[#allocation4 + $0x50] sm:$0xff] }
 0x407   : > { %v2110_v62 = vpop.f32.mrf.mxu1  ;;  %v1554_v51 = vpop.xlane.xlu0 %1553  ;;  %v1503_v50 = vmul.f32 %v4675_v47, %v1471_v24 }
 0x408   : > { %2219 = vst [vmem:[#allocation5 + $0xd8] sm:$0xff] %v2187_v23  ;;  %1655 = vst.msk [vmem:[#allocation4 + $0x8] sm:$0xff] %vm1653_vm1, %v1622_v28  ;;  %v1630_v61 = vadd.f32 %v1554_v51, %v1502_v39  ;;  %v1743_v28 = vld [vmem:[#allocation5 + $0x48] sm:$0xff]  ;;  %v1473_v51 = vld [vmem:[#allocation4 + $0x60] sm:$0xff] }
 0x409   : > { %v2113_v27 = vpop.f32.mrf.mxu1  ;;  %v1539_v60 = vpop.xlane.xlu1 %1538  ;;  %v1935_v2 = vmul.f32 %v4916_v7, %v1743_v28  ;;  %v1505_v47 = vmul.f32 %v4694_v54, %v1473_v51 }
 0x40a   : > { %1663 = vst.msk [vmem:[#allocation4 + $0x48] sm:$0xff] %vm1653_vm1, %v1630_v61  ;;  %v2188_v5 = vadd.f32 %v2113_v27, %v1931_v48  ;;  %v1625_v14 = vadd.f32 %v1539_v60, %v1497_v30  ;;  %v1744_v60 = vld [vmem:[#allocation5 + $0xf8] sm:$0xff] }
 0x40b   : > { %v2115_v38 = vpop.f32.mrf.mxu1  ;;  %v1560_v22 = vpop.xlane.xlu0 %1559  ;;  %v1936_v7 = vmul.f32 %v4907_v29, %v1744_v60 }
 0x40c   : > { %2220 = vst [vmem:[#allocation5 + $0x30] sm:$0xff] %v2188_v5  ;;  %1658 = vst.msk [vmem:[#allocation4 + $0x20] sm:$0xff] %vm1653_vm1, %v1625_v14  ;;  %v1632_v53 = vadd.f32 %v1560_v22, %v1504_v57  ;;  %v1475_v14 = vld [vmem:[#allocation4 + $0x70] sm:$0xff] }
 0x40d   : > { %v2118_v41 = vpop.f32.mrf.mxu1  ;;  %v1545_v21 = vpop.xlane.xlu1 %1544  ;;  %v1507_v54 = vmul.f32 %v4711_v15, %v1475_v14  ;;  %v5457_v15 = vld [vmem:[#allocation31_spill] sm:$0xff] }
 0x40e   : > { %1665 = vst.msk [vmem:[#allocation4 + $0x58] sm:$0xff] %vm1653_vm1, %v1632_v53  ;;  %v2189_v17 = vadd.f32 %v2118_v41, %v1932_v11  ;;  %v1627_v63 = vadd.f32 %v1545_v21, %v1499_v33  ;;  %v1482_v11 = vld [vmem:[#allocation4 + $0xa8] sm:$0xff]  ;;  %v1745_v33 = vld [vmem:[#allocation5 + $0xc0] sm:$0xff] }
 0x40f   : > { %v2120_v12 = vpop.f32.mrf.mxu1  ;;  %v1566_v1 = vpop.xlane.xlu0 %1565  ;;  %v1477_v21 = vld [vmem:[#allocation4 + $0x80] sm:$0xff]  ;;  %v1937_v29 = vmul.f32 %v4920_v34, %v1745_v33 }
 0x410   : > { %2221 = vst [vmem:[#allocation5 + $0x20] sm:$0xff] %v2189_v17  ;;  %1660 = vst.msk [vmem:[#allocation4 + $0x30] sm:$0xff] %vm1653_vm1, %v1627_v63  ;;  %v1634_v13 = vadd.f32 %v1566_v1, %v1506_v36  ;;  %v1514_v63 = vmul.f32 %v5456_v10, %v1482_v11  ;;  %v1484_v1 = vld [vmem:[#allocation4 + $0xb8] sm:$0xff] }
 0x411   : > { %v2123_v4 = vpop.f32.mrf.mxu1  ;;  %v1551_v37 = vpop.xlane.xlu1 %1550 }
 0x412   : > { %1667 = vst.msk [vmem:[#allocation4 + $0x68] sm:$0xff] %vm1653_vm1, %v1634_v13  ;;  %v2190_v35 = vadd.f32 %v2123_v4, %v1933_v59  ;;  %v1629_v45 = vadd.f32 %v1551_v37, %v1501_v9  ;;  %v1509_v59 = vmul.f32 %v5457_v15, %v1477_v21  ;;  %v1746_v13 = vld [vmem:[#allocation5 + $0xb8] sm:$0xff]  ;;  %v1479_v4 = vld [vmem:[#allocation4 + $0x90] sm:$0xff] }
 0x413   : > { %v2125_v16 = vpop.f32.mrf.mxu1  ;;  %v1572_v56 = vpop.xlane.xlu0 %1571  ;;  %v1938_v34 = vmul.f32 %v4912_v31, %v1746_v13 }
 0x414   : > { %2222 = vst [vmem:[#allocation5 + $0xf0] sm:$0xff] %v2190_v35  ;;  %1662 = vst.msk [vmem:[#allocation4 + $0x40] sm:$0xff] %vm1653_vm1, %v1629_v45  ;;  %v1636_v23 = vadd.f32 %v1572_v56, %v1508_v52  ;;  %v5458_v35 = vld [vmem:[#allocation35_spill] sm:$0xff]  ;;  %v1486_v56 = vld [vmem:[#allocation4 + $0xc8] sm:$0xff] }
 0x415   : > { %v2128_v39 = vpop.f32.mrf.mxu1  ;;  %v1557_v62 = vpop.xlane.xlu1 %1556  ;;  %v1516_v45 = vmul.f32 %v5458_v35, %v1484_v1  ;;  %v5463_v1 = vld [vmem:[#allocation64_spill] sm:$0xff] }
 0x416   : > { %1669 = vst.msk [vmem:[#allocation4 + $0x78] sm:$0xff] %vm1653_vm1, %v1636_v23  ;;  %v2191_v32 = vadd.f32 %v2128_v39, %v1934_v6  ;;  %v1631_v48 = vadd.f32 %v1557_v62, %v1503_v50  ;;  %v5459_v6 = vld [vmem:[#allocation32_spill] sm:$0xff]  ;;  %v1747_v50 = vld [vmem:[#allocation5] sm:$0xff] }
 0x417   : > { %v2130_v61 = vpop.f32.mrf.mxu1  ;;  %v1578_v30 = vpop.xlane.xlu0 %1577  ;;  %v1511_v23 = vmul.f32 %v5459_v6, %v1479_v4  ;;  %v1481_v62 = vld [vmem:[#allocation4 + $0xa0] sm:$0xff]  ;;  %v1939_v31 = vmul.f32 %v4928_v49, %v1747_v50  ;;  %v1748_v35 = vld [vmem:[#allocation5 + $0x28] sm:$0xff] }
 0x418   : > { %2223 = vst [vmem:[#allocation5 + $0x88] sm:$0xff] %v2191_v32  ;;  %1664 = vst.msk [vmem:[#allocation4 + $0x50] sm:$0xff] %vm1653_vm1, %v1631_v48  ;;  %v1638_v27 = vadd.f32 %v1578_v30, %v1510_v20  ;;  %v1518_v48 = vmul.f32 %v4823_v42, %v1486_v56  ;;  %v1488_v30 = vld [vmem:[#allocation4 + $0xd8] sm:$0xff] }
 0x419   : > { %v2133_v40 = vpop.f32.mrf.mxu1  ;;  %v1563_v5 = vpop.xlane.xlu1 %1562  ;;  %v1520_v42 = vmul.f32 %v4830_v25, %v1488_v30  ;;  %v1749_v56 = vld [vmem:[#allocation5 + $0x98] sm:$0xff] }
 0x41a   : > { %1671 = vst.msk [vmem:[#allocation4 + $0x88] sm:$0xff] %vm1653_vm1, %v1638_v27  ;;  %v2192_v57 = vadd.f32 %v2133_v40, %v1935_v2  ;;  %v1633_v38 = vadd.f32 %v1563_v5, %v1505_v47  ;;  %v5460_v2 = vld [vmem:[#allocation33_spill] sm:$0xff] }
 0x41b   : > { %v2135_v22 = vpop.f32.mrf.mxu1  ;;  %v1584_v55 = vpop.xlane.xlu0 %1583  ;;  %v1513_v27 = vmul.f32 %v5460_v2, %v1481_v62  ;;  %v1483_v40 = vld [vmem:[#allocation4 + $0xb0] sm:$0xff] }
 0x41c   : > { %2224 = vst [vmem:[#allocation5 + $0x48] sm:$0xff] %v2192_v57  ;;  %1666 = vst.msk [vmem:[#allocation4 + $0x60] sm:$0xff] %vm1653_vm1, %v1633_v38  ;;  %v1640_v53 = vadd.f32 %v1584_v55, %v1512_v19  ;;  %v1490_v19 = vld [vmem:[#allocation4 + $0xe8] sm:$0xff] }
 0x41d   : > { %v2138_v3 = vpop.f32.mrf.mxu1  ;;  %v1569_v41 = vpop.xlane.xlu1 %1568  ;;  %v5461_v22 = vld [vmem:[#allocation72_spill] sm:$0xff] }
 0x41e   : > { %1673 = vst.msk [vmem:[#allocation4 + $0x98] sm:$0xff] %vm1653_vm1, %v1640_v53  ;;  %v2193_v8 = vadd.f32 %v2138_v3, %v1936_v7  ;;  %v1635_v17 = vadd.f32 %v1569_v41, %v1507_v54  ;;  %v1515_v55 = vmul.f32 %v5461_v22, %v1483_v40  ;;  %v1485_v7 = vld [vmem:[#allocation4 + $0xc0] sm:$0xff]  ;;  %v1522_v54 = vmul.f32 %v4835_v58, %v1490_v19  ;;  %v1492_v3 = vld [vmem:[#allocation4 + $0xf8] sm:$0xff]  ;;  %v5462_v41 = vld [vmem:[#allocation73_spill] sm:$0xff] }
 0x41f   : > { %v2140_v36 = vpop.f32.mrf.mxu1  ;;  %v1590_v12 = vpop.xlane.xlu0 %1589  ;;  %v1517_v21 = vmul.f32 %v5462_v41, %v1485_v7 }
 0x420   : > { %2225 = vst [vmem:[#allocation5 + $0xf8] sm:$0xff] %v2193_v8  ;;  %1668 = vst.msk [vmem:[#allocation4 + $0x70] sm:$0xff] %vm1653_vm1, %v1635_v17  ;;  %v1642_v26 = vadd.f32 %v1590_v12, %v1514_v63  ;;  %v1487_v17 = vld [vmem:[#allocation4 + $0xd0] sm:$0xff]  ;;  %v1524_v63 = vmul.f32 %v4886_v46, %v1492_v3 }
 0x421   : > { %v2143_v9 = vpop.f32.mrf.mxu1  ;;  %v1575_v44 = vpop.xlane.xlu1 %1574  ;;  %v1519_v58 = vmul.f32 %v5463_v1, %v1487_v17 }
 0x422   : > { %1675 = vst.msk [vmem:[#allocation4 + $0xa8] sm:$0xff] %vm1653_vm1, %v1642_v26  ;;  %v2194_v37 = vadd.f32 %v2143_v9, %v1937_v29  ;;  %v1637_v24 = vadd.f32 %v1575_v44, %v1509_v59  ;;  %v1489_v26 = vld [vmem:[#allocation4 + $0xe0] sm:$0xff]  ;;  %v5464_v59 = vld [vmem:[#allocation34_spill] sm:$0xff]  ;;  %v1491_v44 = vld [vmem:[#allocation4 + $0xf0] sm:$0xff] }
 0x423   : > { %v2145_v52 = vpop.f32.mrf.mxu1  ;;  %v1596_v16 = vpop.xlane.xlu0 %1595  ;;  %v1521_v13 = vmul.f32 %v5464_v59, %v1489_v26  ;;  %v1523_v46 = vmul.f32 %v4881_v0, %v1491_v44 }
 0x424   : > { %2226 = vst [vmem:[#allocation5 + $0xc0] sm:$0xff] %v2194_v37  ;;  %1670 = vst.msk [vmem:[#allocation4 + $0x80] sm:$0xff] %vm1653_vm1, %v1637_v24  ;;  %v1644_v43 = vadd.f32 %v1596_v16, %v1516_v45 }
 0x425   : > { %v2148_v28 = vpop.f32.mrf.mxu1  ;;  %v1581_v39 = vpop.xlane.xlu1 %1580 }
 0x426   : > { %1677 = vst.msk [vmem:[#allocation4 + $0xb8] sm:$0xff] %vm1653_vm1, %v1644_v43  ;;  %v2195_v51 = vadd.f32 %v2148_v28, %v1938_v34  ;;  %v1639_v32 = vadd.f32 %v1581_v39, %v1511_v23 }
 0x427   : > { %v2150_v20 = vpop.f32.mrf.mxu1  ;;  %v1602_v61 = vpop.xlane.xlu0 %1601 }
 0x428   : > { %2227 = vst [vmem:[#allocation5 + $0xb8] sm:$0xff] %v2195_v51  ;;  %1672 = vst.msk [vmem:[#allocation4 + $0x90] sm:$0xff] %vm1653_vm1, %v1639_v32  ;;  %v1646_v18 = vadd.f32 %v1602_v61, %v1518_v48 }
 0x429   : > { %v2153_v47 = vpop.f32.mrf.mxu1  ;;  %v1587_v60 = vpop.xlane.xlu1 %1586 }
 0x42a   : > { %1679 = vst.msk [vmem:[#allocation4 + $0xc8] sm:$0xff] %vm1653_vm1, %v1646_v18  ;;  %v2196_v5 = vadd.f32 %v2153_v47, %v1939_v31  ;;  %v1641_v14 = vadd.f32 %v1587_v60, %v1513_v27 }
 0x42b   : > { %v2155_v57 = vpop.f32.mrf.mxu1  ;;  %v1608_v38 = vpop.xlane.xlu0 %1607 }
 0x42c   : > { %2228 = vst [vmem:[#allocation5] sm:$0xff] %v2196_v5  ;;  %1674 = vst.msk [vmem:[#allocation4 + $0xa0] sm:$0xff] %vm1653_vm1, %v1641_v14  ;;  %v1648_v49 = vadd.f32 %v1608_v38, %v1520_v42 }
 0x42d   : > { %v1593_v11 = vpop.xlane.xlu1 %1592 }
 0x42e   : > { %1681 = vst.msk [vmem:[#allocation4 + $0xd8] sm:$0xff] %vm1653_vm1, %v1648_v49  ;;  %v1643_v53 = vadd.f32 %v1593_v11, %v1515_v55 }
 0x42f   : > { %v1614_v33 = vpop.xlane.xlu0 %1613 }
 0x430   : > { %1676 = vst.msk [vmem:[#allocation4 + $0xb0] sm:$0xff] %vm1653_vm1, %v1643_v53  ;;  %v1650_v25 = vadd.f32 %v1614_v33, %v1522_v54 }
 0x431   : > { %v1599_v8 = vpop.xlane.xlu1 %1598 }
 0x432   : > { %1683 = vst.msk [vmem:[#allocation4 + $0xe8] sm:$0xff] %vm1653_vm1, %v1650_v25  ;;  %v1645_v10 = vadd.f32 %v1599_v8, %v1517_v21 }
 0x433   : > { %v1620_v36 = vpop.xlane.xlu0 %1619 }
 0x434   : > { %1678 = vst.msk [vmem:[#allocation4 + $0xc0] sm:$0xff] %vm1653_vm1, %v1645_v10  ;;  %v1652_v12 = vadd.f32 %v1620_v36, %v1524_v63 }
 0x435   : > { %v1605_v29 = vpop.xlane.xlu1 %1604 }
 0x436   : > { %1685 = vst.msk [vmem:[#allocation4 + $0xf8] sm:$0xff] %vm1653_vm1, %v1652_v12  ;;  %v1647_v15 = vadd.f32 %v1605_v29, %v1519_v58 }
 0x438   : > { %1680 = vst.msk [vmem:[#allocation4 + $0xd0] sm:$0xff] %vm1653_vm1, %v1647_v15 }
 0x439   : > { %v1611_v9 = vpop.xlane.xlu1 %1610 }
 0x43a   : > { %v1649_v4 = vadd.f32 %v1611_v9, %v1521_v13 }
 0x43b   : > { %v1903_v45 = vpop.permute.xlu0 %1902 }
 0x43c   : > { %1682 = vst.msk [vmem:[#allocation4 + $0xe0] sm:$0xff] %vm1653_vm1, %v1649_v4  ;;  %v1940_v52 = vmul.f32 %v1903_v45, %v1748_v35 }
 0x43d   : > { %v1617_v37 = vpop.xlane.xlu1 %1616 }
 0x43e   : > { %v1651_v24 = vadd.f32 %v1617_v37, %v1523_v46 }
 0x440   : > { %1684 = vst.msk [vmem:[#allocation4 + $0xf0] sm:$0xff] %vm1653_vm1, %v1651_v24 }
 0x441   : > { %v1908_v34 = vpop.permute.xlu1 %1907 }
 0x442   : > { %v1941_v23 = vmul.f32 %v1908_v34, %v1749_v56 }
 0x463   : > { %v2158_v16 = vpop.f32.mrf.mxu1 }
 0x464   : > { %v2197_v43 = vadd.f32 %v2158_v16, %v1940_v52 }
 0x465   : > { %v2160_v6 = vpop.f32.mrf.mxu1 }
 0x466   : > { %2229 = vst [vmem:[#allocation5 + $0x28] sm:$0xff] %v2197_v43 }
 0x467   : > { %2234 = sbr.rel (%p2738_p10) target bundleno = 1335 (0x537), region = 52 }
 0x468   : > { %v2163_v50 = vpop.f32.mrf.mxu1 }
 0x469   : > { %v2198_v28 = vadd.f32 %v2163_v50, %v1941_v23 }
 0x46a   : > { %v2165_v39 = vpop.f32.mrf.mxu1 }
 0x46b   : > { %2230 = vst [vmem:[#allocation5 + $0x98] sm:$0xff] %v2198_v28 }
 0x46c   : > { %v2237_v0 = vld [vmem:[#allocation4 + $0x10] sm:$0xff]  ;;  %v2235_v62 = vld [vmem:[#allocation4] sm:$0xff]  ;;  %v2238_v51 = vld [vmem:[#allocation4 + $0x18] sm:$0xff]  ;;  %v3473_v32 = vmov 0  }
 0x46d   : > { %3173 = vset.pattern.permute.xlu1 %v3473_v32  ;;  %3172 = vset.pattern.permute.xlu0 %v3473_v32  ;;  %3174 = vrcp.f32 %v2237_v0  ;;  %v2236_v48 = vld [vmem:[#allocation4 + $0x8] sm:$0xff]  ;;  %v2239_v61 = vld [vmem:[#allocation4 + $0x20] sm:$0xff]  ;;  %v2242_v30 = vld [vmem:[#allocation4 + $0x38] sm:$0xff] }
 0x46e   : > { %3176 = vrcp.f32 %v2235_v62  ;;  %v2240_v20 = vld [vmem:[#allocation4 + $0x28] sm:$0xff]  ;;  %v2241_v31 = vld [vmem:[#allocation4 + $0x30] sm:$0xff]  ;;  %v2243_v2 = vld [vmem:[#allocation4 + $0x40] sm:$0xff] }
 0x46f   : > { %3178 = vrcp.f32 %v2238_v51  ;;  %v2244_v18 = vld [vmem:[#allocation4 + $0x48] sm:$0xff]  ;;  %v2246_v40 = vld [vmem:[#allocation4 + $0x58] sm:$0xff]  ;;  %v2245_v14 = vld [vmem:[#allocation4 + $0x50] sm:$0xff] }
 0x470   : > { %3180 = vrcp.f32 %v2236_v48  ;;  %v2248_v57 = vld [vmem:[#allocation4 + $0x68] sm:$0xff]  ;;  %v2247_v19 = vld [vmem:[#allocation4 + $0x60] sm:$0xff]  ;;  %v2250_v22 = vld [vmem:[#allocation4 + $0x78] sm:$0xff] }
 0x471   : > { %3182 = vrcp.f32 %v2240_v20  ;;  %v2249_v11 = vld [vmem:[#allocation4 + $0x70] sm:$0xff]  ;;  %v2252_v53 = vld [vmem:[#allocation4 + $0x88] sm:$0xff]  ;;  %v2251_v33 = vld [vmem:[#allocation4 + $0x80] sm:$0xff] }
 0x472   : > { %3184 = vrcp.f32 %v2239_v61  ;;  %v2254_v25 = vld [vmem:[#allocation4 + $0x98] sm:$0xff]  ;;  %v2253_v21 = vld [vmem:[#allocation4 + $0x90] sm:$0xff]  ;;  %v2256_v17 = vld [vmem:[#allocation4 + $0xa8] sm:$0xff] }
 0x473   : > { %3186 = vrcp.f32 %v2242_v30  ;;  %v2255_v63 = vld [vmem:[#allocation4 + $0xa0] sm:$0xff]  ;;  %v2258_v12 = vld [vmem:[#allocation4 + $0xb8] sm:$0xff]  ;;  %v2257_v58 = vld [vmem:[#allocation4 + $0xb0] sm:$0xff] }
 0x474   : > { %3188 = vrcp.f32 %v2241_v31  ;;  %v2260_v26 = vld [vmem:[#allocation4 + $0xc8] sm:$0xff]  ;;  %v2259_v59 = vld [vmem:[#allocation4 + $0xc0] sm:$0xff]  ;;  %v2262_v9 = vld [vmem:[#allocation4 + $0xd8] sm:$0xff] }
 0x475   : > { %3190 = vrcp.f32 %v2244_v18  ;;  %v2261_v4 = vld [vmem:[#allocation4 + $0xd0] sm:$0xff]  ;;  %v2264_v37 = vld [vmem:[#allocation4 + $0xe8] sm:$0xff]  ;;  %v2263_v35 = vld [vmem:[#allocation4 + $0xe0] sm:$0xff] }
 0x476   : > { %3192 = vrcp.f32 %v2243_v2  ;;  %v2266_v52 = vld [vmem:[#allocation4 + $0xf8] sm:$0xff]  ;;  %v2265_v56 = vld [vmem:[#allocation4 + $0xf0] sm:$0xff]  ;;  %v2301_v62 = vld [vmem:[#allocation5 + $0xe8] sm:$0xff] }
 0x477   : > { %3194 = vrcp.f32 %v2246_v40  ;;  %v2299_v51 = vld [vmem:[#allocation5 + $0x80] sm:$0xff]  ;;  %v2302_v30 = vld [vmem:[#allocation5 + $0x78] sm:$0xff]  ;;  %v2300_v31 = vld [vmem:[#allocation5 + $0xc8] sm:$0xff] }
 0x478   : > { %3196 = vrcp.f32 %v2245_v14  ;;  %v2303_v40 = vld [vmem:[#allocation5 + $0x8] sm:$0xff] }
 0x479   : > { %3198 = vrcp.f32 %v2248_v57 }
 0x47a   : > { %v3175_v27 = vpop.eup %3174  ;;  %3200 = vrcp.f32 %v2247_v19  ;;  %v2305_v19 = vld [vmem:[#allocation5 + $0x58] sm:$0xff] }
 0x47b   : > { %v3177_v47 = vpop.eup %3176  ;;  %2343 = vperm.xlu1 %3173, %v3175_v27   ;;  %3202 = vrcp.f32 %v2250_v22 }
 0x47c   : > { %v3179_v60 = vpop.eup %3178  ;;  %2333 = vperm.xlu0 %3172, %v3177_v47   ;;  %3204 = vrcp.f32 %v2249_v11 }
 0x47d   : > { %v3181_v5 = vpop.eup %3180  ;;  %3206 = vrcp.f32 %v2252_v53  ;;  %v2307_v53 = vld [vmem:[#allocation5 + $0xd0] sm:$0xff] }
 0x47e   : > { %v3183_v42 = vpop.eup %3182  ;;  %3208 = vrcp.f32 %v2251_v33 }
 0x47f   : > { %2348 = vperm.xlu1 %3173, %v3179_v60   ;;  %v3185_v38 = vpop.eup %3184  ;;  %3210 = vrcp.f32 %v2254_v25  ;;  %v2304_v60 = vld [vmem:[#allocation5 + $0x90] sm:$0xff] }
 0x480   : > { %2338 = vperm.xlu0 %3172, %v3181_v5   ;;  %v3187_v49 = vpop.eup %3186  ;;  %3212 = vrcp.f32 %v2253_v21  ;;  %v2309_v21 = vld [vmem:[#allocation5 + $0x38] sm:$0xff] }
 0x481   : > { %v3189_v55 = vpop.eup %3188  ;;  %3214 = vrcp.f32 %v2256_v17 }
 0x482   : > { %v3191_v7 = vpop.eup %3190  ;;  %3216 = vrcp.f32 %v2255_v63 }
 0x483   : > { %2358 = vperm.xlu1 %3173, %v3183_v42   ;;  %v3193_v54 = vpop.eup %3192  ;;  %3218 = vrcp.f32 %v2258_v12  ;;  %v2311_v12 = vld [vmem:[#allocation5 + $0xe0] sm:$0xff] }
 0x484   : > { %2353 = vperm.xlu0 %3172, %v3185_v38   ;;  %v3195_v3 = vpop.eup %3194  ;;  %3220 = vrcp.f32 %v2257_v58  ;;  %v2306_v38 = vld [vmem:[#allocation5 + $0xa8] sm:$0xff] }
 0x485   : > { %v3197_v41 = vpop.eup %3196  ;;  %3222 = vrcp.f32 %v2260_v26 }
 0x486   : > { %v3199_v8 = vpop.eup %3198  ;;  %3224 = vrcp.f32 %v2259_v59  ;;  %v2313_v59 = vld [vmem:[#allocation5 + $0x18] sm:$0xff] }
 0x487   : > { %2368 = vperm.xlu1 %3173, %v3187_v49   ;;  %v3201_v10 = vpop.eup %3200  ;;  %3226 = vrcp.f32 %v2262_v9 }
 0x488   : > { %2363 = vperm.xlu0 %3172, %v3189_v55   ;;  %v3203_v36 = vpop.eup %3202  ;;  %3228 = vrcp.f32 %v2261_v4 }
 0x489   : > { %v3205_v1 = vpop.eup %3204  ;;  %3230 = vrcp.f32 %v2264_v37  ;;  %v2315_v37 = vld [vmem:[#allocation5 + $0x10] sm:$0xff] }
 0x48a   : > { %v3207_v29 = vpop.eup %3206  ;;  %3232 = vrcp.f32 %v2263_v35 }
 0x48b   : > { %2378 = vperm.xlu1 %3173, %v3191_v7   ;;  %v3209_v15 = vpop.eup %3208  ;;  %3234 = vrcp.f32 %v2266_v52  ;;  %v2308_v7 = vld [vmem:[#allocation5 + $0xb0] sm:$0xff] }
 0x48c   : > { %2373 = vperm.xlu0 %3172, %v3193_v54   ;;  %v3211_v13 = vpop.eup %3210  ;;  %3236 = vrcp.f32 %v2265_v56  ;;  %v2317_v56 = vld [vmem:[#allocation5 + $0x50] sm:$0xff] }
 0x48d   : > { %v3213_v44 = vpop.eup %3212 }
 0x48e   : > { %v3215_v46 = vpop.eup %3214 }
 0x48f   : > { %2388 = vperm.xlu1 %3173, %v3195_v3   ;;  %v3217_v24 = vpop.eup %3216 }
 0x490   : > { %2383 = vperm.xlu0 %3172, %v3197_v41   ;;  %v3219_v45 = vpop.eup %3218  ;;  %v2310_v41 = vld [vmem:[#allocation5 + $0x40] sm:$0xff] }
 0x491   : > { %v3221_v16 = vpop.eup %3220 }
 0x492   : > { %v3223_v34 = vpop.eup %3222 }
 0x493   : > { %2398 = vperm.xlu1 %3173, %v3199_v8   ;;  %v3225_v43 = vpop.eup %3224 }
 0x494   : > { %2393 = vperm.xlu0 %3172, %v3201_v10   ;;  %v3227_v6 = vpop.eup %3226 }
 0x495   : > { %v3229_v23 = vpop.eup %3228 }
 0x496   : > { %v3231_v50 = vpop.eup %3230 }
 0x497   : > { %2408 = vperm.xlu1 %3173, %v3203_v36   ;;  %v3233_v28 = vpop.eup %3232  ;;  %v2312_v36 = vld [vmem:[#allocation5 + $0x60] sm:$0xff] }
 0x498   : > { %2403 = vperm.xlu0 %3172, %v3205_v1   ;;  %v3235_v39 = vpop.eup %3234 }
 0x499   : > { %v3237_v0 = vpop.eup %3236 }
 0x49b   : > { %2418 = vperm.xlu1 %3173, %v3207_v29  }
 0x49c   : > { %2413 = vperm.xlu0 %3172, %v3209_v15   ;;  %v2314_v15 = vld [vmem:[#allocation5 + $0x68] sm:$0xff] }
 0x49f   : > { %2428 = vperm.xlu1 %3173, %v3211_v13  }
 0x4a0   : > { %2423 = vperm.xlu0 %3172, %v3213_v44  }
 0x4a3   : > { %2438 = vperm.xlu1 %3173, %v3215_v46   ;;  %v2316_v46 = vld [vmem:[#allocation5 + $0x70] sm:$0xff] }
 0x4a4   : > { %2433 = vperm.xlu0 %3172, %v3217_v24  }
 0x4a7   : > { %2448 = vperm.xlu1 %3173, %v3219_v45  }
 0x4a8   : > { %2443 = vperm.xlu0 %3172, %v3221_v16   ;;  %v2318_v16 = vld [vmem:[#allocation5 + $0xa0] sm:$0xff] }
 0x4ab   : > { %2458 = vperm.xlu1 %3173, %v3223_v34  }
 0x4ac   : > { %2453 = vperm.xlu0 %3172, %v3225_v43  }
 0x4af   : > { %2468 = vperm.xlu1 %3173, %v3227_v6  }
 0x4b0   : > { %2463 = vperm.xlu0 %3172, %v3229_v23  }
 0x4b3   : > { %2478 = vperm.xlu1 %3173, %v3231_v50   ;;  %v2320_v50 = vld [vmem:[#allocation5 + $0x30] sm:$0xff] }
 0x4b4   : > { %2473 = vperm.xlu0 %3172, %v3233_v28   ;;  %v2319_v28 = vld [vmem:[#allocation5 + $0xd8] sm:$0xff] }
 0x4b7   : > { %2488 = vperm.xlu1 %3173, %v3235_v39  }
 0x4b8   : > { %2483 = vperm.xlu0 %3172, %v3237_v0  }
 0x4f6   : > { %v2344_v32 = vpop.permute.xlu1 %2343 }
 0x4f7   : > { %v2493_v48 = vmul.f32 %v2344_v32, %v2301_v62  ;;  %v2334_v20 = vpop.permute.xlu0 %2333  ;;  %v2322_v32 = vld [vmem:[#allocation5 + $0xf0] sm:$0xff] }
 0x4f8   : > { %v2491_v61 = vmul.f32 %v2334_v20, %v2299_v51 }
 0x4f9   : > { %2525 = vst [vmem:[%s3768_s4 + $0x10] sm:$0xff] %v2493_v48  ;;  %v2321_v48 = vld [vmem:[#allocation5 + $0x20] sm:$0xff] }
 0x4fa   : > { %2523 = vst [vmem:[%s3768_s4] sm:$0xff] %v2491_v61  ;;  %v2349_v18 = vpop.permute.xlu1 %2348 }
 0x4fb   : > { %v2494_v2 = vmul.f32 %v2349_v18, %v2302_v30  ;;  %v2339_v27 = vpop.permute.xlu0 %2338  ;;  %v2324_v18 = vld [vmem:[#allocation5 + $0x48] sm:$0xff] }
 0x4fc   : > { %v2492_v47 = vmul.f32 %v2339_v27, %v2300_v31 }
 0x4fd   : > { %2526 = vst [vmem:[%s3768_s4 + $0x18] sm:$0xff] %v2494_v2  ;;  %v2323_v2 = vld [vmem:[#allocation5 + $0x88] sm:$0xff] }
 0x4fe   : > { %2524 = vst [vmem:[%s3768_s4 + $0x8] sm:$0xff] %v2492_v47  ;;  %v2359_v5 = vpop.permute.xlu1 %2358 }
 0x4ff   : > { %v2496_v14 = vmul.f32 %v2359_v5, %v2304_v60  ;;  %v2354_v42 = vpop.permute.xlu0 %2353  ;;  %v2326_v5 = vld [vmem:[#allocation5 + $0xc0] sm:$0xff] }
 0x500   : > { %v2495_v57 = vmul.f32 %v2354_v42, %v2303_v40 }
 0x501   : > { %2528 = vst [vmem:[%s3768_s4 + $0x28] sm:$0xff] %v2496_v14  ;;  %v2325_v14 = vld [vmem:[#allocation5 + $0xf8] sm:$0xff] }
 0x502   : > { %2527 = vst [vmem:[%s3768_s4 + $0x20] sm:$0xff] %v2495_v57  ;;  %v2369_v49 = vpop.permute.xlu1 %2368 }
 0x503   : > { %v2498_v22 = vmul.f32 %v2369_v49, %v2306_v38  ;;  %v2364_v55 = vpop.permute.xlu0 %2363  ;;  %v2328_v49 = vld [vmem:[#allocation5] sm:$0xff] }
 0x504   : > { %v2497_v11 = vmul.f32 %v2364_v55, %v2305_v19 }
 0x505   : > { %2530 = vst [vmem:[%s3768_s4 + $0x38] sm:$0xff] %v2498_v22  ;;  %v2327_v22 = vld [vmem:[#allocation5 + $0xb8] sm:$0xff] }
 0x506   : > { %2529 = vst [vmem:[%s3768_s4 + $0x30] sm:$0xff] %v2497_v11  ;;  %v2379_v54 = vpop.permute.xlu1 %2378 }
 0x507   : > { %v2500_v33 = vmul.f32 %v2379_v54, %v2308_v7  ;;  %v2374_v3 = vpop.permute.xlu0 %2373  ;;  %v2330_v54 = vld [vmem:[#allocation5 + $0x98] sm:$0xff] }
 0x508   : > { %v2499_v25 = vmul.f32 %v2374_v3, %v2307_v53 }
 0x509   : > { %2532 = vst [vmem:[%s3768_s4 + $0x48] sm:$0xff] %v2500_v33  ;;  %v2329_v33 = vld [vmem:[#allocation5 + $0x28] sm:$0xff] }
 0x50a   : > { %2531 = vst [vmem:[%s3768_s4 + $0x40] sm:$0xff] %v2499_v25  ;;  %v2389_v8 = vpop.permute.xlu1 %2388 }
 0x50b   : > { %v2502_v17 = vmul.f32 %v2389_v8, %v2310_v41  ;;  %v2384_v10 = vpop.permute.xlu0 %2383 }
 0x50c   : > { %v2501_v63 = vmul.f32 %v2384_v10, %v2309_v21 }
 0x50d   : > { %2534 = vst [vmem:[%s3768_s4 + $0x58] sm:$0xff] %v2502_v17 }
 0x50e   : > { %2533 = vst [vmem:[%s3768_s4 + $0x50] sm:$0xff] %v2501_v63  ;;  %v2399_v1 = vpop.permute.xlu1 %2398 }
 0x50f   : > { %v2504_v58 = vmul.f32 %v2399_v1, %v2312_v36  ;;  %v2394_v29 = vpop.permute.xlu0 %2393 }
 0x510   : > { %v2503_v26 = vmul.f32 %v2394_v29, %v2311_v12 }
 0x511   : > { %2536 = vst [vmem:[%s3768_s4 + $0x68] sm:$0xff] %v2504_v58 }
 0x512   : > { %2535 = vst [vmem:[%s3768_s4 + $0x60] sm:$0xff] %v2503_v26  ;;  %v2409_v13 = vpop.permute.xlu1 %2408 }
 0x513   : > { %v2506_v9 = vmul.f32 %v2409_v13, %v2314_v15  ;;  %v2404_v44 = vpop.permute.xlu0 %2403 }
 0x514   : > { %v2505_v4 = vmul.f32 %v2404_v44, %v2313_v59 }
 0x515   : > { %2538 = vst [vmem:[%s3768_s4 + $0x78] sm:$0xff] %v2506_v9 }
 0x516   : > { %2537 = vst [vmem:[%s3768_s4 + $0x70] sm:$0xff] %v2505_v4  ;;  %v2419_v24 = vpop.permute.xlu1 %2418 }
 0x517   : > { %v2508_v35 = vmul.f32 %v2419_v24, %v2316_v46  ;;  %v2414_v45 = vpop.permute.xlu0 %2413 }
 0x518   : > { %v2507_v52 = vmul.f32 %v2414_v45, %v2315_v37 }
 0x519   : > { %2540 = vst [vmem:[%s3768_s4 + $0x88] sm:$0xff] %v2508_v35 }
 0x51a   : > { %2539 = vst [vmem:[%s3768_s4 + $0x80] sm:$0xff] %v2507_v52  ;;  %v2429_v34 = vpop.permute.xlu1 %2428 }
 0x51b   : > { %v2510_v43 = vmul.f32 %v2429_v34, %v2318_v16  ;;  %v2424_v6 = vpop.permute.xlu0 %2423 }
 0x51c   : > { %v2509_v23 = vmul.f32 %v2424_v6, %v2317_v56 }
 0x51d   : > { %2542 = vst [vmem:[%s3768_s4 + $0x98] sm:$0xff] %v2510_v43 }
 0x51e   : > { %2541 = vst [vmem:[%s3768_s4 + $0x90] sm:$0xff] %v2509_v23  ;;  %v2439_v39 = vpop.permute.xlu1 %2438 }
 0x51f   : > { %v2512_v0 = vmul.f32 %v2439_v39, %v2320_v50  ;;  %v2434_v62 = vpop.permute.xlu0 %2433 }
 0x520   : > { %v2511_v51 = vmul.f32 %v2434_v62, %v2319_v28 }
 0x521   : > { %2544 = vst [vmem:[%s3768_s4 + $0xa8] sm:$0xff] %v2512_v0 }
 0x522   : > { %2543 = vst [vmem:[%s3768_s4 + $0xa0] sm:$0xff] %v2511_v51  ;;  %v2449_v20 = vpop.permute.xlu1 %2448 }
 0x523   : > { %v2514_v61 = vmul.f32 %v2449_v20, %v2322_v32  ;;  %v2444_v30 = vpop.permute.xlu0 %2443 }
 0x524   : > { %v2513_v31 = vmul.f32 %v2444_v30, %v2321_v48 }
 0x525   : > { %2546 = vst [vmem:[%s3768_s4 + $0xb8] sm:$0xff] %v2514_v61 }
 0x526   : > { %2545 = vst [vmem:[%s3768_s4 + $0xb0] sm:$0xff] %v2513_v31  ;;  %v2459_v27 = vpop.permute.xlu1 %2458 }
 0x527   : > { %v2516_v47 = vmul.f32 %v2459_v27, %v2324_v18  ;;  %v2454_v60 = vpop.permute.xlu0 %2453 }
 0x528   : > { %v2515_v40 = vmul.f32 %v2454_v60, %v2323_v2 }
 0x529   : > { %2548 = vst [vmem:[%s3768_s4 + $0xc8] sm:$0xff] %v2516_v47 }
 0x52a   : > { %2547 = vst [vmem:[%s3768_s4 + $0xc0] sm:$0xff] %v2515_v40  ;;  %v2469_v42 = vpop.permute.xlu1 %2468 }
 0x52b   : > { %v2518_v57 = vmul.f32 %v2469_v42, %v2326_v5  ;;  %v2464_v38 = vpop.permute.xlu0 %2463 }
 0x52c   : > { %v2517_v19 = vmul.f32 %v2464_v38, %v2325_v14 }
 0x52d   : > { %2550 = vst [vmem:[%s3768_s4 + $0xd8] sm:$0xff] %v2518_v57 }
 0x52e   : > { %2549 = vst [vmem:[%s3768_s4 + $0xd0] sm:$0xff] %v2517_v19  ;;  %v2479_v55 = vpop.permute.xlu1 %2478 }
 0x52f   : > { %v2520_v11 = vmul.f32 %v2479_v55, %v2328_v49  ;;  %v2474_v7 = vpop.permute.xlu0 %2473 }
 0x530   : > { %v2519_v53 = vmul.f32 %v2474_v7, %v2327_v22 }
 0x531   : > { %2552 = vst [vmem:[%s3768_s4 + $0xe8] sm:$0xff] %v2520_v11 }
 0x532   : > { %2551 = vst [vmem:[%s3768_s4 + $0xe0] sm:$0xff] %v2519_v53  ;;  %v2489_v3 = vpop.permute.xlu1 %2488 }
 0x533   : > { %v2522_v25 = vmul.f32 %v2489_v3, %v2330_v54  ;;  %v2484_v41 = vpop.permute.xlu0 %2483 }
 0x534   : > { %v2521_v21 = vmul.f32 %v2484_v41, %v2329_v33 }
 0x535   : > { %2554 = vst [vmem:[%s3768_s4 + $0xf8] sm:$0xff] %v2522_v25 }
 0x536   : > { %2553 = vst [vmem:[%s3768_s4 + $0xf0] sm:$0xff] %v2521_v21 }
 0x537 PF: > { %s5466_s19 = sld [smem:[#allocation20_spill]]  ;;  %s2571_s12 = sshll.u32 %s3768_s4, 4  ;;  %s5033_s12 = int_to_ptr.vmem [resolvable:$true] %s2571_s12 }
 0x538   : > { %s5467_s20 = sld [smem:[#allocation21_spill]]  ;;  %s2556_s15 = scalar_lea.sflag [#allocation8], %s3748_s7 }
 0x539   : > { %s5468_s29 = sld [smem:[#allocation28_spill]]  ;;  %s3322_s1 = scalar_lea.vmem %s5033_s12, 4096 }
 0x53a   : > { %s5469_s27 = sld [smem:[#allocation106_spill]]  ;;  %p3323_p9 = scmp.ne.s32.totalorder %s5033_s12, %s3322_s1 }
 0x53b   : > { %s3474_s25 = smov [#allocation12]  }
 0x53c   : > { %s3326_s16 = sshll.u32 %s3474_s25, 4  ;;  %s3327_s16 = int_to_ptr.vmem [resolvable:$false] %s3326_s16 }
 0x53d   : > { %s2740_s5 = sshll.u32 %s5466_s19, 5  ;;  %s3328_s22 = scalar_lea.vmem %s3327_s16, 8192 }
 0x53e   : > { %s2741_s9 = sshll.u32 %s5467_s20, 6  ;;  %p3329_p6 = scmp.lt.s32.totalorder %s5033_s12, %s3327_s16 }
 0x53f   : > { %s2568_s10 = sadd.s32 %s2741_s9, %s2740_s5  ;;  %p5470_p1 = scmp.ne.s32.totalorder %s5468_s29, 0 }
 0x540   : > { %s2742_s3 = sshll.u32 %s2568_s10, 7  ;;  %p3330_p0 = scmp.lt.s32.totalorder %s3328_s22, %s3322_s1 }
 0x541   : > { %s5038_s28 = scalar_lea.hbm %s5469_s27, %s2742_s3  ;;  %p3324_p13 = pnand %p3323_p9, %p5470_p1 }
 0x542   : > { %p3331_p11 = por %p3330_p0, %p3329_p6 }
 0x543   : > { %p3325_p7 = pneg %p3324_p13 }
 0x545   : > { %p3332_p4 = pnand %p3331_p11, %p3325_p7 }
 0x547   : > { %3335 = shalt.err (!%p3332_p4)
}
 0x548   : > { %s3336_s18 = scalar_lea.hbm %s5038_s28, 4096  ;;  %s3340_s11 = scalar_lea.hbm %s5469_s27, 16384 }
 0x549   : > { %p3337_p3 = scmp.ne.s32.totalorder %s5038_s28, %s3336_s18  ;;  %p3341_p8 = scmp.lt.s32.totalorder %s5038_s28, %s5469_s27 }
 0x54a   : > { %p3342_p12 = scmp.lt.s32.totalorder %s3340_s11, %s3336_s18 }
 0x54b   : > { %p3338_p5 = pnand %p3337_p3, %p5470_p1 }
 0x54c   : > { %p3343_p10 = por %p3342_p12, %p3341_p8 }
 0x54d   : > { %p3339_p2 = pneg %p3338_p5 }
 0x54f   : > { %p3344_p9 = pnand %p3343_p10, %p3339_p2 }
 0x551   : > { %3347 = shalt.err (!%p3344_p9)
}
 0x552   : > { %s3475_s5 = smov 128   ;;  %s3476_s9 = smov 8  }
 0x553   : > { %2847 = dma.vmem_to_hbm [thread:$0]  (%p5470_p1), %s5033_s12, 4096, %s5038_s28, %s2556_s15, %s3475_s5, %s3475_s5, %s3476_s9  }
 0x554 PF: > { %s5471_s10 = sld [smem:[#allocation17_spill]]  ;;  %p2864_p13 = scmp.ge.s32.totalorder %s3462_s24, 2 }
 0x555   : > { %s5472_s3 = sld [smem:[#allocation30_spill]] }
 0x55a   : > { %s2586_s8 = sand.u32 1, %s5471_s10  }
 0x55b   : > { %p5473_p7 = scmp.ne.s32.totalorder %s5472_s3, 0  ;;  %s2587_s2 = scalar_lea.sflag [#allocation8], %s2586_s8 }
 0x55d   : > { %p2860_p6 = pnand %p2864_p13, %p5473_p7 }
 0x55f   : > { %p2861_p0 = pneg %p2860_p6 }
 0x561   : > { %3409 = dma.done.wait (%p2861_p0), %s2587_s2, 4096  }
 0x562   : > { %3411 = vsyncadd (%p2861_p0), %s2587_s2, 4294963200  ;;  %s22_s24 = sadd.s32 1, %s3462_s24   ;;  %s5475_s12 = sld [smem:[#allocation16_spill]] }
 0x563   : > { %p5068_p11 = scmp.ge.s32.totalorder %s22_s24, 10   ;;  %s5476_s15 = sld [smem:[#allocation18_spill]] }
 0x564   : > { %s5477_s7 = smov %s3695_s13  ;;  %s5478_s19 = sld [smem:[#allocation22_spill]] }
 0x565   : > { %s5479_s22 = sld [smem:[#allocation27_spill]]  ;;  %s5481_s13 = smov %s3422_s14 }
 0x566   : > { %s5480_s29 = sld [smem:[#allocation29_spill]]  ;;  %s5482_s14 = smov %s3700_s30 }
 0x567   : > { %s5483_s16 = smov %s3434_s17  ;;  %s5484_s17 = smov %s5477_s7 }
 0x568   : > { %s5485_s18 = smov %s3450_s21  ;;  %s5486_s20 = smov %s3458_s23 }
 0x569   : > { %s5487_s21 = smov %s5490_s26  ;;  %21 = sbr.rel (!%p5068_p11) target bundleno = 16 (0x10), region = 109 }
 0x56c   : > { %s5488_s23 = smov %s5480_s29 }
 0x56e   :  { %2592 = vsyncpa [#allocation7], 1 }
 0x56f   :  { %2594 = vsyncpa [#allocation7 + $0x1], 1 }
 0x570   :  { %2595 = vsyncpa [#allocation10], 1 }
 0x571   :  { %2597 = vsyncpa [#allocation10 + $0x1], 1 }
 0x572   :  { %2598 = vsyncpa [#allocation8], 1 }
 0x573   :  { %2600 = vsyncpa [#allocation8 + $0x1], 1 }

</bundles_post_ra>
